<compile_context>
chip_gen: v6e
topology: v6e:2x2x1
jax: 0.10.0
libtpu: 0.0.40
codegen_flags: <defaults>
</compile_context>

<pallas_src>
import functools

import jax
import jax.numpy as jnp
import numpy as np
from jax.experimental import pallas as pl
from jax.experimental.pallas import tpu as pltpu


def _round_up(v, m):
    return (v + m - 1) // m * m


# ------------------------------- fused kernel --------------------------------

def _resa_unit_kernel(*refs, s, A, Ho, Wo, resize_identity):
    """One grid step processes one image.

    refs = (x, mask, w1, b1, w2, b2, w3, b3, [wid, bid], out, y1_scratch)

    x is the space-to-batch split of the 1-padded NHWC image: shape
    (1, s*s*A, Bp, Cin) where plane p = ph*s+pw holds padded-row indices r = a*s+ph and
    padded-col indices c = b*s+pw.  With that layout every 3x3 tap of the strided conv2
    and every avg-pool tap is a dense static slice.
    """
    if resize_identity:
        (x_ref, mask_ref, w1_ref, b1_ref, w2_ref, b2_ref, w3_ref, b3_ref,
         wid_ref, bid_ref, o_ref, y1s_ref) = refs
    else:
        (x_ref, mask_ref, w1_ref, b1_ref, w2_ref, b2_ref, w3_ref, b3_ref,
         o_ref, y1s_ref) = refs

    P = s * s
    Bp = x_ref.shape[2]
    Cin = x_ref.shape[3]
    midP = w1_ref.shape[1]
    Cout = w3_ref.shape[1]

    # conv1 (1x1, BN scale folded into weights) + bias + ReLU, per parity plane.
    # The mask zeroes the positions forming conv2's zero-padding ring, so the 3x3 taps
    # below see exact zero padding (bias/ReLU must not leak into the pad ring).
    for p in range(P):
        xp = x_ref[0, p * A:(p + 1) * A, :, :].reshape(A * Bp, Cin)
        y1 = jnp.dot(xp, w1_ref[...], preferred_element_type=jnp.float32)
        y1 = jnp.maximum(y1 + b1_ref[...], 0.0) * mask_ref[p * A * Bp:(p + 1) * A * Bp, :]
        y1s_ref[p * A:(p + 1) * A, :, :] = y1.reshape(A, Bp, midP).astype(y1s_ref.dtype)

    # conv2 (3x3, stride s, pad 1): 9 accumulating MXU matmuls over shifted windows of
    # the conv1 output kept in VMEM (no HBM im2col).
    acc = jnp.zeros((Ho * Wo, midP), jnp.float32)
    for kh in range(3):
        for kw in range(3):
            p = (kh % s) * s + (kw % s)
            r0 = p * A + kh // s
            c0 = kw // s
            tap = y1s_ref[r0:r0 + Ho, c0:c0 + Wo, :].reshape(Ho * Wo, midP)
            acc = acc + jnp.dot(tap, w2_ref[kh * 3 + kw],
                                preferred_element_type=jnp.float32)
    y2 = jnp.maximum(acc + b2_ref[...], 0.0).astype(jnp.bfloat16)

    # conv3 (1x1) + bias (activation comes after the residual add).
    y3 = jnp.dot(y2, w3_ref[...], preferred_element_type=jnp.float32) + b3_ref[...]

    # identity branch
    if resize_identity:
        # AvgPool(kernel=stride, stride=stride) + 1x1 conv + folded BN (no activation),
        # taps read straight from the split input (no HBM tap tensor).
        pooled = jnp.zeros((Ho, Wo, Cin), jnp.float32)
        for di in range(s):
            for dj in range(s):
                p = ((di + 1) % s) * s + ((dj + 1) % s)
                r0 = p * A + (di + 1) // s
                c0 = (dj + 1) // s
                pooled = pooled + x_ref[0, r0:r0 + Ho, c0:c0 + Wo, :].astype(jnp.float32)
        pooled = (pooled * (1.0 / (s * s))).astype(jnp.bfloat16).reshape(Ho * Wo, Cin)
        ident = jnp.dot(pooled, wid_ref[...],
                        preferred_element_type=jnp.float32) + bid_ref[...]
    else:
        # stride == 1 and Cin == Cout: plain passthrough (interior of the padded split).
        ident = x_ref[0, 1:1 + Ho, 1:1 + Wo, :].astype(jnp.float32).reshape(Ho * Wo, Cout)

    out = jnp.maximum(y3 + ident, 0.0)
    o_ref[...] = out.reshape(1, Ho, Wo, Cout).astype(o_ref.dtype)


# ------------------------------- wrapper --------------------------------------

def _const_index_map(ndim):
    def index_map(n):
        return (0,) * ndim
    return index_map


def resa_unit_forward(x_nchw, params, stride):
    """ResAUnit forward (bottleneck=True, conv1_stride=False, padding=1, dilation=1)."""
    # TODO(synk): dilation != 1 (which switches the identity pool to kernel_size=1) and
    # ragged ceil_mode/count_include_pad pooling for H,W not divisible by the stride are
    # not implemented; the shapes used here divide evenly so semantics match PyTorch.
    x = jnp.transpose(x_nchw, (0, 2, 3, 1)).astype(jnp.bfloat16)  # NCHW -> NHWC, bf16 MXU operands
    N, H, W, Cin = x.shape
    s = int(stride)
    assert H % s == 0 and W % s == 0, "spatial dims must be divisible by the stride"
    Ho, Wo = H // s, W // s
    midP = params["w1p"].shape[1]
    Cout = params["w3p"].shape[1]
    resize_identity = (Cin != Cout) or (s != 1)

    P = s * s
    A = -(-(H + 2) // s)            # rows per parity plane of the 1-padded image
    B = -(-(W + 2) // s)            # cols per parity plane
    Bp = _round_up(B, 8)            # sublane-align the plane width

    # Index-only glue: zero-pad by 1 and space-to-batch into s*s parity planes so every
    # 3x3 / pooling tap inside the kernel is a dense static VMEM slice (stride-free).
    xpad = jnp.pad(x, ((0, 0), (1, 1), (1, 1), (0, 0)))
    xpad = jnp.pad(xpad, ((0, 0), (0, A * s - (H + 2)), (0, B * s - (W + 2)), (0, 0)))
    xs = xpad.reshape(N, A, s, B, s, Cin).transpose(0, 2, 4, 1, 3, 5)
    xs = xs.reshape(N, P, A, B, Cin)
    xs = jnp.pad(xs, ((0, 0), (0, 0), (0, 0), (0, Bp - B), (0, 0)))
    xs = xs.reshape(N, P * A, Bp, Cin)

    # Static 0/1 mask of split positions that hold a real (non-padding) pixel.
    mask = np.zeros((P, A, Bp), np.float32)
    for ph in range(s):
        for pw in range(s):
            for a in range(A):
                for b in range(B):
                    r, c = a * s + ph, b * s + pw
                    if 1 <= r <= H and 1 <= c <= W:
                        mask[ph * s + pw, a, b] = 1.0
    mask = jnp.asarray(mask.reshape(P * A * Bp, 1))

    kernel = functools.partial(_resa_unit_kernel, s=s, A=A, Ho=Ho, Wo=Wo,
                               resize_identity=resize_identity)

    const_inputs = [mask, params["w1p"], params["b1p"], params["w2p"], params["b2p"],
                    params["w3p"], params["b3p"]]
    if resize_identity:
        const_inputs += [params["widp"], params["bidp"]]

    in_specs = [pl.BlockSpec((1, P * A, Bp, Cin), lambda n: (n, 0, 0, 0))]
    in_specs += [pl.BlockSpec(a.shape, _const_index_map(a.ndim)) for a in const_inputs]

    out = pl.pallas_call(
        kernel,
        out_shape=jax.ShapeDtypeStruct((N, Ho, Wo, Cout), jnp.float32),
        grid=(N,),
        in_specs=in_specs,
        out_specs=pl.BlockSpec((1, Ho, Wo, Cout), lambda n: (n, 0, 0, 0)),
        scratch_shapes=[pltpu.VMEM((P * A, Bp, midP), jnp.bfloat16)],
        compiler_params=pltpu.CompilerParams(
            dimension_semantics=("parallel",),
            vmem_limit_bytes=32 * 1024 * 1024),
    )(xs, *const_inputs)

    return jnp.transpose(out, (0, 3, 1, 2))  # NHWC -> NCHW


# ------------------------------- parameters -----------------------------------

def _bn_affine(key, c, eps=1e-5):
    k1, k2, k3, k4 = jax.random.split(key, 4)
    gamma = jax.random.uniform(k1, (c,), minval=0.5, maxval=1.5)
    beta = 0.1 * jax.random.normal(k2, (c,))
    mean = 0.1 * jax.random.normal(k3, (c,))
    var = jax.random.uniform(k4, (c,), minval=0.5, maxval=1.5)
    scale = gamma / jnp.sqrt(var + eps)
    bias = beta - mean * scale
    return scale.astype(jnp.float32), bias.astype(jnp.float32)


def init_params(key, in_channels, out_channels):
    mid = out_channels // 4                       # bottleneck_factor = 4
    midP = _round_up(mid, 128)                    # lane-dense internal width
    ks = jax.random.split(key, 8)
    w1 = (0.1 * jax.random.normal(ks[0], (1, 1, in_channels, mid))).astype(jnp.float32)
    w2 = (0.1 * jax.random.normal(ks[1], (3, 3, mid, mid))).astype(jnp.float32)
    w3 = (0.1 * jax.random.normal(ks[2], (1, 1, mid, out_channels))).astype(jnp.float32)
    wid = (0.1 * jax.random.normal(ks[3], (1, 1, in_channels, out_channels))).astype(jnp.float32)
    s1, b1 = _bn_affine(ks[4], mid)
    s2, b2 = _bn_affine(ks[5], mid)
    s3, b3 = _bn_affine(ks[6], out_channels)
    sid, bid = _bn_affine(ks[7], out_channels)

    # Fold the BN scale into the conv weights once (per output channel); keep the bias.
    w1f = (w1 * s1).astype(jnp.bfloat16)
    w2f = (w2 * s2).astype(jnp.bfloat16)
    w3f = (w3 * s3).astype(jnp.bfloat16)
    widf = (wid * sid).astype(jnp.bfloat16)

    pad_m = midP - mid
    return dict(
        # bf16, channel-padded weights + f32 biases consumed by the fused kernel
        w1p=jnp.pad(w1f.reshape(in_channels, mid), ((0, 0), (0, pad_m))),
        b1p=jnp.pad(b1, (0, pad_m)).reshape(1, midP),
        w2p=jnp.pad(w2f.reshape(9, mid, mid), ((0, 0), (0, pad_m), (0, pad_m))),
        b2p=jnp.pad(b2, (0, pad_m)).reshape(1, midP),
        w3p=jnp.pad(w3f.reshape(mid, out_channels), ((0, pad_m), (0, 0))),
        b3p=b3.reshape(1, out_channels),
        widp=widf.reshape(in_channels, out_channels),
        bidp=bid.reshape(1, out_channels),
        # the same (bf16-rounded) folded weights in f32 HWIO for the pure-JAX reference
        w1_hwio=w1f.astype(jnp.float32), w2_hwio=w2f.astype(jnp.float32),
        w3_hwio=w3f.astype(jnp.float32), wid_hwio=widf.astype(jnp.float32),
        b1=b1, b2=b2, b3=b3, bid=bid,
    )


# ---------------------------- pure-JAX reference -------------------------------

def ref_forward(x_nchw, p, stride):
    x = jnp.transpose(x_nchw, (0, 2, 3, 1)).astype(jnp.bfloat16).astype(jnp.float32)
    s = int(stride)

    def conv(v, w, st, pad):
        return jax.lax.conv_general_dilated(
            v, w, (st, st), [(pad, pad), (pad, pad)],
            dimension_numbers=("NHWC", "HWIO", "NHWC"),
            precision=jax.lax.Precision.HIGHEST)

    y = jnp.maximum(conv(x, p["w1_hwio"], 1, 0) + p["b1"], 0.0)
    y = jnp.maximum(conv(y, p["w2_hwio"], s, 1) + p["b2"], 0.0)
    y = conv(y, p["w3_hwio"], 1, 0) + p["b3"]

    N, H, W, Cin = x.shape
    Cout = p["w3_hwio"].shape[-1]
    if (Cin != Cout) or (s != 1):
        Ho, Wo = H // s, W // s
        pooled = x.reshape(N, Ho, s, Wo, s, Cin).mean(axis=(2, 4))
        ident = conv(pooled, p["wid_hwio"], 1, 0) + p["bid"]
    else:
        ident = x
    out = jnp.maximum(y + ident, 0.0)
    return jnp.transpose(out, (0, 3, 1, 2))


# ------------------------------------ main -------------------------------------

if __name__ == "__main__":
    key = jax.random.PRNGKey(0)
    kx, kp, kx2, kp2 = jax.random.split(key, 4)

    # primary config: downsampling unit (resize identity: stride 2, Cin != Cout)
    N_, Cin, Cout, H_, W_, stride = 2, 16, 32, 16, 16, 2
    x = jax.random.normal(kx, (N_, Cin, H_, W_), dtype=jnp.float32)  # NCHW, like PyTorch
    params = init_params(kp, Cin, Cout)
    out = jax.block_until_ready(resa_unit_forward(x, params, stride))
    ref = ref_forward(x, params, stride)
    np.testing.assert_allclose(np.asarray(out), np.asarray(ref), rtol=1e-2, atol=1e-2)

    # secondary config: identity passthrough (stride 1, Cin == Cout)
    N2, C2, H2, W2 = 2, 32, 8, 8
    x2 = jax.random.normal(kx2, (N2, C2, H2, W2), dtype=jnp.float32)
    params2 = init_params(kp2, C2, C2)
    out2 = jax.block_until_ready(resa_unit_forward(x2, params2, 1))
    ref2 = ref_forward(x2, params2, 1)
    np.testing.assert_allclose(np.asarray(out2), np.asarray(ref2), rtol=1e-2, atol=1e-2)

    print("KERNEL_OK")
</pallas_src>

<mosaic_0001>
module attributes {stable_mosaic.version = 11 : i64} {
  func.func @_resa_unit_kernel(%arg0: i32, %arg1: memref<1x36x16x16xbf16, #tpu.memory_space<vmem>>, %arg2: memref<576x1xf32, #tpu.memory_space<vmem>>, %arg3: memref<16x128xbf16, #tpu.memory_space<vmem>>, %arg4: memref<1x128xf32, #tpu.memory_space<vmem>>, %arg5: memref<9x128x128xbf16, #tpu.memory_space<vmem>>, %arg6: memref<1x128xf32, #tpu.memory_space<vmem>>, %arg7: memref<128x32xbf16, #tpu.memory_space<vmem>>, %arg8: memref<1x32xf32, #tpu.memory_space<vmem>>, %arg9: memref<16x32xbf16, #tpu.memory_space<vmem>>, %arg10: memref<1x32xf32, #tpu.memory_space<vmem>>, %arg11: memref<1x8x8x32xf32, #tpu.memory_space<vmem>>, %arg12: memref<36x16x128xbf16, #tpu.memory_space<vmem>>) attributes {dimension_semantics = [#tpu.dimension_semantics<parallel>], iteration_bounds = array<i64: 2>, scalar_prefetch = 0 : i64, scratch_operands = 1 : i64, tpu.core_type = #tpu.core_type<tc>, window_params = [{transform_indices = @transform_0, window_bounds = array<i64: 1, 36, 16, 16>}, {pipeline_mode = #tpu.pipeline_mode<synchronous>, transform_indices = @transform_1, window_bounds = array<i64: 576, 1>}, {pipeline_mode = #tpu.pipeline_mode<synchronous>, transform_indices = @transform_2, window_bounds = array<i64: 16, 128>}, {pipeline_mode = #tpu.pipeline_mode<synchronous>, transform_indices = @transform_3, window_bounds = array<i64: 1, 128>}, {pipeline_mode = #tpu.pipeline_mode<synchronous>, transform_indices = @transform_4, window_bounds = array<i64: 9, 128, 128>}, {pipeline_mode = #tpu.pipeline_mode<synchronous>, transform_indices = @transform_5, window_bounds = array<i64: 1, 128>}, {pipeline_mode = #tpu.pipeline_mode<synchronous>, transform_indices = @transform_6, window_bounds = array<i64: 128, 32>}, {pipeline_mode = #tpu.pipeline_mode<synchronous>, transform_indices = @transform_7, window_bounds = array<i64: 1, 32>}, {pipeline_mode = #tpu.pipeline_mode<synchronous>, transform_indices = @transform_8, window_bounds = array<i64: 16, 32>}, {pipeline_mode = #tpu.pipeline_mode<synchronous>, transform_indices = @transform_9, window_bounds = array<i64: 1, 32>}, {transform_indices = @transform_10, window_bounds = array<i64: 1, 8, 8, 32>}]} {
    %c0 = arith.constant 0 : index
    %c0_0 = arith.constant 0 : index
    %c0_1 = arith.constant 0 : index
    %c0_2 = arith.constant 0 : index
    %0 = vector.load %arg1[%c0, %c0_0, %c0_1, %c0_2] : memref<1x36x16x16xbf16, #tpu.memory_space<vmem>>, vector<1x9x16x16xbf16>
    %1 = vector.shape_cast %0 : vector<1x9x16x16xbf16> to vector<9x16x16xbf16>
    %2 = vector.shape_cast %1 : vector<9x16x16xbf16> to vector<144x16xbf16>
    %c0_3 = arith.constant 0 : index
    %c0_4 = arith.constant 0 : index
    %3 = vector.load %arg3[%c0_3, %c0_4] : memref<16x128xbf16, #tpu.memory_space<vmem>>, vector<16x128xbf16>
    %cst = arith.constant dense<0.000000e+00> : vector<144x128xf32>
    %4 = tpu.matmul %2, %3, %cst {dimension_numbers = #tpu.dot_dimension_numbers<[1], [0], [0], [1], [0, 0, 1, 1], [], []>} : vector<144x16xbf16>, vector<16x128xbf16>, vector<144x128xf32> -> vector<144x128xf32>
    %c0_5 = arith.constant 0 : index
    %c0_6 = arith.constant 0 : index
    %5 = vector.load %arg4[%c0_5, %c0_6] : memref<1x128xf32, #tpu.memory_space<vmem>>, vector<1x128xf32>
    %6 = vector.broadcast %5 : vector<1x128xf32> to vector<144x128xf32>
    %7 = arith.addf %4, %6 : vector<144x128xf32>
    %cst_7 = arith.constant 0.000000e+00 : f32
    %8 = vector.broadcast %cst_7 : f32 to vector<144x128xf32>
    %9 = arith.maximumf %7, %8 : vector<144x128xf32>
    %c0_8 = arith.constant 0 : index
    %c0_9 = arith.constant 0 : index
    %10 = vector.load %arg2[%c0_8, %c0_9] : memref<576x1xf32, #tpu.memory_space<vmem>>, vector<144x1xf32>
    %11 = vector.broadcast %10 : vector<144x1xf32> to vector<144x128xf32>
    %12 = arith.mulf %9, %11 : vector<144x128xf32>
    %13 = vector.shape_cast %12 : vector<144x128xf32> to vector<9x16x128xf32>
    %14 = arith.truncf %13 : vector<9x16x128xf32> to vector<9x16x128xbf16>
    %c0_10 = arith.constant 0 : index
    %c0_11 = arith.constant 0 : index
    %c0_12 = arith.constant 0 : index
    %15 = vector.load %arg12[%c0_10, %c0_11, %c0_12] : memref<36x16x128xbf16, #tpu.memory_space<vmem>>, vector<9x16x128xbf16>
    tpu.vector_store %arg12[%c0_10, %c0_11, %c0_12], %14 {strides = array<i32>} : memref<36x16x128xbf16, #tpu.memory_space<vmem>>, vector<9x16x128xbf16>,
    %c0_13 = arith.constant 0 : index
    %c9 = arith.constant 9 : index
    %c0_14 = arith.constant 0 : index
    %c0_15 = arith.constant 0 : index
    %16 = vector.load %arg1[%c0_13, %c9, %c0_14, %c0_15] : memref<1x36x16x16xbf16, #tpu.memory_space<vmem>>, vector<1x9x16x16xbf16>
    %17 = vector.shape_cast %16 : vector<1x9x16x16xbf16> to vector<9x16x16xbf16>
    %18 = vector.shape_cast %17 : vector<9x16x16xbf16> to vector<144x16xbf16>
    %c0_16 = arith.constant 0 : index
    %c0_17 = arith.constant 0 : index
    %19 = vector.load %arg3[%c0_16, %c0_17] : memref<16x128xbf16, #tpu.memory_space<vmem>>, vector<16x128xbf16>
    %cst_18 = arith.constant dense<0.000000e+00> : vector<144x128xf32>
    %20 = tpu.matmul %18, %19, %cst_18 {dimension_numbers = #tpu.dot_dimension_numbers<[1], [0], [0], [1], [0, 0, 1, 1], [], []>} : vector<144x16xbf16>, vector<16x128xbf16>, vector<144x128xf32> -> vector<144x128xf32>
    %c0_19 = arith.constant 0 : index
    %c0_20 = arith.constant 0 : index
    %21 = vector.load %arg4[%c0_19, %c0_20] : memref<1x128xf32, #tpu.memory_space<vmem>>, vector<1x128xf32>
    %22 = vector.broadcast %21 : vector<1x128xf32> to vector<144x128xf32>
    %23 = arith.addf %20, %22 : vector<144x128xf32>
    %cst_21 = arith.constant 0.000000e+00 : f32
    %24 = vector.broadcast %cst_21 : f32 to vector<144x128xf32>
    %25 = arith.maximumf %23, %24 : vector<144x128xf32>
    %c144 = arith.constant 144 : index
    %c0_22 = arith.constant 0 : index
    %26 = vector.load %arg2[%c144, %c0_22] : memref<576x1xf32, #tpu.memory_space<vmem>>, vector<144x1xf32>
    %27 = vector.broadcast %26 : vector<144x1xf32> to vector<144x128xf32>
    %28 = arith.mulf %25, %27 : vector<144x128xf32>
    %29 = vector.shape_cast %28 : vector<144x128xf32> to vector<9x16x128xf32>
    %30 = arith.truncf %29 : vector<9x16x128xf32> to vector<9x16x128xbf16>
    %c9_23 = arith.constant 9 : index
    %c0_24 = arith.constant 0 : index
    %c0_25 = arith.constant 0 : index
    %31 = vector.load %arg12[%c9_23, %c0_24, %c0_25] : memref<36x16x128xbf16, #tpu.memory_space<vmem>>, vector<9x16x128xbf16>
    tpu.vector_store %arg12[%c9_23, %c0_24, %c0_25], %30 {strides = array<i32>} : memref<36x16x128xbf16, #tpu.memory_space<vmem>>, vector<9x16x128xbf16>,
    %c0_26 = arith.constant 0 : index
    %c18 = arith.constant 18 : index
    %c0_27 = arith.constant 0 : index
    %c0_28 = arith.constant 0 : index
    %32 = vector.load %arg1[%c0_26, %c18, %c0_27, %c0_28] : memref<1x36x16x16xbf16, #tpu.memory_space<vmem>>, vector<1x9x16x16xbf16>
    %33 = vector.shape_cast %32 : vector<1x9x16x16xbf16> to vector<9x16x16xbf16>
    %34 = vector.shape_cast %33 : vector<9x16x16xbf16> to vector<144x16xbf16>
    %c0_29 = arith.constant 0 : index
    %c0_30 = arith.constant 0 : index
    %35 = vector.load %arg3[%c0_29, %c0_30] : memref<16x128xbf16, #tpu.memory_space<vmem>>, vector<16x128xbf16>
    %cst_31 = arith.constant dense<0.000000e+00> : vector<144x128xf32>
    %36 = tpu.matmul %34, %35, %cst_31 {dimension_numbers = #tpu.dot_dimension_numbers<[1], [0], [0], [1], [0, 0, 1, 1], [], []>} : vector<144x16xbf16>, vector<16x128xbf16>, vector<144x128xf32> -> vector<144x128xf32>
    %c0_32 = arith.constant 0 : index
    %c0_33 = arith.constant 0 : index
    %37 = vector.load %arg4[%c0_32, %c0_33] : memref<1x128xf32, #tpu.memory_space<vmem>>, vector<1x128xf32>
    %38 = vector.broadcast %37 : vector<1x128xf32> to vector<144x128xf32>
    %39 = arith.addf %36, %38 : vector<144x128xf32>
    %cst_34 = arith.constant 0.000000e+00 : f32
    %40 = vector.broadcast %cst_34 : f32 to vector<144x128xf32>
    %41 = arith.maximumf %39, %40 : vector<144x128xf32>
    %c288 = arith.constant 288 : index
    %c0_35 = arith.constant 0 : index
    %42 = vector.load %arg2[%c288, %c0_35] : memref<576x1xf32, #tpu.memory_space<vmem>>, vector<144x1xf32>
    %43 = vector.broadcast %42 : vector<144x1xf32> to vector<144x128xf32>
    %44 = arith.mulf %41, %43 : vector<144x128xf32>
    %45 = vector.shape_cast %44 : vector<144x128xf32> to vector<9x16x128xf32>
    %46 = arith.truncf %45 : vector<9x16x128xf32> to vector<9x16x128xbf16>
    %c18_36 = arith.constant 18 : index
    %c0_37 = arith.constant 0 : index
    %c0_38 = arith.constant 0 : index
    %47 = vector.load %arg12[%c18_36, %c0_37, %c0_38] : memref<36x16x128xbf16, #tpu.memory_space<vmem>>, vector<9x16x128xbf16>
    tpu.vector_store %arg12[%c18_36, %c0_37, %c0_38], %46 {strides = array<i32>} : memref<36x16x128xbf16, #tpu.memory_space<vmem>>, vector<9x16x128xbf16>,
    %c0_39 = arith.constant 0 : index
    %c27 = arith.constant 27 : index
    %c0_40 = arith.constant 0 : index
    %c0_41 = arith.constant 0 : index
    %48 = vector.load %arg1[%c0_39, %c27, %c0_40, %c0_41] : memref<1x36x16x16xbf16, #tpu.memory_space<vmem>>, vector<1x9x16x16xbf16>
    %49 = vector.shape_cast %48 : vector<1x9x16x16xbf16> to vector<9x16x16xbf16>
    %50 = vector.shape_cast %49 : vector<9x16x16xbf16> to vector<144x16xbf16>
    %c0_42 = arith.constant 0 : index
    %c0_43 = arith.constant 0 : index
    %51 = vector.load %arg3[%c0_42, %c0_43] : memref<16x128xbf16, #tpu.memory_space<vmem>>, vector<16x128xbf16>
    %cst_44 = arith.constant dense<0.000000e+00> : vector<144x128xf32>
    %52 = tpu.matmul %50, %51, %cst_44 {dimension_numbers = #tpu.dot_dimension_numbers<[1], [0], [0], [1], [0, 0, 1, 1], [], []>} : vector<144x16xbf16>, vector<16x128xbf16>, vector<144x128xf32> -> vector<144x128xf32>
    %c0_45 = arith.constant 0 : index
    %c0_46 = arith.constant 0 : index
    %53 = vector.load %arg4[%c0_45, %c0_46] : memref<1x128xf32, #tpu.memory_space<vmem>>, vector<1x128xf32>
    %54 = vector.broadcast %53 : vector<1x128xf32> to vector<144x128xf32>
    %55 = arith.addf %52, %54 : vector<144x128xf32>
    %cst_47 = arith.constant 0.000000e+00 : f32
    %56 = vector.broadcast %cst_47 : f32 to vector<144x128xf32>
    %57 = arith.maximumf %55, %56 : vector<144x128xf32>
    %c432 = arith.constant 432 : index
    %c0_48 = arith.constant 0 : index
    %58 = vector.load %arg2[%c432, %c0_48] : memref<576x1xf32, #tpu.memory_space<vmem>>, vector<144x1xf32>
    %59 = vector.broadcast %58 : vector<144x1xf32> to vector<144x128xf32>
    %60 = arith.mulf %57, %59 : vector<144x128xf32>
    %61 = vector.shape_cast %60 : vector<144x128xf32> to vector<9x16x128xf32>
    %62 = arith.truncf %61 : vector<9x16x128xf32> to vector<9x16x128xbf16>
    %c27_49 = arith.constant 27 : index
    %c0_50 = arith.constant 0 : index
    %c0_51 = arith.constant 0 : index
    %63 = vector.load %arg12[%c27_49, %c0_50, %c0_51] : memref<36x16x128xbf16, #tpu.memory_space<vmem>>, vector<9x16x128xbf16>
    tpu.vector_store %arg12[%c27_49, %c0_50, %c0_51], %62 {strides = array<i32>} : memref<36x16x128xbf16, #tpu.memory_space<vmem>>, vector<9x16x128xbf16>,
    %cst_52 = arith.constant 0.000000e+00 : f32
    %64 = vector.broadcast %cst_52 : f32 to vector<64x128xf32>
    %c0_53 = arith.constant 0 : index
    %c0_54 = arith.constant 0 : index
    %c0_55 = arith.constant 0 : index
    %65 = vector.load %arg12[%c0_53, %c0_54, %c0_55] : memref<36x16x128xbf16, #tpu.memory_space<vmem>>, vector<8x8x128xbf16>
    %66 = vector.shape_cast %65 : vector<8x8x128xbf16> to vector<64x128xbf16>
    %c0_56 = arith.constant 0 : index
    %c0_57 = arith.constant 0 : index
    %c0_58 = arith.constant 0 : index
    %67 = vector.load %arg5[%c0_56, %c0_57, %c0_58] : memref<9x128x128xbf16, #tpu.memory_space<vmem>>, vector<1x128x128xbf16>
    %68 = vector.shape_cast %67 : vector<1x128x128xbf16> to vector<128x128xbf16>
    %cst_59 = arith.constant dense<0.000000e+00> : vector<64x128xf32>
    %69 = tpu.matmul %66, %68, %cst_59 {dimension_numbers = #tpu.dot_dimension_numbers<[1], [0], [0], [1], [0, 0, 1, 1], [], []>} : vector<64x128xbf16>, vector<128x128xbf16>, vector<64x128xf32> -> vector<64x128xf32>
    %70 = arith.addf %64, %69 : vector<64x128xf32>
    %c9_60 = arith.constant 9 : index
    %c0_61 = arith.constant 0 : index
    %c0_62 = arith.constant 0 : index
    %71 = vector.load %arg12[%c9_60, %c0_61, %c0_62] : memref<36x16x128xbf16, #tpu.memory_space<vmem>>, vector<8x8x128xbf16>
    %72 = vector.shape_cast %71 : vector<8x8x128xbf16> to vector<64x128xbf16>
    %c1 = arith.constant 1 : index
    %c0_63 = arith.constant 0 : index
    %c0_64 = arith.constant 0 : index
    %73 = vector.load %arg5[%c1, %c0_63, %c0_64] : memref<9x128x128xbf16, #tpu.memory_space<vmem>>, vector<1x128x128xbf16>
    %74 = vector.shape_cast %73 : vector<1x128x128xbf16> to vector<128x128xbf16>
    %cst_65 = arith.constant dense<0.000000e+00> : vector<64x128xf32>
    %75 = tpu.matmul %72, %74, %cst_65 {dimension_numbers = #tpu.dot_dimension_numbers<[1], [0], [0], [1], [0, 0, 1, 1], [], []>} : vector<64x128xbf16>, vector<128x128xbf16>, vector<64x128xf32> -> vector<64x128xf32>
    %76 = arith.addf %70, %75 : vector<64x128xf32>
    %c0_66 = arith.constant 0 : index
    %c1_67 = arith.constant 1 : index
    %c0_68 = arith.constant 0 : index
    %77 = vector.load %arg12[%c0_66, %c1_67, %c0_68] : memref<36x16x128xbf16, #tpu.memory_space<vmem>>, vector<8x8x128xbf16>
    %78 = vector.shape_cast %77 : vector<8x8x128xbf16> to vector<64x128xbf16>
    %c2 = arith.constant 2 : index
    %c0_69 = arith.constant 0 : index
    %c0_70 = arith.constant 0 : index
    %79 = vector.load %arg5[%c2, %c0_69, %c0_70] : memref<9x128x128xbf16, #tpu.memory_space<vmem>>, vector<1x128x128xbf16>
    %80 = vector.shape_cast %79 : vector<1x128x128xbf16> to vector<128x128xbf16>
    %cst_71 = arith.constant dense<0.000000e+00> : vector<64x128xf32>
    %81 = tpu.matmul %78, %80, %cst_71 {dimension_numbers = #tpu.dot_dimension_numbers<[1], [0], [0], [1], [0, 0, 1, 1], [], []>} : vector<64x128xbf16>, vector<128x128xbf16>, vector<64x128xf32> -> vector<64x128xf32>
    %82 = arith.addf %76, %81 : vector<64x128xf32>
    %c18_72 = arith.constant 18 : index
    %c0_73 = arith.constant 0 : index
    %c0_74 = arith.constant 0 : index
    %83 = vector.load %arg12[%c18_72, %c0_73, %c0_74] : memref<36x16x128xbf16, #tpu.memory_space<vmem>>, vector<8x8x128xbf16>
    %84 = vector.shape_cast %83 : vector<8x8x128xbf16> to vector<64x128xbf16>
    %c3 = arith.constant 3 : index
    %c0_75 = arith.constant 0 : index
    %c0_76 = arith.constant 0 : index
    %85 = vector.load %arg5[%c3, %c0_75, %c0_76] : memref<9x128x128xbf16, #tpu.memory_space<vmem>>, vector<1x128x128xbf16>
    %86 = vector.shape_cast %85 : vector<1x128x128xbf16> to vector<128x128xbf16>
    %cst_77 = arith.constant dense<0.000000e+00> : vector<64x128xf32>
    %87 = tpu.matmul %84, %86, %cst_77 {dimension_numbers = #tpu.dot_dimension_numbers<[1], [0], [0], [1], [0, 0, 1, 1], [], []>} : vector<64x128xbf16>, vector<128x128xbf16>, vector<64x128xf32> -> vector<64x128xf32>
    %88 = arith.addf %82, %87 : vector<64x128xf32>
    %c27_78 = arith.constant 27 : index
    %c0_79 = arith.constant 0 : index
    %c0_80 = arith.constant 0 : index
    %89 = vector.load %arg12[%c27_78, %c0_79, %c0_80] : memref<36x16x128xbf16, #tpu.memory_space<vmem>>, vector<8x8x128xbf16>
    %90 = vector.shape_cast %89 : vector<8x8x128xbf16> to vector<64x128xbf16>
    %c4 = arith.constant 4 : index
    %c0_81 = arith.constant 0 : index
    %c0_82 = arith.constant 0 : index
    %91 = vector.load %arg5[%c4, %c0_81, %c0_82] : memref<9x128x128xbf16, #tpu.memory_space<vmem>>, vector<1x128x128xbf16>
    %92 = vector.shape_cast %91 : vector<1x128x128xbf16> to vector<128x128xbf16>
    %cst_83 = arith.constant dense<0.000000e+00> : vector<64x128xf32>
    %93 = tpu.matmul %90, %92, %cst_83 {dimension_numbers = #tpu.dot_dimension_numbers<[1], [0], [0], [1], [0, 0, 1, 1], [], []>} : vector<64x128xbf16>, vector<128x128xbf16>, vector<64x128xf32> -> vector<64x128xf32>
    %94 = arith.addf %88, %93 : vector<64x128xf32>
    %c18_84 = arith.constant 18 : index
    %c1_85 = arith.constant 1 : index
    %c0_86 = arith.constant 0 : index
    %95 = vector.load %arg12[%c18_84, %c1_85, %c0_86] : memref<36x16x128xbf16, #tpu.memory_space<vmem>>, vector<8x8x128xbf16>
    %96 = vector.shape_cast %95 : vector<8x8x128xbf16> to vector<64x128xbf16>
    %c5 = arith.constant 5 : index
    %c0_87 = arith.constant 0 : index
    %c0_88 = arith.constant 0 : index
    %97 = vector.load %arg5[%c5, %c0_87, %c0_88] : memref<9x128x128xbf16, #tpu.memory_space<vmem>>, vector<1x128x128xbf16>
    %98 = vector.shape_cast %97 : vector<1x128x128xbf16> to vector<128x128xbf16>
    %cst_89 = arith.constant dense<0.000000e+00> : vector<64x128xf32>
    %99 = tpu.matmul %96, %98, %cst_89 {dimension_numbers = #tpu.dot_dimension_numbers<[1], [0], [0], [1], [0, 0, 1, 1], [], []>} : vector<64x128xbf16>, vector<128x128xbf16>, vector<64x128xf32> -> vector<64x128xf32>
    %100 = arith.addf %94, %99 : vector<64x128xf32>
    %c1_90 = arith.constant 1 : index
    %c0_91 = arith.constant 0 : index
    %c0_92 = arith.constant 0 : index
    %101 = vector.load %arg12[%c1_90, %c0_91, %c0_92] : memref<36x16x128xbf16, #tpu.memory_space<vmem>>, vector<8x8x128xbf16>
    %102 = vector.shape_cast %101 : vector<8x8x128xbf16> to vector<64x128xbf16>
    %c6 = arith.constant 6 : index
    %c0_93 = arith.constant 0 : index
    %c0_94 = arith.constant 0 : index
    %103 = vector.load %arg5[%c6, %c0_93, %c0_94] : memref<9x128x128xbf16, #tpu.memory_space<vmem>>, vector<1x128x128xbf16>
    %104 = vector.shape_cast %103 : vector<1x128x128xbf16> to vector<128x128xbf16>
    %cst_95 = arith.constant dense<0.000000e+00> : vector<64x128xf32>
    %105 = tpu.matmul %102, %104, %cst_95 {dimension_numbers = #tpu.dot_dimension_numbers<[1], [0], [0], [1], [0, 0, 1, 1], [], []>} : vector<64x128xbf16>, vector<128x128xbf16>, vector<64x128xf32> -> vector<64x128xf32>
    %106 = arith.addf %100, %105 : vector<64x128xf32>
    %c10 = arith.constant 10 : index
    %c0_96 = arith.constant 0 : index
    %c0_97 = arith.constant 0 : index
    %107 = vector.load %arg12[%c10, %c0_96, %c0_97] : memref<36x16x128xbf16, #tpu.memory_space<vmem>>, vector<8x8x128xbf16>
    %108 = vector.shape_cast %107 : vector<8x8x128xbf16> to vector<64x128xbf16>
    %c7 = arith.constant 7 : index
    %c0_98 = arith.constant 0 : index
    %c0_99 = arith.constant 0 : index
    %109 = vector.load %arg5[%c7, %c0_98, %c0_99] : memref<9x128x128xbf16, #tpu.memory_space<vmem>>, vector<1x128x128xbf16>
    %110 = vector.shape_cast %109 : vector<1x128x128xbf16> to vector<128x128xbf16>
    %cst_100 = arith.constant dense<0.000000e+00> : vector<64x128xf32>
    %111 = tpu.matmul %108, %110, %cst_100 {dimension_numbers = #tpu.dot_dimension_numbers<[1], [0], [0], [1], [0, 0, 1, 1], [], []>} : vector<64x128xbf16>, vector<128x128xbf16>, vector<64x128xf32> -> vector<64x128xf32>
    %112 = arith.addf %106, %111 : vector<64x128xf32>
    %c1_101 = arith.constant 1 : index
    %c1_102 = arith.constant 1 : index
    %c0_103 = arith.constant 0 : index
    %113 = vector.load %arg12[%c1_101, %c1_102, %c0_103] : memref<36x16x128xbf16, #tpu.memory_space<vmem>>, vector<8x8x128xbf16>
    %114 = vector.shape_cast %113 : vector<8x8x128xbf16> to vector<64x128xbf16>
    %c8 = arith.constant 8 : index
    %c0_104 = arith.constant 0 : index
    %c0_105 = arith.constant 0 : index
    %115 = vector.load %arg5[%c8, %c0_104, %c0_105] : memref<9x128x128xbf16, #tpu.memory_space<vmem>>, vector<1x128x128xbf16>
    %116 = vector.shape_cast %115 : vector<1x128x128xbf16> to vector<128x128xbf16>
    %cst_106 = arith.constant dense<0.000000e+00> : vector<64x128xf32>
    %117 = tpu.matmul %114, %116, %cst_106 {dimension_numbers = #tpu.dot_dimension_numbers<[1], [0], [0], [1], [0, 0, 1, 1], [], []>} : vector<64x128xbf16>, vector<128x128xbf16>, vector<64x128xf32> -> vector<64x128xf32>
    %118 = arith.addf %112, %117 : vector<64x128xf32>
    %c0_107 = arith.constant 0 : index
    %c0_108 = arith.constant 0 : index
    %119 = vector.load %arg6[%c0_107, %c0_108] : memref<1x128xf32, #tpu.memory_space<vmem>>, vector<1x128xf32>
    %120 = vector.broadcast %119 : vector<1x128xf32> to vector<64x128xf32>
    %121 = arith.addf %118, %120 : vector<64x128xf32>
    %cst_109 = arith.constant 0.000000e+00 : f32
    %122 = vector.broadcast %cst_109 : f32 to vector<64x128xf32>
    %123 = arith.maximumf %121, %122 : vector<64x128xf32>
    %124 = arith.truncf %123 : vector<64x128xf32> to vector<64x128xbf16>
    %c0_110 = arith.constant 0 : index
    %c0_111 = arith.constant 0 : index
    %125 = vector.load %arg7[%c0_110, %c0_111] : memref<128x32xbf16, #tpu.memory_space<vmem>>, vector<128x32xbf16>
    %cst_112 = arith.constant dense<0.000000e+00> : vector<64x32xf32>
    %126 = tpu.matmul %124, %125, %cst_112 {dimension_numbers = #tpu.dot_dimension_numbers<[1], [0], [0], [1], [0, 0, 1, 1], [], []>} : vector<64x128xbf16>, vector<128x32xbf16>, vector<64x32xf32> -> vector<64x32xf32>
    %c0_113 = arith.constant 0 : index
    %c0_114 = arith.constant 0 : index
    %127 = vector.load %arg8[%c0_113, %c0_114] : memref<1x32xf32, #tpu.memory_space<vmem>>, vector<1x32xf32>
    %128 = vector.broadcast %127 : vector<1x32xf32> to vector<64x32xf32>
    %129 = arith.addf %126, %128 : vector<64x32xf32>
    %cst_115 = arith.constant 0.000000e+00 : f32
    %130 = vector.broadcast %cst_115 : f32 to vector<8x8x16xf32>
    %c0_116 = arith.constant 0 : index
    %c27_117 = arith.constant 27 : index
    %c0_118 = arith.constant 0 : index
    %c0_119 = arith.constant 0 : index
    %131 = vector.load %arg1[%c0_116, %c27_117, %c0_118, %c0_119] : memref<1x36x16x16xbf16, #tpu.memory_space<vmem>>, vector<1x8x8x16xbf16>
    %132 = vector.shape_cast %131 : vector<1x8x8x16xbf16> to vector<8x8x16xbf16>
    %133 = arith.extf %132 : vector<8x8x16xbf16> to vector<8x8x16xf32>
    %134 = arith.addf %130, %133 : vector<8x8x16xf32>
    %c0_120 = arith.constant 0 : index
    %c18_121 = arith.constant 18 : index
    %c1_122 = arith.constant 1 : index
    %c0_123 = arith.constant 0 : index
    %135 = vector.load %arg1[%c0_120, %c18_121, %c1_122, %c0_123] : memref<1x36x16x16xbf16, #tpu.memory_space<vmem>>, vector<1x8x8x16xbf16>
    %136 = vector.shape_cast %135 : vector<1x8x8x16xbf16> to vector<8x8x16xbf16>
    %137 = arith.extf %136 : vector<8x8x16xbf16> to vector<8x8x16xf32>
    %138 = arith.addf %134, %137 : vector<8x8x16xf32>
    %c0_124 = arith.constant 0 : index
    %c10_125 = arith.constant 10 : index
    %c0_126 = arith.constant 0 : index
    %c0_127 = arith.constant 0 : index
    %139 = vector.load %arg1[%c0_124, %c10_125, %c0_126, %c0_127] : memref<1x36x16x16xbf16, #tpu.memory_space<vmem>>, vector<1x8x8x16xbf16>
    %140 = vector.shape_cast %139 : vector<1x8x8x16xbf16> to vector<8x8x16xbf16>
    %141 = arith.extf %140 : vector<8x8x16xbf16> to vector<8x8x16xf32>
    %142 = arith.addf %138, %141 : vector<8x8x16xf32>
    %c0_128 = arith.constant 0 : index
    %c1_129 = arith.constant 1 : index
    %c1_130 = arith.constant 1 : index
    %c0_131 = arith.constant 0 : index
    %143 = vector.load %arg1[%c0_128, %c1_129, %c1_130, %c0_131] : memref<1x36x16x16xbf16, #tpu.memory_space<vmem>>, vector<1x8x8x16xbf16>
    %144 = vector.shape_cast %143 : vector<1x8x8x16xbf16> to vector<8x8x16xbf16>
    %145 = arith.extf %144 : vector<8x8x16xbf16> to vector<8x8x16xf32>
    %146 = arith.addf %142, %145 : vector<8x8x16xf32>
    %cst_132 = arith.constant 2.500000e-01 : f32
    %147 = vector.broadcast %cst_132 : f32 to vector<8x8x16xf32>
    %148 = arith.mulf %146, %147 : vector<8x8x16xf32>
    %149 = arith.truncf %148 : vector<8x8x16xf32> to vector<8x8x16xbf16>
    %150 = vector.shape_cast %149 : vector<8x8x16xbf16> to vector<64x16xbf16>
    %c0_133 = arith.constant 0 : index
    %c0_134 = arith.constant 0 : index
    %151 = vector.load %arg9[%c0_133, %c0_134] : memref<16x32xbf16, #tpu.memory_space<vmem>>, vector<16x32xbf16>
    %cst_135 = arith.constant dense<0.000000e+00> : vector<64x32xf32>
    %152 = tpu.matmul %150, %151, %cst_135 {dimension_numbers = #tpu.dot_dimension_numbers<[1], [0], [0], [1], [0, 0, 1, 1], [], []>} : vector<64x16xbf16>, vector<16x32xbf16>, vector<64x32xf32> -> vector<64x32xf32>
    %c0_136 = arith.constant 0 : index
    %c0_137 = arith.constant 0 : index
    %153 = vector.load %arg10[%c0_136, %c0_137] : memref<1x32xf32, #tpu.memory_space<vmem>>, vector<1x32xf32>
    %154 = vector.broadcast %153 : vector<1x32xf32> to vector<64x32xf32>
    %155 = arith.addf %152, %154 : vector<64x32xf32>
    %156 = arith.addf %129, %155 : vector<64x32xf32>
    %cst_138 = arith.constant 0.000000e+00 : f32
    %157 = vector.broadcast %cst_138 : f32 to vector<64x32xf32>
    %158 = arith.maximumf %156, %157 : vector<64x32xf32>
    %159 = vector.shape_cast %158 : vector<64x32xf32> to vector<1x8x8x32xf32>
    %c0_139 = arith.constant 0 : index
    %c0_140 = arith.constant 0 : index
    %c0_141 = arith.constant 0 : index
    %c0_142 = arith.constant 0 : index
    %160 = vector.load %arg11[%c0_139, %c0_140, %c0_141, %c0_142] : memref<1x8x8x32xf32, #tpu.memory_space<vmem>>, vector<1x8x8x32xf32>
    tpu.vector_store %arg11[%c0_139, %c0_140, %c0_141, %c0_142], %159 {strides = array<i32>} : memref<1x8x8x32xf32, #tpu.memory_space<vmem>>, vector<1x8x8x32xf32>,
    return
  }
  func.func @transform_0(%arg0: i32) -> (i32, i32, i32, i32) {
    %c0_i32 = arith.constant 0 : i32
    %c0_i32_0 = arith.constant 0 : i32
    %c0_i32_1 = arith.constant 0 : i32
    %c0_i32_2 = arith.constant 0 : i32
    return %arg0, %c0_i32, %c0_i32_0, %c0_i32_1 : i32, i32, i32, i32
  }
  func.func @transform_1(%arg0: i32) -> (i32, i32) {
    %c0_i32 = arith.constant 0 : i32
    %c0_i32_0 = arith.constant 0 : i32
    %c0_i32_1 = arith.constant 0 : i32
    return %c0_i32, %c0_i32_0 : i32, i32
  }
  func.func @transform_2(%arg0: i32) -> (i32, i32) {
    %c0_i32 = arith.constant 0 : i32
    %c0_i32_0 = arith.constant 0 : i32
    %c0_i32_1 = arith.constant 0 : i32
    return %c0_i32, %c0_i32_0 : i32, i32
  }
  func.func @transform_3(%arg0: i32) -> (i32, i32) {
    %c0_i32 = arith.constant 0 : i32
    %c0_i32_0 = arith.constant 0 : i32
    %c0_i32_1 = arith.constant 0 : i32
    return %c0_i32, %c0_i32_0 : i32, i32
  }
  func.func @transform_4(%arg0: i32) -> (i32, i32, i32) {
    %c0_i32 = arith.constant 0 : i32
    %c0_i32_0 = arith.constant 0 : i32
    %c0_i32_1 = arith.constant 0 : i32
    %c0_i32_2 = arith.constant 0 : i32
    return %c0_i32, %c0_i32_0, %c0_i32_1 : i32, i32, i32
  }
  func.func @transform_5(%arg0: i32) -> (i32, i32) {
    %c0_i32 = arith.constant 0 : i32
    %c0_i32_0 = arith.constant 0 : i32
    %c0_i32_1 = arith.constant 0 : i32
    return %c0_i32, %c0_i32_0 : i32, i32
  }
  func.func @transform_6(%arg0: i32) -> (i32, i32) {
    %c0_i32 = arith.constant 0 : i32
    %c0_i32_0 = arith.constant 0 : i32
    %c0_i32_1 = arith.constant 0 : i32
    return %c0_i32, %c0_i32_0 : i32, i32
  }
  func.func @transform_7(%arg0: i32) -> (i32, i32) {
    %c0_i32 = arith.constant 0 : i32
    %c0_i32_0 = arith.constant 0 : i32
    %c0_i32_1 = arith.constant 0 : i32
    return %c0_i32, %c0_i32_0 : i32, i32
  }
  func.func @transform_8(%arg0: i32) -> (i32, i32) {
    %c0_i32 = arith.constant 0 : i32
    %c0_i32_0 = arith.constant 0 : i32
    %c0_i32_1 = arith.constant 0 : i32
    return %c0_i32, %c0_i32_0 : i32, i32
  }
  func.func @transform_9(%arg0: i32) -> (i32, i32) {
    %c0_i32 = arith.constant 0 : i32
    %c0_i32_0 = arith.constant 0 : i32
    %c0_i32_1 = arith.constant 0 : i32
    return %c0_i32, %c0_i32_0 : i32, i32
  }
  func.func @transform_10(%arg0: i32) -> (i32, i32, i32, i32) {
    %c0_i32 = arith.constant 0 : i32
    %c0_i32_0 = arith.constant 0 : i32
    %c0_i32_1 = arith.constant 0 : i32
    %c0_i32_2 = arith.constant 0 : i32
    return %arg0, %c0_i32, %c0_i32_0, %c0_i32_1 : i32, i32, i32, i32
  }
}

</mosaic_0001>

<bundles_post_ra>
// kernel: tpu_custom_call.1
= control target key start
LH: loop header
LB: loop body
LE: loop exit
PB: predicated region body
PF: predicated region fallthrough
CT: control target
= control target key end

     0   :  { %15 = vsyncpa [#allocation4], 0  ;;  %s7612_s0 = inlined_call_operand.vmem [shape: bf16[2,36,16,16], index: 0, kind: input, shape index: {}]   ;;  %s7613_s1 = inlined_call_operand.vmem [shape: f32[576,1], index: 1, kind: input, shape index: {}]   ;;  %s7614_s2 = inlined_call_operand.vmem [shape: bf16[16,128], index: 2, kind: input, shape index: {}]   ;;  %s7615_s3 = inlined_call_operand.vmem [shape: f32[1,128], index: 3, kind: input, shape index: {}]   ;;  %s7616_s4 = inlined_call_operand.vmem [shape: bf16[9,128,128], index: 4, kind: input, shape index: {}]   ;;  %s7617_s5 = inlined_call_operand.vmem [shape: f32[1,128], index: 5, kind: input, shape index: {}]   ;;  %s7618_s6 = inlined_call_operand.vmem [shape: bf16[128,32], index: 6, kind: input, shape index: {}]   ;;  %s7619_s7 = inlined_call_operand.vmem [shape: f32[1,32], index: 7, kind: input, shape index: {}]   ;;  %s7620_s8 = inlined_call_operand.vmem [shape: bf16[16,32], index: 8, kind: input, shape index: {}]   ;;  %s7621_s9 = inlined_call_operand.vmem [shape: f32[1,32], index: 9, kind: input, shape index: {}]   ;;  %s7622_s10 = inlined_call_operand.hbm [shape: f32[2,8,8,32], index: 10, kind: output, shape index: {}]  }
   0x1   :  { %17 = vsyncpa [#allocation4 + $0x1], 0  ;;  %s6310_s13 = smov 0   ;;  %s6312_s14 = smov 0  }
   0x2   :  { %s6314_s15 = smov 0   ;;  %s6316_s16 = smov 0  }
   0x3 LB: > { %s6331_s17 = sadd.s32 4294967295, %s6247_s16   ;;  %s4615_s18 = sadd.s32 4294967294, %s6247_s16   ;;  %s6247_s16 = sphi %s6316_s16, %s7658_s16   ;;  %s6243_s15 = sphi %s6314_s15, %s7657_s15   ;;  %s6239_s14 = sphi %s6312_s14, %s7656_s14   ;;  %s6235_s13 = sphi %s6310_s13, %s7655_s13  }
   0x4   : > { %s6335_s19 = sadd.s32 1, %s6247_s16   ;;  %s245_s20 = sadd.s32 1, %s6243_s15 }
   0x5   : > { %s242_s21 = ssub.s32 %s6247_s16, %s6335_s19  ;;  %p255_p0 = scmp.ne.s32.totalorder %s6243_s15, %s6239_s14 }
   0x6   : > { %p243_p1 = scmp.eq.s32.totalorder %s242_s21, 0  ;;  %p256_p2 = scmp.eq.s32.totalorder %s6331_s17, 1 }
   0x7   : > { %p261_p3 = scmp.ne.s32.totalorder %s6239_s14, %s6235_s13  ;;  %p262_p4 = scmp.eq.s32.totalorder %s4615_s18, 1 }
   0x8   : > { %s6346_s22 = scalar_select %p243_p1, %s6243_s15, %s245_s20  }
   0x9   : > { %p6348_p5 = por %p256_p2, %p255_p0  ;;  %p6352_p6 = por %p262_p4, %p261_p3 }
   0xa   : > { %p4618_p7 = scmp.ge.s32.totalorder %s6247_s16, 1  ;;  %p315_p8 = scmp.lt.s32.totalorder %s6247_s16, 3 }
   0xc   : > { %p316_p9 = pnand %p4618_p7, %p315_p8 }
   0xe   : > { %319 = sbr.rel (%p316_p9) target bundleno = 853 (0x355), region = 60 }
  0x13   : > { %v1035_v0 = vld [vmem:[%s7613_s1 + $0xa0] sm:$0xff]  ;;  %v1033_v1 = vld [vmem:[%s7613_s1 + $0x90] sm:$0xff]  ;;  %v6249_v2 = vmov 0   ;;  %p353_p10 = scmp.lt.s32.totalorder %s6331_s17, 1  ;;  %v1036_v3 = vld [vmem:[%s7613_s1 + $0xa8] sm:$0xff]  ;;  %v6250_v5 = vmov 0.0  }
  0x14   : > { %6040 = vset.pattern.permute.xlu1 %v6249_v2  ;;  %6039 = vset.pattern.permute.xlu0 %v6249_v2  ;;  %v6041_v4 = vld [vmem:[%s7614_s2] sm:$0xff]   ;;  %v1034_v6 = vld [vmem:[%s7613_s1 + $0x98] sm:$0xff]  ;;  %vm6251_vm0 = vmmov 0   ;;  %v1037_v8 = vld [vmem:[%s7613_s1 + $0xb0] sm:$0xff]  ;;  %vm437_vm1 = vcmask 130048   ;;  %vm4231_vm5 = vcmask 1046528  }
  0x15   : > { %1063 = vperm.xlu1 %6040, %v1035_v0   ;;  %1053 = vperm.xlu0 %6039, %v1033_v1   ;;  %s354_s21 = scalar_select %p353_p10, %s6331_s17, 1  ;;  %v1038_v7 = vld [vmem:[%s7613_s1 + $0xb8] sm:$0xff]  ;;  %v6044_v9 = vld [vmem:[%s7614_s2] sm:$0xff]   ;;  %v1040_v12 = vld [vmem:[%s7613_s1 + $0xc8] sm:$0xff]  ;;  %vm2481_vm2 = vsmask.f32 3328 }
  0x16   : > { %5992 = vmatprep.subr.bf16.mxu1 %v6250_v5  ;;  %5590 = vmatprep.subr.bf16.mxu0 %v6250_v5  ;;  %v1039_v13 = vld [vmem:[%s7613_s1 + $0xc0] sm:$0xff]  ;;  %v589_v15 = vld [vmem:[%s7613_s1 + $0x8] sm:$0xff]  ;;  %v591_v20 = vld [vmem:[%s7613_s1 + $0x18] sm:$0xff]  ;;  %vm2482_vm3 = vsmask.f32 7440  ;;  %s350_s29 = sand.u32 1, %s6239_s14  }
  0x17   : > { %5993 = vmatpush3.bf16.msra.mxu1 %v6041_v4  ;;  %5591 = vmatpush3.bf16.msra.mxu0 %v6041_v4  ;;  %s5994_s25 = smul.u32 288, %s354_s21  ;;  %v6048_v14 = vld [vmem:[%s7614_s2] sm:$0xff]   ;;  %v590_v21 = vld [vmem:[%s7613_s1 + $0x10] sm:$0xff]  ;;  %v593_v22 = vld [vmem:[%s7613_s1 + $0x28] sm:$0xff]  ;;  %s4619_s18 = sshll.u32 %s350_s29, 6  ;;  %vm4530_vm6 = vcmask 261120  }
  0x18   : > { %5592 = vmatprep.mubr.msk.bf16.mxu0 %vm6251_vm0, %v6250_v5  ;;  %5624 = vmatprep.mubr.msk.bf16.mxu1 %vm6251_vm0, %v6250_v5  ;;  %v588_v16 = vld [vmem:[%s7613_s1] sm:$0xff]  ;;  %v595_v26 = vld [vmem:[%s7613_s1 + $0x38] sm:$0xff]  ;;  %v594_v27 = vld [vmem:[%s7613_s1 + $0x30] sm:$0xff]  ;;  %s7543_s20 = scalar_lea.vmem [#allocation3], %s4619_s18  ;;  %s5212_s21 = sshll.u32 %s6331_s17, 10 }
  0x19   : > { %1068 = vperm.xlu1 %6040, %v1036_v3   ;;  %1058 = vperm.xlu0 %6039, %v1034_v6   ;;  %s6391_s12 = scalar_lea.vmem %s7612_s0, %s5994_s25  ;;  %v6047_v19 = vld [vmem:[%s7614_s2] sm:$0xff]   ;;  %v1042_v28 = vld [vmem:[%s7613_s1 + $0xd8] sm:$0xff]  ;;  %v1041_v29 = vld [vmem:[%s7613_s1 + $0xd0] sm:$0xff]  ;;  %s4553_s26 = sshll.u32 %s7543_s20, 4  ;;  %s7564_s26 = int_to_ptr.vmem [resolvable:$true] %s4553_s26 }
  0x1a   : > { %5628 = vmatprep.subr.bf16.mxu1 %v6250_v5  ;;  %5666 = vmatprep.subr.bf16.mxu0 %v6250_v5  ;;  %v6042_v10 = vld [vmem:[%s6391_s12] sm:$0xff]   ;;  %v6045_v17 = vld [vmem:[%s6391_s12 + $0x8] sm:$0xff]   ;;  %v6049_v24 = vld [vmem:[%s6391_s12 + $0x10] sm:$0xff]   ;;  %s7562_s27 = scalar_lea.hbm %s7622_s10, %s5212_s21  ;;  %s7572_s17 = scalar_lea.sflag [#allocation4], %s350_s29 }
  0x1b   : > { %v6043_v11 = vld [vmem:[%s6391_s12 + $0x40] sm:$0xff]   ;;  %5593 = vmatmul.mubr.msk.bf16.vlgmr.msra.gmra.mxu0 %vm437_vm1, %v6042_v10  ;;  %v6046_v18 = vld [vmem:[%s6391_s12 + $0x48] sm:$0xff]   ;;  %v6050_v25 = vld [vmem:[%s6391_s12 + $0x50] sm:$0xff]   ;;  %s6187_s28 = scalar_lea.vmem %s7564_s26, 1024  ;;  %s6252_s30 = smov [#allocation3]  }
  0x1c   : > { %5625 = vmatmul.mubr.msk.bf16.vlgmr.msra.gmra.mxu1 %vm437_vm1, %v6043_v11  ;;  %5596 = vmatprep.mubr.msk.bf16.mxu0 %vm6251_vm0, %v6250_v5  ;;  %v592_v23 = vld [vmem:[%s7613_s1 + $0x20] sm:$0xff]  ;;  %v6051_v30 = vld [vmem:[%s6391_s12 + $0x18] sm:$0xff]   ;;  %v1044_v32 = vld [vmem:[%s7613_s1 + $0xe8] sm:$0xff]  ;;  %p6188_p11 = scmp.ne.s32.totalorder %s7564_s26, %s6187_s28  ;;  %s6191_s11 = sshll.u32 %s6252_s30, 4  ;;  %s6192_s11 = int_to_ptr.vmem [resolvable:$false] %s6191_s11 }
  0x1d   : > { %1078 = vperm.xlu1 %6040, %v1038_v7   ;;  %1073 = vperm.xlu0 %6039, %v1037_v8   ;;  %v6052_v31 = vld [vmem:[%s6391_s12 + $0x58] sm:$0xff]   ;;  %v1043_v33 = vld [vmem:[%s7613_s1 + $0xe0] sm:$0xff]  ;;  %v1045_v35 = vld [vmem:[%s7613_s1 + $0xf0] sm:$0xff]  ;;  %s6193_s18 = scalar_lea.vmem %s6192_s11, 2048  ;;  %p6194_p0 = scmp.lt.s32.totalorder %s7564_s26, %s6192_s11 }
  0x1e   : > { %5629 = vmatpush3.bf16.msra.mxu1 %v6044_v9  ;;  %5630 = vmatprep.mubr.msk.bf16.mxu1 %vm6251_vm0, %v6250_v5  ;;  %v1046_v34 = vld [vmem:[%s7613_s1 + $0xf8] sm:$0xff]  ;;  %v6053_v36 = vld [vmem:[%s6391_s12 + $0x20] sm:$0xff]   ;;  %v1048_v38 = vld [vmem:[%s7613_s1 + $0x108] sm:$0xff]  ;;  %p6189_p12 = pnand %p6188_p11, %p6348_p5  ;;  %p6195_p1 = scmp.lt.s32.totalorder %s6193_s18, %s6187_s28 }
  0x1f   : > { %5704 = vmatprep.subr.bf16.mxu1 %v6250_v5  ;;  %5667 = vmatpush3.bf16.msra.mxu0 %v6048_v14  ;;  %v6054_v37 = vld [vmem:[%s6391_s12 + $0x60] sm:$0xff]   ;;  %v597_v40 = vld [vmem:[%s7613_s1 + $0x48] sm:$0xff]  ;;  %v599_v44 = vld [vmem:[%s7613_s1 + $0x58] sm:$0xff] }
  0x20   : > { %v1047_v39 = vld [vmem:[%s7613_s1 + $0x100] sm:$0xff]  ;;  %v6055_v42 = vld [vmem:[%s6391_s12 + $0x28] sm:$0xff]   ;;  %v598_v45 = vld [vmem:[%s7613_s1 + $0x50] sm:$0xff]  ;;  %p6190_p13 = pneg %p6189_p12  ;;  %p6196_p2 = por %p6195_p1, %p6194_p0 }
  0x21   : > { %1088 = vperm.xlu1 %6040, %v1040_v12   ;;  %1083 = vperm.xlu0 %6039, %v1039_v13   ;;  %v596_v41 = vld [vmem:[%s7613_s1 + $0x40] sm:$0xff]  ;;  %v6056_v43 = vld [vmem:[%s6391_s12 + $0x68] sm:$0xff]   ;;  %v6057_v48 = vld [vmem:[%s6391_s12 + $0x30] sm:$0xff]  }
  0x22   : > { %v601_v46 = vld [vmem:[%s7613_s1 + $0x68] sm:$0xff]  ;;  %v600_v47 = vld [vmem:[%s7613_s1 + $0x60] sm:$0xff]  ;;  %v6058_v49 = vld [vmem:[%s6391_s12 + $0x70] sm:$0xff]   ;;  %p6197_p3 = pnand %p6196_p2, %p6190_p13 }
  0x23   : > { %5597 = vmatmul.mubr.msk.bf16.gmra.mxu0 %vm437_vm1, %v6045_v17  ;;  %v603_v50 = vld [vmem:[%s7613_s1 + $0x78] sm:$0xff]  ;;  %v602_v51 = vld [vmem:[%s7613_s1 + $0x70] sm:$0xff]  ;;  %v1480_v52 = vld [vmem:[%s7613_s1 + $0x128] sm:$0xff] }
  0x24   : > { %5631 = vmatmul.mubr.msk.bf16.vlgmr.msra.gmra.mxu1 %vm437_vm1, %v6046_v18  ;;  %5600 = vmatprep.mubr.msk.bf16.mxu0 %vm6251_vm0, %v6250_v5  ;;  %v1479_v53 = vld [vmem:[%s7613_s1 + $0x120] sm:$0xff]  ;;  %v6059_v54 = vld [vmem:[%s6391_s12 + $0x38] sm:$0xff]   ;;  %v1481_v57 = vld [vmem:[%s7613_s1 + $0x130] sm:$0xff] }
  0x25   : > { %613 = vperm.xlu1 %6040, %v589_v15   ;;  %608 = vperm.xlu0 %6039, %v588_v16   ;;  %v6060_v55 = vld [vmem:[%s6391_s12 + $0x78] sm:$0xff]   ;;  %v1484_v58 = vld [vmem:[%s7613_s1 + $0x148] sm:$0xff]  ;;  %v1483_v59 = vld [vmem:[%s7613_s1 + $0x140] sm:$0xff] }
  0x26   : > { %5705 = vmatpush3.bf16.msra.mxu1 %v6047_v19  ;;  %5634 = vmatprep.mubr.msk.bf16.mxu1 %vm6251_vm0, %v6250_v5  ;;  %v1482_v56 = vld [vmem:[%s7613_s1 + $0x138] sm:$0xff]  ;;  %v6061_v60 = vld [vmem:[%s6391_s12 + $0x80] sm:$0xff]   ;;  %v6062_v61 = vld [vmem:[%s6391_s12 + $0x90] sm:$0xff]  }
  0x27   : > { %v6081_v62 = vld [vmem:[%s7616_s4 + $0x78] sm:$0xff]   ;;  %v1485_v0 = vld [vmem:[%s7613_s1 + $0x150] sm:$0xff]  ;;  %v6063_v3 = vld [vmem:[%s6391_s12 + $0x88] sm:$0xff]  }
  0x28   : > { %5742 = vmatprep.subr.bf16.mxu0 %v6081_v62  ;;  %v1486_v63 = vld [vmem:[%s7613_s1 + $0x158] sm:$0xff]  ;;  %v1925_v2 = vld [vmem:[%s7613_s1 + $0x1b0] sm:$0xff]  ;;  %v1928_v6 = vld [vmem:[%s7613_s1 + $0x1c8] sm:$0xff] }
  0x29   : > { %623 = vperm.xlu1 %6040, %v591_v20   ;;  %618 = vperm.xlu0 %6039, %v590_v21   ;;  %v1926_v1 = vld [vmem:[%s7613_s1 + $0x1b8] sm:$0xff]  ;;  %v1927_v7 = vld [vmem:[%s7613_s1 + $0x1c0] sm:$0xff]  ;;  %v1929_v9 = vld [vmem:[%s7613_s1 + $0x1d0] sm:$0xff] }
  0x2a   : > { %v6064_v4 = vld [vmem:[%s6391_s12 + $0x98] sm:$0xff]   ;;  %v6065_v10 = vld [vmem:[%s6391_s12 + $0xa0] sm:$0xff]   ;;  %v6082_v13 = vld [vmem:[%s7616_s4 + $0x70] sm:$0xff]  }
  0x2b   : > { %5601 = vmatmul.mubr.msk.bf16.gmra.mxu0 %vm437_vm1, %v6049_v24  ;;  %v1930_v8 = vld [vmem:[%s7613_s1 + $0x1d8] sm:$0xff]  ;;  %v1932_v14 = vld [vmem:[%s7613_s1 + $0x1e8] sm:$0xff]  ;;  %v1931_v15 = vld [vmem:[%s7613_s1 + $0x1e0] sm:$0xff] }
  0x2c   : > { %5635 = vmatmul.mubr.msk.bf16.gmra.mxu1 %vm437_vm1, %v6050_v25  ;;  %5604 = vmatprep.mubr.msk.bf16.mxu0 %vm6251_vm0, %v6250_v5  ;;  %v6066_v11 = vld [vmem:[%s6391_s12 + $0xd8] sm:$0xff]   ;;  %v6085_v16 = vld [vmem:[%s7616_s4 + $0x30] sm:$0xff]   ;;  %v1488_v17 = vld [vmem:[%s7613_s1 + $0x168] sm:$0xff] }
  0x2d   : > { %633 = vperm.xlu1 %6040, %v593_v22   ;;  %628 = vperm.xlu0 %6039, %v592_v23   ;;  %v6083_v12 = vld [vmem:[%s7616_s4 + $0x38] sm:$0xff]   ;;  %v1487_v18 = vld [vmem:[%s7613_s1 + $0x160] sm:$0xff]  ;;  %v6067_v19 = vld [vmem:[%s6391_s12 + $0xa8] sm:$0xff]  }
  0x2e   : > { %5638 = vmatprep.mubr.msk.bf16.mxu1 %vm6251_vm0, %v6250_v5  ;;  %5766 = vmatprep.subr.bf16.mxu1 %v6083_v12  ;;  %v6068_v20 = vld [vmem:[%s6391_s12 + $0xe0] sm:$0xff]   ;;  %v6086_v21 = vld [vmem:[%s7616_s4 + $0x28] sm:$0xff]   ;;  %v1490_v23 = vld [vmem:[%s7613_s1 + $0x178] sm:$0xff] }
  0x2f   : > { %v6084_v22 = vld [vmem:[%s7616_s4 + $0x68] sm:$0xff]   ;;  %v1489_v24 = vld [vmem:[%s7613_s1 + $0x170] sm:$0xff]  ;;  %v6088_v25 = vld [vmem:[%s7616_s4 + $0x20] sm:$0xff]  }
  0x30   : > { %vm7104_vm4 = vmor %vm2481_vm2, %vm2482_vm3 }
  0x31   : > { %643 = vperm.xlu1 %6040, %v595_v26   ;;  %638 = vperm.xlu0 %6039, %v594_v27   ;;  %v1492_v26 = vld [vmem:[%s7613_s1 + $0x188] sm:$0xff]  ;;  %v1491_v27 = vld [vmem:[%s7613_s1 + $0x180] sm:$0xff] }
  0x33   : > { %5605 = vmatmul.mubr.msk.bf16.gmra.mxu0 %vm437_vm1, %v6051_v30  ;;  %v6087_v30 = vld [vmem:[%s7616_s4 + $0x60] sm:$0xff]  }
  0x34   : > { %5639 = vmatmul.mubr.msk.bf16.gmra.mxu1 %vm437_vm1, %v6052_v31  ;;  %5608 = vmatprep.mubr.msk.bf16.mxu0 %vm6251_vm0, %v6250_v5  ;;  %v1494_v31 = vld [vmem:[%s7613_s1 + $0x198] sm:$0xff] }
  0x35   : > { %1098 = vperm.xlu1 %6040, %v1042_v28   ;;  %1093 = vperm.xlu0 %6039, %v1041_v29   ;;  %v6069_v28 = vld [vmem:[%s6391_s12 + $0xb0] sm:$0xff]   ;;  %v6070_v29 = vld [vmem:[%s6391_s12 + $0xe8] sm:$0xff]  }
  0x36   : > { %5642 = vmatprep.mubr.msk.bf16.mxu1 %vm6251_vm0, %v6250_v5 }
  0x39   : > { %1108 = vperm.xlu1 %6040, %v1044_v32   ;;  %1103 = vperm.xlu0 %6039, %v1043_v33   ;;  %v1493_v32 = vld [vmem:[%s7613_s1 + $0x190] sm:$0xff]  ;;  %v6089_v33 = vld [vmem:[%s7616_s4 + $0x18] sm:$0xff]  }
  0x3b   : > { %5609 = vmatmul.mubr.msk.bf16.gmra.mxu0 %vm437_vm1, %v6053_v36  ;;  %v6071_v36 = vld [vmem:[%s6391_s12 + $0xb8] sm:$0xff]  }
  0x3c   : > { %5643 = vmatmul.mubr.msk.bf16.gmra.mxu1 %vm437_vm1, %v6054_v37  ;;  %5612 = vmatprep.mubr.msk.bf16.mxu0 %vm6251_vm0, %v6250_v5  ;;  %v6072_v37 = vld [vmem:[%s6391_s12 + $0xf0] sm:$0xff]  }
  0x3d   : > { %1118 = vperm.xlu1 %6040, %v1046_v34   ;;  %1113 = vperm.xlu0 %6039, %v1045_v35   ;;  %v1934_v34 = vld [vmem:[%s7613_s1 + $0x1f8] sm:$0xff]  ;;  %v1933_v35 = vld [vmem:[%s7613_s1 + $0x1f0] sm:$0xff] }
  0x3e   : > { %5646 = vmatprep.mubr.msk.bf16.mxu1 %vm6251_vm0, %v6250_v5 }
  0x41   : > { %1128 = vperm.xlu1 %6040, %v1048_v38   ;;  %1123 = vperm.xlu0 %6039, %v1047_v39   ;;  %v6091_v38 = vld [vmem:[%s7616_s4 + $0x58] sm:$0xff]   ;;  %v6092_v39 = vld [vmem:[%s7616_s4 + $0x10] sm:$0xff]  }
  0x43   : > { %5613 = vmatmul.mubr.msk.bf16.gmra.mxu0 %vm437_vm1, %v6055_v42  ;;  %v6094_v42 = vld [vmem:[%s7616_s4 + $0x8] sm:$0xff]  }
  0x44   : > { %5647 = vmatmul.mubr.msk.bf16.gmra.mxu1 %vm437_vm1, %v6056_v43  ;;  %5616 = vmatprep.mubr.msk.bf16.mxu0 %vm6251_vm0, %v6250_v5  ;;  %v6095_v43 = vld [vmem:[%s7616_s4 + $0x50] sm:$0xff]  }
  0x45   : > { %653 = vperm.xlu1 %6040, %v597_v40   ;;  %648 = vperm.xlu0 %6039, %v596_v41   ;;  %v1936_v40 = vld [vmem:[%s7613_s1 + $0x208] sm:$0xff]  ;;  %v1935_v41 = vld [vmem:[%s7613_s1 + $0x200] sm:$0xff] }
  0x46   : > { %5650 = vmatprep.mubr.msk.bf16.mxu1 %vm6251_vm0, %v6250_v5 }
  0x49   : > { %663 = vperm.xlu1 %6040, %v599_v44   ;;  %658 = vperm.xlu0 %6039, %v598_v45   ;;  %v1938_v44 = vld [vmem:[%s7613_s1 + $0x218] sm:$0xff]  ;;  %v1937_v45 = vld [vmem:[%s7613_s1 + $0x210] sm:$0xff] }
  0x4b   : > { %5617 = vmatmul.mubr.msk.bf16.gmra.mxu0 %vm437_vm1, %v6057_v48  ;;  %v6097_v48 = vld [vmem:[%s7616_s4 + $0x48] sm:$0xff]  }
  0x4c   : > { %5651 = vmatmul.mubr.msk.bf16.gmra.mxu1 %vm437_vm1, %v6058_v49  ;;  %5620 = vmatprep.mubr.msk.bf16.mxu0 %vm6251_vm0, %v6250_v5  ;;  %v1940_v49 = vld [vmem:[%s7613_s1 + $0x228] sm:$0xff] }
  0x4d   : > { %673 = vperm.xlu1 %6040, %v601_v46   ;;  %668 = vperm.xlu0 %6039, %v600_v47   ;;  %v6073_v46 = vld [vmem:[%s6391_s12 + $0xc0] sm:$0xff]   ;;  %v6074_v47 = vld [vmem:[%s6391_s12 + $0xf8] sm:$0xff]  }
  0x4e   : > { %5654 = vmatprep.mubr.msk.bf16.mxu1 %vm6251_vm0, %v6250_v5 }
  0x51   : > { %683 = vperm.xlu1 %6040, %v603_v50   ;;  %678 = vperm.xlu0 %6039, %v602_v51   ;;  %v1939_v50 = vld [vmem:[%s7613_s1 + $0x220] sm:$0xff] }
  0x52   : > { %v6096_v51 = vld [vmem:[%s7616_s4] sm:$0xff]  }
  0x53   : > { %5621 = vmatmul.mubr.msk.bf16.gmra.mxu0 %vm437_vm1, %v6059_v54 }
  0x54   : > { %5655 = vmatmul.mubr.msk.bf16.gmra.mxu1 %vm437_vm1, %v6060_v55  ;;  %5668 = vmatprep.mubr.msk.bf16.mxu0 %vm6251_vm0, %v6250_v5  ;;  %v605_v55 = vld [vmem:[%s7613_s1 + $0x88] sm:$0xff] }
  0x55   : > { %1504 = vperm.xlu1 %6040, %v1480_v52   ;;  %1499 = vperm.xlu0 %6039, %v1479_v53   ;;  %v6099_v52 = vld [vmem:[%s7616_s4 + $0x40] sm:$0xff]  }
  0x56   : > { %5658 = vmatprep.mubr.msk.bf16.mxu1 %vm6251_vm0, %v6250_v5 }
  0x59   : > { %1514 = vperm.xlu1 %6040, %v1482_v56   ;;  %1509 = vperm.xlu0 %6039, %v1481_v57   ;;  %v604_v56 = vld [vmem:[%s7613_s1 + $0x80] sm:$0xff]  ;;  %v6075_v57 = vld [vmem:[%s6391_s12 + $0xc8] sm:$0xff]  }
  0x5b   : > { %5669 = vmatmul.mubr.msk.bf16.vlgmr.msra.gmra.mxu0 %vm437_vm1, %v6062_v61  ;;  %v1050_v61 = vld [vmem:[%s7613_s1 + $0x118] sm:$0xff] }
  0x5c   : > { %5659 = vmatmul.mubr.msk.bf16.gmra.mxu1 %vm437_vm1, %v6061_v60  ;;  %5672 = vmatprep.mubr.msk.bf16.mxu0 %vm6251_vm0, %v6250_v5 }
  0x5d   : > { %1524 = vperm.xlu1 %6040, %v1484_v58   ;;  %1519 = vperm.xlu0 %6039, %v1483_v59   ;;  %v6076_v58 = vld [vmem:[%s6391_s12 + $0x100] sm:$0xff]  }
  0x5e   : > { %5662 = vmatprep.mubr.msk.bf16.mxu1 %vm6251_vm0, %v6250_v5  ;;  %5743 = vmatpush3.bf16.msra.mxu0 %v6081_v62  ;;  %v1049_v62 = vld [vmem:[%s7613_s1 + $0x110] sm:$0xff] }
  0x5f   : > { %5744 = vmatprep.subr.bf16.mxu0 %v6082_v13 }
  0x61   : > { %1534 = vperm.xlu1 %6040, %v1486_v63   ;;  %1529 = vperm.xlu0 %6039, %v1485_v0  }
  0x62   : > { %5745 = vmatpush3.bf16.msra.mxu0 %v6082_v13  ;;  %v6079_v13 = vld [vmem:[%s6391_s12 + $0x110] sm:$0xff]  }
  0x63   : > { %5673 = vmatmul.mubr.msk.bf16.gmra.mxu0 %vm437_vm1, %v6064_v4  ;;  %5746 = vmatprep.subr.bf16.mxu0 %v6084_v22  ;;  %v6078_v4 = vld [vmem:[%s6391_s12 + $0x108] sm:$0xff]  }
  0x64   : > { %5663 = vmatmul.mubr.msk.bf16.gmra.mxu1 %vm437_vm1, %v6063_v3  ;;  %5676 = vmatprep.mubr.msk.bf16.mxu0 %vm6251_vm0, %v6250_v5  ;;  %v6077_v3 = vld [vmem:[%s6391_s12 + $0xd0] sm:$0xff]  }
  0x65   : > { %1950 = vperm.xlu1 %6040, %v1926_v1   ;;  %1945 = vperm.xlu0 %6039, %v1925_v2   ;;  %v1496_v1 = vld [vmem:[%s7613_s1 + $0x1a8] sm:$0xff]  ;;  %v1495_v2 = vld [vmem:[%s7613_s1 + $0x1a0] sm:$0xff] }
  0x66   : > { %5706 = vmatprep.mubr.msk.bf16.mxu1 %vm6251_vm0, %v6250_v5  ;;  %5747 = vmatpush3.bf16.msra.mxu0 %v6084_v22 }
  0x67   : > { %5748 = vmatprep.subr.bf16.mxu0 %v6087_v30 }
  0x69   : > { %1960 = vperm.xlu1 %6040, %v1928_v6   ;;  %1955 = vperm.xlu0 %6039, %v1927_v7   ;;  %v6789_v6 = vld [vmem:[%s7616_s4 + $0xb8] sm:$0xff]  }
  0x6a   : > { %5749 = vmatpush3.bf16.msra.mxu0 %v6087_v30 }
  0x6b   : > { %5677 = vmatmul.mubr.msk.bf16.gmra.mxu0 %vm437_vm1, %v6065_v10  ;;  %5750 = vmatprep.subr.bf16.mxu0 %v6091_v38  ;;  %v1941_v10 = vld [vmem:[%s7613_s1 + $0x230] sm:$0xff] }
  0x6c   : > { %5707 = vmatmul.mubr.msk.bf16.vlgmr.msra.gmra.mxu1 %vm437_vm1, %v6066_v11  ;;  %5680 = vmatprep.mubr.msk.bf16.mxu0 %vm6251_vm0, %v6250_v5 }
  0x6d   : > { %1970 = vperm.xlu1 %6040, %v1930_v8   ;;  %1965 = vperm.xlu0 %6039, %v1929_v9   ;;  %v1942_v9 = vld [vmem:[%s7613_s1 + $0x238] sm:$0xff] }
  0x6e   : > { %5710 = vmatprep.mubr.msk.bf16.mxu1 %vm6251_vm0, %v6250_v5  ;;  %5767 = vmatpush3.bf16.msra.mxu1 %v6083_v12 }
  0x6f   : > { %5768 = vmatprep.subr.bf16.mxu1 %v6085_v16  ;;  %5751 = vmatpush3.bf16.msra.mxu0 %v6091_v38 }
  0x70   : > { %5752 = vmatprep.subr.bf16.mxu0 %v6095_v43 }
  0x71   : > { %1980 = vperm.xlu1 %6040, %v1932_v14   ;;  %1975 = vperm.xlu0 %6039, %v1931_v15  }
  0x72   : > { %5769 = vmatpush3.bf16.msra.mxu1 %v6085_v16 }
  0x73   : > { %5681 = vmatmul.mubr.msk.bf16.gmra.mxu0 %vm437_vm1, %v6067_v19  ;;  %5770 = vmatprep.subr.bf16.mxu1 %v6086_v21  ;;  %v6822_v19 = vld [vmem:[%s7616_s4 + $0xf8] sm:$0xff]  }
  0x74   : > { %5711 = vmatmul.mubr.msk.bf16.gmra.mxu1 %vm437_vm1, %v6068_v20  ;;  %5684 = vmatprep.mubr.msk.bf16.mxu0 %vm6251_vm0, %v6250_v5 }
  0x75   : > { %1544 = vperm.xlu1 %6040, %v1488_v17   ;;  %1539 = vperm.xlu0 %6039, %v1487_v18   ;;  %v6080_v18 = vld [vmem:[%s6391_s12 + $0x118] sm:$0xff]  }
  0x76   : > { %5714 = vmatprep.mubr.msk.bf16.mxu1 %vm6251_vm0, %v6250_v5  ;;  %5771 = vmatpush3.bf16.msra.mxu1 %v6086_v21 }
  0x77   : > { %5772 = vmatprep.subr.bf16.mxu1 %v6088_v25  ;;  %5753 = vmatpush3.bf16.msra.mxu0 %v6095_v43 }
  0x78   : > { %5754 = vmatprep.subr.bf16.mxu0 %v6097_v48 }
  0x79   : > { %1554 = vperm.xlu1 %6040, %v1490_v23   ;;  %1549 = vperm.xlu0 %6039, %v1489_v24  }
  0x7a   : > { %5773 = vmatpush3.bf16.msra.mxu1 %v6088_v25 }
  0x7b   : > { %5685 = vmatmul.mubr.msk.bf16.gmra.mxu0 %vm437_vm1, %v6069_v28  ;;  %5774 = vmatprep.subr.bf16.mxu1 %v6089_v33 }
  0x7c   : > { %5715 = vmatmul.mubr.msk.bf16.gmra.mxu1 %vm437_vm1, %v6070_v29  ;;  %5688 = vmatprep.mubr.msk.bf16.mxu0 %vm6251_vm0, %v6250_v5 }
  0x7d   : > { %1564 = vperm.xlu1 %6040, %v1492_v26   ;;  %1559 = vperm.xlu0 %6039, %v1491_v27  }
  0x7e   : > { %5718 = vmatprep.mubr.msk.bf16.mxu1 %vm6251_vm0, %v6250_v5  ;;  %5775 = vmatpush3.bf16.msra.mxu1 %v6089_v33 }
  0x7f   : > { %5776 = vmatprep.subr.bf16.mxu1 %v6092_v39  ;;  %5755 = vmatpush3.bf16.msra.mxu0 %v6097_v48 }
  0x80   : > { %5756 = vmatprep.subr.bf16.mxu0 %v6099_v52 }
  0x81   : > { %1574 = vperm.xlu1 %6040, %v1494_v31   ;;  %1569 = vperm.xlu0 %6039, %v1493_v32  }
  0x82   : > { %5777 = vmatpush3.bf16.msra.mxu1 %v6092_v39 }
  0x83   : > { %5689 = vmatmul.mubr.msk.bf16.gmra.mxu0 %vm437_vm1, %v6071_v36  ;;  %5778 = vmatprep.subr.bf16.mxu1 %v6094_v42 }
  0x84   : > { %5719 = vmatmul.mubr.msk.bf16.gmra.mxu1 %vm437_vm1, %v6072_v37  ;;  %5692 = vmatprep.mubr.msk.bf16.mxu0 %vm6251_vm0, %v6250_v5 }
  0x85   : > { %1990 = vperm.xlu1 %6040, %v1934_v34   ;;  %1985 = vperm.xlu0 %6039, %v1933_v35  }
  0x86   : > { %5722 = vmatprep.mubr.msk.bf16.mxu1 %vm6251_vm0, %v6250_v5  ;;  %5779 = vmatpush3.bf16.msra.mxu1 %v6094_v42 }
  0x87   : > { %5780 = vmatprep.subr.bf16.mxu1 %v6096_v51  ;;  %5757 = vmatpush3.bf16.msra.mxu0 %v6099_v52 }
  0x88   : > { %5790 = vmatprep.subr.bf16.mxu0 %v6789_v6 }
  0x89   : > { %2000 = vperm.xlu1 %6040, %v1936_v40   ;;  %1995 = vperm.xlu0 %6039, %v1935_v41  }
  0x8a   : > { %5781 = vmatpush3.bf16.msra.mxu1 %v6096_v51 }
  0x8b   : > { %5693 = vmatmul.mubr.msk.bf16.gmra.mxu0 %vm437_vm1, %v6073_v46  ;;  %5814 = vmatprep.subr.bf16.mxu1 %v6822_v19 }
  0x8c   : > { %5723 = vmatmul.mubr.msk.bf16.gmra.mxu1 %vm437_vm1, %v6074_v47  ;;  %5696 = vmatprep.mubr.msk.bf16.mxu0 %vm6251_vm0, %v6250_v5 }
  0x8d   : > { %2010 = vperm.xlu1 %6040, %v1938_v44   ;;  %2005 = vperm.xlu0 %6039, %v1937_v45   ;;  %v6881_v45 = vld [vmem:[%s7615_s3] ss:$0 sm:$0xff] }
  0x8e   : > { %5726 = vmatprep.mubr.msk.bf16.mxu1 %vm6251_vm0, %v6250_v5 }
  0x90   : > { %v6746_v53 = vpop.permute.xlu1 %1063  ;;  %v6748_v54 = vpop.permute.xlu0 %1053 }
  0x91   : > { %2020 = vperm.xlu1 %6040, %v1940_v49   ;;  %2015 = vperm.xlu0 %6039, %v1939_v50  }
  0x93   : > { %5697 = vmatmul.mubr.msk.bf16.gmra.mxu0 %vm437_vm1, %v6075_v57 }
  0x94   : > { %v6758_v59 = vpop.permute.xlu1 %1068  ;;  %v6760_v60 = vpop.permute.xlu0 %1058  ;;  %5727 = vmatmul.mubr.msk.bf16.gmra.mxu1 %vm437_vm1, %v6076_v58  ;;  %5700 = vmatprep.mubr.msk.bf16.mxu0 %vm6251_vm0, %v6250_v5 }
  0x95   : > { %693 = vperm.xlu1 %6040, %v605_v55   ;;  %688 = vperm.xlu0 %6039, %v604_v56  }
  0x96   : > { %5730 = vmatprep.mubr.msk.bf16.mxu1 %vm6251_vm0, %v6250_v5 }
  0x98   : > { %v6774_v63 = vpop.permute.xlu1 %1078  ;;  %v6776_v0 = vpop.permute.xlu0 %1073 }
  0x99   : > { %1138 = vperm.xlu1 %6040, %v1050_v61   ;;  %1133 = vperm.xlu0 %6039, %v1049_v62  }
  0x9b   : > { %5701 = vmatmul.mubr.msk.bf16.gmra.mxu0 %vm437_vm1, %v6077_v3 }
  0x9c   : > { %v6791_v7 = vpop.permute.xlu1 %1088  ;;  %v6793_v8 = vpop.permute.xlu0 %1083  ;;  %5731 = vmatmul.mubr.msk.bf16.gmra.mxu1 %vm437_vm1, %v6078_v4 }
  0x9d   : > { %1584 = vperm.xlu1 %6040, %v1496_v1   ;;  %1579 = vperm.xlu0 %6039, %v1495_v2  }
  0x9e   : > { %5734 = vmatprep.mubr.msk.bf16.mxu1 %vm6251_vm0, %v6250_v5 }
  0xa0   : > { %v614_v11 = vpop.permute.xlu1 %613  ;;  %v609_v12 = vpop.permute.xlu0 %608 }
  0xa1   : > { %2030 = vperm.xlu1 %6040, %v1942_v9   ;;  %2025 = vperm.xlu0 %6039, %v1941_v10  }
  0xa4   : > { %v6807_v14 = vpop.permute.xlu1 %623  ;;  %v6809_v15 = vpop.permute.xlu0 %618  ;;  %5735 = vmatmul.mubr.msk.bf16.gmra.mxu1 %vm437_vm1, %v6079_v13 }
  0xa5   : > { %5738 = vmatprep.mubr.msk.bf16.mxu1 %vm6251_vm0, %v6250_v5 }
  0xa8   : > { %v6814_v16 = vpop.permute.xlu1 %633  ;;  %v6816_v17 = vpop.permute.xlu0 %628 }
  0xac   : > { %v6824_v20 = vpop.permute.xlu1 %643  ;;  %v6826_v21 = vpop.permute.xlu0 %638  ;;  %5739 = vmatmul.mubr.msk.bf16.gmra.mxu1 %vm437_vm1, %v6080_v18 }
  0xb0   : > { %v6830_v22 = vpop.permute.xlu1 %1098  ;;  %v6832_v5 = vpop.permute.xlu0 %1093 }
  0xb4   : > { %v6834_v23 = vpop.permute.xlu1 %1108  ;;  %v6836_v24 = vpop.permute.xlu0 %1103 }
  0xb8   : > { %v6838_v25 = vpop.permute.xlu1 %1118  ;;  %v6840_v26 = vpop.permute.xlu0 %1113 }
  0xbc   : > { %v6842_v27 = vpop.permute.xlu1 %1128  ;;  %v6844_v28 = vpop.permute.xlu0 %1123 }
  0xc0   : > { %v6846_v29 = vpop.permute.xlu1 %653  ;;  %v6848_v30 = vpop.permute.xlu0 %648 }
  0xc4   : > { %v6850_v31 = vpop.permute.xlu1 %663  ;;  %v6852_v32 = vpop.permute.xlu0 %658 }
  0xc8   : > { %v6854_v33 = vpop.permute.xlu1 %673  ;;  %v6856_v34 = vpop.permute.xlu0 %668 }
  0xcc   : > { %v6858_v35 = vpop.permute.xlu1 %683  ;;  %v6860_v36 = vpop.permute.xlu0 %678 }
  0xd0   : > { %v6862_v37 = vpop.permute.xlu1 %1504  ;;  %v6864_v38 = vpop.permute.xlu0 %1499 }
  0xd4   : > { %v6866_v39 = vpop.permute.xlu1 %1514  ;;  %v6868_v40 = vpop.permute.xlu0 %1509 }
  0xd8   : > { %v6870_v41 = vpop.permute.xlu1 %1524  ;;  %v6872_v42 = vpop.permute.xlu0 %1519 }
  0xdb   : > { %v499_v46 = vpop.f32.mrf.mxu0 }
  0xdc   : > { %v6874_v43 = vpop.permute.xlu1 %1534  ;;  %v6876_v44 = vpop.permute.xlu0 %1529  ;;  %v500_v48 = vadd.f32 %v6881_v45, %v499_v46 }
  0xdd   : > { %7625 = vst [vmem:[#allocation6_spill] sm:$0xff] %v6874_v43  ;;  %v6883_v47 = vpop.f32.mrf.mxu1  ;;  %v5594_v49 = vpop.f32.mrf.mxu0 }
  0xde   : > { %v570_v51 = vmax.f32 %v500_v48, 0.0 }
  0xdf   : > { %v5626_v50 = vpop.f32.mrf.mxu1  ;;  %v502_v56 = vpop.f32.mrf.mxu0 }
  0xe0   : > { %v6886_v52 = vpop.permute.xlu1 %1950  ;;  %v6888_v55 = vpop.permute.xlu0 %1945  ;;  %v503_v58 = vadd.f32 %v6881_v45, %v502_v56  ;;  %v696_v1 = vmul.f32 %v609_v12, %v570_v51 }
  0xe1   : > { %v6890_v57 = vpop.f32.mrf.mxu1  ;;  %v5595_v61 = vpop.f32.mrf.mxu0 }
  0xe2   : > { %v571_v2 = vmax.f32 %v503_v58, 0.0 }
  0xe3   : > { %v5627_v62 = vpop.f32.mrf.mxu1  ;;  %v507_v9 = vpop.f32.mrf.mxu0 }
  0xe4   : > { %v6893_v3 = vpop.permute.xlu1 %1960  ;;  %v6895_v4 = vpop.permute.xlu0 %1955  ;;  %v697_v13 = vmul.f32 %v614_v11, %v571_v2  ;;  %v508_v18 = vadd.f32 %v6881_v45, %v507_v9 }
  0xe5   : > { %v944_v10 = vpop.f32.mrf.mxu1  ;;  %v5598_v48 = vpop.f32.mrf.mxu0 }
  0xe6   : > { %v945_v46 = vadd.f32 %v6881_v45, %v944_v10  ;;  %v5216_v50 = vpack.c.bf16 %v697_v13, %v696_v1  ;;  %v572_v43 = vmax.f32 %v508_v18, 0.0 }
  0xe7   : > { %v5632_v49 = vpop.f32.mrf.mxu1  ;;  %v510_v51 = vpop.f32.mrf.mxu0 }
  0xe8   : > { %v6899_v56 = vpop.permute.xlu1 %1970  ;;  %v6901_v61 = vpop.permute.xlu0 %1965  ;;  %v1015_v12 = vmax.f32 %v945_v46, 0.0  ;;  %5217 = vst [vmem:[#allocation2] sm:$0xff] %v5216_v50   ;;  %v511_v62 = vadd.f32 %v6881_v45, %v510_v51  ;;  %v698_v10 = vmul.f32 %v6809_v15, %v572_v43 }
  0xe9   : > { %7626 = vst [vmem:[#allocation7_spill] sm:$0xff] %v6899_v56  ;;  %7627 = vst [vmem:[#allocation8_spill] sm:$0xff] %v6901_v61  ;;  %v947_v58 = vpop.f32.mrf.mxu1  ;;  %v5599_v2 = vpop.f32.mrf.mxu0 }
  0xea   : > { %v948_v11 = vadd.f32 %v6881_v45, %v947_v58  ;;  %v573_v48 = vmax.f32 %v511_v62, 0.0  ;;  %v1141_v18 = vmul.f32 %v6748_v54, %v1015_v12 }
  0xeb   : > { %v5633_v9 = vpop.f32.mrf.mxu1  ;;  %v515_v46 = vpop.f32.mrf.mxu0 }
  0xec   : > { %v1016_v49 = vmax.f32 %v948_v11, 0.0  ;;  %v6906_v1 = vpop.permute.xlu1 %1980  ;;  %v6908_v13 = vpop.permute.xlu0 %1975  ;;  %v699_v50 = vmul.f32 %v6807_v14, %v573_v48  ;;  %v516_v58 = vadd.f32 %v6881_v45, %v515_v46 }
  0xed   : > { %7628 = vst [vmem:[#allocation9_spill] sm:$0xff] %v6906_v1  ;;  %7629 = vst [vmem:[#allocation10_spill] sm:$0xff] %v6908_v13  ;;  %v952_v56 = vpop.f32.mrf.mxu1  ;;  %v5602_v9 = vpop.f32.mrf.mxu0 }
  0xee   : > { %v1142_v51 = vmul.f32 %v6760_v60, %v1016_v49  ;;  %v953_v2 = vadd.f32 %v6881_v45, %v952_v56  ;;  %v5221_v43 = vpack.c.bf16 %v699_v50, %v698_v10  ;;  %v574_v13 = vmax.f32 %v516_v58, 0.0 }
  0xef   : > { %v5636_v15 = vpop.f32.mrf.mxu1  ;;  %v518_v12 = vpop.f32.mrf.mxu0 }
  0xf0   : > { %v5261_v62 = vpack.c.bf16 %v1142_v51, %v1141_v18  ;;  %v6915_v11 = vpop.permute.xlu1 %1544  ;;  %v6917_v1 = vpop.permute.xlu0 %1539  ;;  %v1017_v54 = vmax.f32 %v953_v2, 0.0  ;;  %5393 = vst [vmem:[#allocation2 + $0x8] sm:$0xff] %v5221_v43   ;;  %v519_v60 = vadd.f32 %v6881_v45, %v518_v12  ;;  %v700_v50 = vmul.f32 %v6816_v17, %v574_v13 }
  0xf1   : > { %v955_v61 = vpop.f32.mrf.mxu1  ;;  %v5603_v48 = vpop.f32.mrf.mxu0 }
  0xf2   : > { %5262 = vst [vmem:[#allocation2 + $0x48] sm:$0xff] %v5261_v62   ;;  %v956_v14 = vadd.f32 %v6881_v45, %v955_v61  ;;  %v575_v49 = vmax.f32 %v519_v60, 0.0  ;;  %v1143_v51 = vmul.f32 %v6746_v53, %v1017_v54 }
  0xf3   : > { %v5637_v56 = vpop.f32.mrf.mxu1  ;;  %v523_v58 = vpop.f32.mrf.mxu0 }
  0xf4   : > { %v1018_v46 = vmax.f32 %v956_v14, 0.0  ;;  %v6921_v10 = vpop.permute.xlu1 %1554  ;;  %v6923_v18 = vpop.permute.xlu0 %1549  ;;  %v701_v9 = vmul.f32 %v6814_v16, %v575_v49  ;;  %v524_v61 = vadd.f32 %v6881_v45, %v523_v58 }
  0xf5   : > { %7630 = vst [vmem:[#allocation11_spill] sm:$0xff] %v6921_v10  ;;  %v960_v2 = vpop.f32.mrf.mxu1  ;;  %v5606_v62 = vpop.f32.mrf.mxu0 }
  0xf6   : > { %v1144_v15 = vmul.f32 %v6758_v59, %v1018_v46  ;;  %v961_v43 = vadd.f32 %v6881_v45, %v960_v2  ;;  %v5226_v60 = vpack.c.bf16 %v701_v9, %v700_v50  ;;  %v576_v48 = vmax.f32 %v524_v61, 0.0 }
  0xf7   : > { %v5640_v12 = vpop.f32.mrf.mxu1  ;;  %v526_v53 = vpop.f32.mrf.mxu0  ;;  %v6090_v54 = vld [vmem:[#allocation2] ss:$8 sps:$4 sm:$0xff]  }
  0xf8   : > { %v5266_v14 = vpack.c.bf16 %v1144_v15, %v1143_v51  ;;  %v1019_v56 = vmax.f32 %v961_v43, 0.0  ;;  %v6931_v10 = vpop.permute.xlu1 %1564  ;;  %v6933_v17 = vpop.permute.xlu0 %1559  ;;  %5394 = vst [vmem:[#allocation2 + $0x10] sm:$0xff] %v5226_v60   ;;  %v527_v59 = vadd.f32 %v6881_v45, %v526_v53  ;;  %5782 = vmatprep.mubr.bf16.mxu1 %v6090_v54  ;;  %v702_v9 = vmul.f32 %v6826_v21, %v576_v48 }
  0xf9   : > { %v963_v13 = vpop.f32.mrf.mxu1  ;;  %v5607_v49 = vpop.f32.mrf.mxu0 }
  0xfa   : > { %5401 = vst [vmem:[#allocation2 + $0x50] sm:$0xff] %v5266_v14   ;;  %v964_v16 = vadd.f32 %v6881_v45, %v963_v13  ;;  %v577_v50 = vmax.f32 %v527_v59, 0.0  ;;  %v1145_v15 = vmul.f32 %v6776_v0, %v1019_v56 }
  0xfb   : > { %v5641_v46 = vpop.f32.mrf.mxu1  ;;  %v531_v61 = vpop.f32.mrf.mxu0 }
  0xfc   : > { %v1020_v51 = vmax.f32 %v964_v16, 0.0  ;;  %v6937_v58 = vpop.permute.xlu1 %1574  ;;  %v6939_v2 = vpop.permute.xlu0 %1569  ;;  %v703_v62 = vmul.f32 %v6824_v20, %v577_v50  ;;  %v532_v60 = vadd.f32 %v6881_v45, %v531_v61 }
  0xfd   : > { %v968_v43 = vpop.f32.mrf.mxu1  ;;  %v5610_v53 = vpop.f32.mrf.mxu0 }
  0xfe   : > { %v1146_v12 = vmul.f32 %v6774_v63, %v1020_v51  ;;  %v969_v14 = vadd.f32 %v6881_v45, %v968_v43  ;;  %v5231_v54 = vpack.c.bf16 %v703_v62, %v702_v9  ;;  %v578_v16 = vmax.f32 %v532_v60, 0.0 }
  0xff   : > { %v5644_v13 = vpop.f32.mrf.mxu1  ;;  %v534_v0 = vpop.f32.mrf.mxu0 }
 0x100   : > { %v5271_v59 = vpack.c.bf16 %v1146_v12, %v1145_v15  ;;  %v1021_v49 = vmax.f32 %v969_v14, 0.0  ;;  %v6947_v46 = vpop.permute.xlu1 %1990  ;;  %v6949_v21 = vpop.permute.xlu0 %1985  ;;  %5395 = vst [vmem:[#allocation2 + $0x18] sm:$0xff] %v5231_v54   ;;  %v535_v63 = vadd.f32 %v6881_v45, %v534_v0  ;;  %v704_v62 = vmul.f32 %v6848_v30, %v578_v16 }
 0x101   : > { %v971_v48 = vpop.f32.mrf.mxu1  ;;  %v6093_v56 = vld [vmem:[#allocation2 + $0x48] ss:$8 sps:$4 sm:$0xff]   ;;  %v5611_v50 = vpop.f32.mrf.mxu0 }
 0x102   : > { %5402 = vst [vmem:[#allocation2 + $0x58] sm:$0xff] %v5271_v59   ;;  %v972_v20 = vadd.f32 %v6881_v45, %v971_v48  ;;  %5758 = vmatprep.mubr.bf16.mxu0 %v6093_v56  ;;  %v579_v9 = vmax.f32 %v535_v63, 0.0  ;;  %v1147_v12 = vmul.f32 %v6793_v8, %v1021_v49  ;;  %v6111_v8 = vld [vmem:[%s7616_s4 + $0xf0] sm:$0xff]  }
 0x103   : > { %v5645_v51 = vpop.f32.mrf.mxu1  ;;  %v539_v60 = vpop.f32.mrf.mxu0 }
 0x104   : > { %v1022_v15 = vmax.f32 %v972_v20, 0.0  ;;  %v6953_v61 = vpop.permute.xlu1 %2000  ;;  %v6955_v43 = vpop.permute.xlu0 %1995  ;;  %v705_v53 = vmul.f32 %v6846_v29, %v579_v9  ;;  %v540_v54 = vadd.f32 %v6881_v45, %v539_v60  ;;  %v567_v29 = vadd.f32 %v6881_v45, %v6890_v57  ;;  %v2467_v57 = vld [vmem:[#allocation2 + $0x8] sm:$0xf] }
 0x105   : > { %v976_v14 = vpop.f32.mrf.mxu1  ;;  %v5614_v0 = vpop.f32.mrf.mxu0 }
 0x106   : > { %v1148_v13 = vmul.f32 %v6791_v7, %v1022_v15  ;;  %v977_v59 = vadd.f32 %v6881_v45, %v976_v14  ;;  %v5236_v56 = vpack.c.bf16 %v705_v53, %v704_v62  ;;  %v580_v20 = vmax.f32 %v540_v54, 0.0  ;;  %v2465_v14 = vld [vmem:[#allocation2] sm:$0xf] }
 0x107   : > { %v5648_v48 = vpop.f32.mrf.mxu1  ;;  %v564_v7 = vadd.f32 %v6881_v45, %v6883_v47  ;;  %v542_v16 = vpop.f32.mrf.mxu0  ;;  %v6098_v9 = vld [vmem:[#allocation2 + $0x10] ss:$8 sps:$4 sm:$0xff]   ;;  %v587_v0 = vmax.f32 %v567_v29, 0.0 }
 0x108   : > { %v5276_v63 = vpack.c.bf16 %v1148_v13, %v1147_v12  ;;  %v1023_v50 = vmax.f32 %v977_v59, 0.0  ;;  %v6963_v51 = vpop.permute.xlu1 %2010  ;;  %v6965_v30 = vpop.permute.xlu0 %2005  ;;  %5396 = vst [vmem:[#allocation2 + $0x20] sm:$0xff] %v5236_v56   ;;  %v543_v15 = vadd.f32 %v6881_v45, %v542_v16  ;;  %5783 = vmatmul.mubr.bf16.vlgmr.msra.gmra.mxu1 %v6098_v9  ;;  %v706_v48 = vmul.f32 %v6852_v32, %v580_v20 }
 0x109   : > { %7631 = vst [vmem:[#allocation12_spill] sm:$0xff] %v6963_v51  ;;  %7632 = vst [vmem:[#allocation13_spill] sm:$0xff] %v6965_v30  ;;  %v979_v49 = vpop.f32.mrf.mxu1  ;;  %v5615_v12 = vpop.f32.mrf.mxu0  ;;  %5815 = vmatpush3.bf16.msra.mxu1 %v6822_v19  ;;  %v586_v59 = vmax.f32 %v564_v7, 0.0  ;;  %v2485_v32 = vshrl.u32 %v2465_v14, 16  ;;  %v2488_v20 = vshll.u32 %v2465_v14, 16 }
 0x10a   : > { %5403 = vst [vmem:[#allocation2 + $0x60] sm:$0xff] %v5276_v63   ;;  %v980_v62 = vadd.f32 %v6881_v45, %v979_v49  ;;  %v581_v53 = vmax.f32 %v543_v15, 0.0  ;;  %v1149_v56 = vmul.f32 %v6832_v5, %v1023_v50  ;;  %5816 = vmatprep.subr.bf16.mxu1 %v6111_v8  ;;  %v6114_v49 = vld [vmem:[%s7616_s4 + $0xe8] sm:$0xff]   ;;  %v2499_v5 = vshrl.u32 %v2467_v57, 16 }
 0x10b   : > { %v5649_v60 = vpop.f32.mrf.mxu1  ;;  %v547_v63 = vpop.f32.mrf.mxu0  ;;  %v2502_v50 = vshll.u32 %v2467_v57, 16 }
 0x10c   : > { %v1024_v13 = vmax.f32 %v980_v62, 0.0  ;;  %v6976_v54 = vpop.permute.xlu1 %2020  ;;  %v6978_v47 = vpop.permute.xlu0 %2015  ;;  %v707_v9 = vmul.f32 %v6850_v31, %v581_v53  ;;  %v548_v19 = vadd.f32 %v6881_v45, %v547_v63  ;;  %v6993_v31 = vld [vmem:[#allocation2 + $0x4] sm:$0x1] }
 0x10d   : > { %7633 = vst [vmem:[#allocation14_spill] sm:$0xff] %v6976_v54  ;;  %7634 = vst [vmem:[#allocation15_spill] sm:$0xff] %v6978_v47  ;;  %v984_v16 = vpop.f32.mrf.mxu1  ;;  %v5618_v29 = vpop.f32.mrf.mxu0  ;;  %5817 = vmatpush3.bf16.msra.mxu1 %v6111_v8  ;;  %v6116_v53 = vld [vmem:[%s7616_s4 + $0xe0] sm:$0xff]  }
 0x10e   : > { %v1150_v15 = vmul.f32 %v6830_v22, %v1024_v13  ;;  %v985_v7 = vadd.f32 %v6881_v45, %v984_v16  ;;  %v5241_v12 = vpack.c.bf16 %v707_v9, %v706_v48  ;;  %v582_v54 = vmax.f32 %v548_v19, 0.0  ;;  %v6103_v22 = vld [vmem:[%s7616_s4 + $0xb0] sm:$0xff]   ;;  %5818 = vmatprep.subr.bf16.mxu1 %v6114_v49  ;;  %v2471_v29 = vld [vmem:[#allocation2 + $0x18] sm:$0xf] }
 0x10f   : > { %v5652_v62 = vpop.f32.mrf.mxu1  ;;  %v550_v57 = vpop.f32.mrf.mxu0  ;;  %v7000_v19 = vrot.slane %v2485_v32, 4  ;;  %v6105_v32 = vld [vmem:[%s7616_s4 + $0xa8] sm:$0xff]  }
 0x110   : > { %v5281_v60 = vpack.c.bf16 %v1150_v15, %v1149_v56  ;;  %v1025_v47 = vmax.f32 %v985_v7, 0.0  ;;  %v694_v51 = vpop.permute.xlu1 %693  ;;  %v689_v30 = vpop.permute.xlu0 %688  ;;  %5397 = vst [vmem:[#allocation2 + $0x28] sm:$0xff] %v5241_v12   ;;  %v551_v63 = vadd.f32 %v6881_v45, %v550_v57  ;;  %v7002_v7 = vrot.slane %v2488_v20, 5  ;;  %v7022_v57 = vld [vmem:[#allocation2 + $0xc] sm:$0x1] }
 0x111   : > { %v713_v14 = vmul.f32 %v694_v51, %v587_v0  ;;  %v712_v13 = vmul.f32 %v689_v30, %v586_v59  ;;  %v987_v48 = vpop.f32.mrf.mxu1  ;;  %v6100_v56 = vld [vmem:[#allocation2 + $0x58] ss:$8 sps:$4 sm:$0xff]   ;;  %v5619_v8 = vpop.f32.mrf.mxu0  ;;  %v2494_v51 = vshll.u32 %v6993_v31, 16  ;;  %v2469_v30 = vld [vmem:[#allocation2 + $0x10] sm:$0xf]  ;;  %5819 = vmatpush3.bf16.msra.mxu1 %v6114_v49  ;;  %v708_v62 = vmul.f32 %v6856_v34, %v582_v54 }
 0x112   : > { %5404 = vst [vmem:[#allocation2 + $0x68] sm:$0xff] %v5281_v60   ;;  %v988_v16 = vadd.f32 %v6881_v45, %v987_v48  ;;  %5759 = vmatmul.mubr.bf16.vlgmr.msra.gmra.mxu0 %v6100_v56  ;;  %v583_v59 = vmax.f32 %v551_v63, 0.0  ;;  %v1151_v12 = vmul.f32 %v6836_v24, %v1025_v47  ;;  %v7011_v20 = vrot.slane %v2499_v5, 4  ;;  %5820 = vmatprep.subr.bf16.mxu1 %v6116_v53 }
 0x113   : > { %v5256_v9 = vpack.c.bf16 %v713_v14, %v712_v13  ;;  %v5653_v15 = vpop.f32.mrf.mxu1  ;;  %5791 = vmatpush3.bf16.msra.mxu0 %v6789_v6  ;;  %v555_v60 = vpop.f32.mrf.mxu0  ;;  %v7013_v31 = vrot.slane %v2502_v50, 5  ;;  %v6117_v6 = vld [vmem:[%s7616_s4 + $0xd8] sm:$0xff]   ;;  %v2513_v5 = vshrl.u32 %v2469_v30, 16  ;;  %v2516_v50 = vshll.u32 %v2469_v30, 16 }
 0x114   : > { %v1026_v0 = vmax.f32 %v988_v16, 0.0  ;;  %5792 = vmatprep.subr.bf16.mxu0 %v6103_v22  ;;  %v709_v34 = vmul.f32 %v6854_v33, %v583_v59  ;;  %v556_v54 = vadd.f32 %v6881_v45, %v555_v60  ;;  %v2527_v48 = vshrl.u32 %v2471_v29, 16  ;;  %v6120_v33 = vld [vmem:[%s7616_s4 + $0xd0] sm:$0xff]  }
 0x115   : > { %5400 = vst [vmem:[#allocation2 + $0x40] sm:$0xff] %v5256_v9   ;;  %v992_v14 = vpop.f32.mrf.mxu1  ;;  %v5622_v49 = vpop.f32.mrf.mxu0  ;;  %v2530_v56 = vshll.u32 %v2471_v29, 16  ;;  %5821 = vmatpush3.bf16.msra.mxu1 %v6116_v53  ;;  %v7032_v29 = vrot.slane %v2494_v51, 5  ;;  %v2491_v60 = vor.u32 %v7002_v7, %v7000_v19  ;;  %v6108_v19 = vld [vmem:[%s7616_s4 + $0x98] sm:$0xff]  }
 0x116   : > { %v1152_v24 = vmul.f32 %v6834_v23, %v1026_v0  ;;  %v993_v47 = vadd.f32 %v6881_v45, %v992_v14  ;;  %v5246_v63 = vpack.c.bf16 %v709_v34, %v708_v62  ;;  %v584_v9 = vmax.f32 %v556_v54, 0.0  ;;  %v6106_v23 = vld [vmem:[%s7616_s4 + $0xa0] sm:$0xff]   ;;  %5822 = vmatprep.subr.bf16.mxu1 %v6117_v6  ;;  %v2470_v14 = vld [vmem:[#allocation2 + $0x14] sm:$0x1] }
 0x117   : > { %v5656_v13 = vpop.f32.mrf.mxu1  ;;  %5793 = vmatpush3.bf16.msra.mxu0 %v6103_v22  ;;  %v558_v15 = vpop.f32.mrf.mxu0  ;;  %v6101_v0 = vld [vmem:[#allocation2 + $0x20] ss:$8 sps:$4 sm:$0xff]   ;;  %v2508_v62 = vshll.u32 %v7022_v57, 16  ;;  %v2515_v34 = vrot.slane %v2513_v5, 4  ;;  %v2505_v49 = vor.u32 %v7013_v31, %v7011_v20  ;;  %v2529_v7 = vrot.slane %v2527_v48, 4 }
 0x118   : > { %v5286_v16 = vpack.c.bf16 %v1152_v24, %v1151_v12  ;;  %v1027_v8 = vmax.f32 %v993_v47, 0.0  ;;  %5794 = vmatprep.subr.bf16.mxu0 %v6105_v32  ;;  %5398 = vst [vmem:[#allocation2 + $0x30] sm:$0xff] %v5246_v63   ;;  %v559_v30 = vadd.f32 %v6881_v45, %v558_v15  ;;  %5786 = vmatprep.mubr.bf16.mxu1 %v6101_v0  ;;  %v2518_v24 = vrot.slane %v2516_v50, 5  ;;  %v7039_v13 = vld [vmem:[#allocation2 + $0x1c] sm:$0x1] }
 0x119   : > { %v995_v59 = vpop.f32.mrf.mxu1  ;;  %v5623_v53 = vpop.f32.mrf.mxu0  ;;  %5823 = vmatpush3.bf16.msra.mxu1 %v6117_v6  ;;  %v710_v51 = vmul.f32 %v6860_v36, %v584_v9  ;;  %v2532_v5 = vrot.slane %v2530_v56, 5  ;;  %v7053_v9 = vrot.slane %v2491_v60, 4  ;;  %v2522_v48 = vshll.u32 %v2470_v14, 16 }
 0x11a   : > { %5405 = vst [vmem:[#allocation2 + $0x70] sm:$0xff] %v5286_v16   ;;  %v996_v22 = vadd.f32 %v6881_v45, %v995_v59  ;;  %v585_v54 = vmax.f32 %v559_v30, 0.0  ;;  %v1153_v57 = vmul.f32 %v6840_v26, %v1027_v8  ;;  %5824 = vmatprep.subr.bf16.mxu1 %v6120_v33  ;;  %v2519_v8 = vor.u32 %v2518_v24, %v2515_v34 }
 0x11b   : > { %v5657_v12 = vpop.f32.mrf.mxu1  ;;  %5795 = vmatpush3.bf16.msra.mxu0 %v6105_v32  ;;  %v1390_v16 = vpop.f32.mrf.mxu0  ;;  %v6122_v32 = vld [vmem:[%s7616_s4 + $0xc8] sm:$0xff]   ;;  %v2536_v56 = vshll.u32 %v7039_v13, 16  ;;  %v2533_v14 = vor.u32 %v2532_v5, %v2529_v7  ;;  %v7064_v24 = vrot.slane %v2505_v49, 4  ;;  %v2473_v5 = vld [vmem:[#allocation2 + $0x20] sm:$0xf] }
 0x11c   : > { %v1028_v47 = vmax.f32 %v996_v22, 0.0  ;;  %5796 = vmatprep.subr.bf16.mxu0 %v6106_v23  ;;  %v711_v20 = vmul.f32 %v6858_v35, %v585_v54  ;;  %v1391_v31 = vadd.f32 %v6881_v45, %v1390_v16  ;;  %v2475_v35 = vld [vmem:[#allocation2 + $0x28] sm:$0xf]  ;;  %v6124_v22 = vld [vmem:[%s7616_s4 + $0xc0] sm:$0xff]   ;;  %v7066_v54 = vrot.slane %v2508_v62, 5 }
 0x11d   : > { %v1000_v63 = vpop.f32.mrf.mxu1  ;;  %v5670_v50 = vpop.f32.mrf.mxu0  ;;  %5825 = vmatpush3.bf16.msra.mxu1 %v6120_v33  ;;  %v7068_v13 = vrot.slane %v2519_v8, 4 }
 0x11e   : > { %v1154_v36 = vmul.f32 %v6838_v25, %v1028_v47  ;;  %v1001_v26 = vadd.f32 %v6881_v45, %v1000_v63  ;;  %v5251_v15 = vpack.c.bf16 %v711_v20, %v710_v51  ;;  %v1461_v30 = vmax.f32 %v1391_v31, 0.0  ;;  %v6110_v25 = vld [vmem:[%s7616_s4 + $0x90] sm:$0xff]   ;;  %5826 = vmatprep.subr.bf16.mxu1 %v6122_v32 }
 0x11f   : > { %v5660_v6 = vpop.f32.mrf.mxu1  ;;  %5797 = vmatpush3.bf16.msra.mxu0 %v6106_v23  ;;  %v1393_v12 = vpop.f32.mrf.mxu0  ;;  %v7070_v51 = vrot.slane %v2522_v48, 5  ;;  %v2558_v63 = vshll.u32 %v2475_v35, 16  ;;  %v7077_v31 = vrot.slane %v2533_v14, 4 }
 0x120   : > { %v5291_v59 = vpack.c.bf16 %v1154_v36, %v1153_v57  ;;  %v1029_v0 = vmax.f32 %v1001_v26, 0.0  ;;  %5798 = vmatprep.subr.bf16.mxu0 %v6108_v19  ;;  %5399 = vst [vmem:[#allocation2 + $0x38] sm:$0xff] %v5251_v15   ;;  %v1394_v34 = vadd.f32 %v6881_v45, %v1393_v12  ;;  %v2555_v57 = vshrl.u32 %v2475_v35, 16  ;;  %v6113_v26 = vld [vmem:[%s7616_s4 + $0x88] sm:$0xff]  }
 0x121   : > { %v1003_v53 = vpop.f32.mrf.mxu1  ;;  %v6104_v60 = vld [vmem:[#allocation2 + $0x68] ss:$8 sps:$4 sm:$0xff]   ;;  %v5671_v47 = vpop.f32.mrf.mxu0  ;;  %5827 = vmatpush3.bf16.msra.mxu1 %v6122_v32  ;;  %v1587_v49 = vmul.f32 %v6864_v38, %v1461_v30  ;;  %v7079_v6 = vrot.slane %v2536_v56, 5  ;;  %v2541_v15 = vshrl.u32 %v2473_v5, 16 }
 0x122   : > { %5406 = vst [vmem:[#allocation2 + $0x78] sm:$0xff] %v5291_v59   ;;  %v1004_v23 = vadd.f32 %v6881_v45, %v1003_v53  ;;  %5762 = vmatprep.mubr.bf16.mxu0 %v6104_v60  ;;  %v1462_v7 = vmax.f32 %v1394_v34, 0.0  ;;  %v1155_v20 = vmul.f32 %v6844_v28, %v1029_v0  ;;  %5828 = vmatprep.subr.bf16.mxu1 %v6124_v22  ;;  %v2544_v59 = vshll.u32 %v2473_v5, 16 }
 0x123   : > { %v5661_v33 = vpop.f32.mrf.mxu1  ;;  %5799 = vmatpush3.bf16.msra.mxu0 %v6108_v19  ;;  %v1398_v36 = vpop.f32.mrf.mxu0  ;;  %v7084_v19 = vld [vmem:[%s7616_s4 + $0x178] sm:$0xff]   ;;  %v7090_v56 = vrot.slane %v2555_v57, 4  ;;  %v7092_v0 = vrot.slane %v2558_v63, 5  ;;  %v7108_v63 = vrot.slane %v2541_v15, 4 }
 0x124   : > { %v1030_v16 = vmax.f32 %v1004_v23, 0.0  ;;  %5800 = vmatprep.subr.bf16.mxu0 %v6110_v25  ;;  %v1588_v38 = vmul.f32 %v6862_v37, %v1462_v7  ;;  %v1399_v50 = vadd.f32 %v6881_v45, %v1398_v36  ;;  %v7100_v33 = vld [vmem:[#allocation2 + $0x2c] sm:$0x1]  ;;  %v7120_v15 = vld [vmem:[%s7616_s4 + $0x138] sm:$0xff]  }
 0x125   : > { %v1008_v62 = vpop.f32.mrf.mxu1  ;;  %v5674_v48 = vpop.f32.mrf.mxu0  ;;  %5829 = vmatpush3.bf16.msra.mxu1 %v6124_v22  ;;  %v6179_v22 = vld [vmem:[%s7618_s6 + $0x28] sm:$0xff]  }
 0x126   : > { %v1156_v28 = vmul.f32 %v6842_v27, %v1030_v16  ;;  %v1009_v32 = vadd.f32 %v6881_v45, %v1008_v62  ;;  %v5306_v35 = vpack.c.bf16 %v1588_v38, %v1587_v49  ;;  %v1463_v12 = vmax.f32 %v1399_v50, 0.0  ;;  %v6115_v27 = vld [vmem:[%s7616_s4 + $0x80] sm:$0xff]   ;;  %5862 = vmatprep.subr.bf16.mxu1 %v7084_v19  ;;  %v1134_v49 = vpop.permute.xlu0 %1133  ;;  %v2477_v38 = vld [vmem:[#allocation2 + $0x30] sm:$0xf] }
 0x127   : > { %v5664_v8 = vpop.f32.mrf.mxu1  ;;  %5801 = vmatpush3.bf16.msra.mxu0 %v6110_v25  ;;  %v1401_v60 = vpop.f32.mrf.mxu0  ;;  %v6107_v14 = vld [vmem:[#allocation2 + $0x30] ss:$8 sps:$4 sm:$0xff]   ;;  %v7110_v16 = vrot.slane %v2544_v59, 5  ;;  %v2564_v59 = vshll.u32 %v7100_v33, 16 }
 0x128   : > { %v5296_v30 = vpack.c.bf16 %v1156_v28, %v1155_v20  ;;  %v1031_v53 = vmax.f32 %v1009_v32, 0.0  ;;  %5802 = vmatprep.subr.bf16.mxu0 %v6113_v26  ;;  %5307 = vst [vmem:[#allocation2 + $0x90] sm:$0xff] %v5306_v35   ;;  %v1402_v34 = vadd.f32 %v6881_v45, %v1401_v60  ;;  %v2479_v25 = vld [vmem:[#allocation2 + $0x38] sm:$0xf]  ;;  %5787 = vmatmul.mubr.bf16.gmra.mxu1 %v6107_v14  ;;  %v1139_v20 = vpop.permute.xlu1 %1138 }
 0x129   : > { %v1011_v37 = vpop.f32.mrf.mxu1  ;;  %v5675_v57 = vpop.f32.mrf.mxu0  ;;  %v2583_v7 = vshrl.u32 %v2479_v25, 16  ;;  %v2586_v5 = vshll.u32 %v2479_v25, 16  ;;  %v2511_v28 = vsel %vm7104_vm4, %v7064_v24, %v7066_v54  ;;  %v1589_v50 = vmul.f32 %v6868_v40, %v1463_v12 }
 0x12a   : > { %5407 = vst [vmem:[#allocation2 + $0x80] sm:$0xff] %v5296_v30   ;;  %v1012_v23 = vadd.f32 %v6881_v45, %v1011_v37  ;;  %v1464_v36 = vmax.f32 %v1402_v34, 0.0  ;;  %v1157_v32 = vmul.f32 %v1134_v49, %v1031_v53  ;;  %v2569_v12 = vshrl.u32 %v2477_v38, 16 }
 0x12b   : > { %v5665_v47 = vpop.f32.mrf.mxu1  ;;  %5803 = vmatpush3.bf16.msra.mxu0 %v6113_v26  ;;  %v1406_v8 = vpop.f32.mrf.mxu0  ;;  %v2561_v26 = vor.u32 %v7092_v0, %v7090_v56  ;;  %v2572_v37 = vshll.u32 %v2477_v38, 16  ;;  %v2585_v60 = vrot.slane %v2583_v7, 4  ;;  %v2588_v14 = vrot.slane %v2586_v5, 5  ;;  %v2474_v56 = vld [vmem:[#allocation2 + $0x24] sm:$0x1] }
 0x12c   : > { %v1032_v62 = vmax.f32 %v1012_v23, 0.0  ;;  %5804 = vmatprep.subr.bf16.mxu0 %v6115_v27  ;;  %v1590_v24 = vmul.f32 %v6866_v39, %v1464_v36  ;;  %v1407_v54 = vadd.f32 %v6881_v45, %v1406_v8  ;;  %v2497_v39 = vsel %vm7104_vm4, %v7053_v9, %v7032_v29 }
 0x12d   : > { %v1836_v48 = vpop.f32.mrf.mxu1  ;;  %v5678_v35 = vpop.f32.mrf.mxu0  ;;  %v2547_v7 = vor.u32 %v7110_v16, %v7108_v63  ;;  %v2525_v49 = vsel %vm7104_vm4, %v7068_v13, %v7070_v51  ;;  %v2539_v29 = vsel %vm7104_vm4, %v7077_v31, %v7079_v6  ;;  %v2550_v9 = vshll.u32 %v2474_v56, 16  ;;  %v2478_v16 = vld [vmem:[#allocation2 + $0x34] sm:$0x1] }
 0x12e   : > { %v1158_v30 = vmul.f32 %v1139_v20, %v1032_v62  ;;  %v1837_v40 = vadd.f32 %v6881_v45, %v1836_v48  ;;  %v5311_v34 = vpack.c.bf16 %v1590_v24, %v1589_v50  ;;  %v1465_v25 = vmax.f32 %v1407_v54, 0.0 }
 0x12f   : > { %v5708_v53 = vpop.f32.mrf.mxu1  ;;  %5805 = vmatpush3.bf16.msra.mxu0 %v6115_v27  ;;  %v1409_v0 = vpop.f32.mrf.mxu0  ;;  %v4883_v20 = vcombine.low %v2497_v39, %v2511_v28  ;;  %v2562_v63 = vrot.slane %v2561_v26, 4  ;;  %v2571_v38 = vrot.slane %v2569_v12, 4  ;;  %v2480_v28 = vld [vmem:[#allocation2 + $0x3c] sm:$0x1]  ;;  %v2574_v8 = vrot.slane %v2572_v37, 5 }
 0x130   : > { %v5301_v23 = vpack.c.bf16 %v1158_v30, %v1157_v32  ;;  %v1907_v47 = vmax.f32 %v1837_v40, 0.0  ;;  %5838 = vmatprep.subr.bf16.mxu0 %v7120_v15  ;;  %5409 = vst [vmem:[#allocation2 + $0x98] sm:$0xff] %v5311_v34   ;;  %v1410_v5 = vadd.f32 %v6881_v45, %v1409_v0  ;;  %v2589_v48 = vor.u32 %v2588_v14, %v2585_v60 }
 0x131   : > { %v1839_v33 = vpop.f32.mrf.mxu1  ;;  %v6112_v57 = vld [vmem:[#allocation2 + $0x78] ss:$8 sps:$4 sm:$0xff]   ;;  %v5679_v62 = vpop.f32.mrf.mxu0  ;;  %v1591_v13 = vmul.f32 %v6872_v42, %v1465_v25  ;;  %v2548_v54 = vrot.slane %v2547_v7, 4  ;;  %v2566_v40 = vrot.slane %v2564_v59, 5  ;;  %v2552_v37 = vrot.slane %v2550_v9, 5 }
 0x132   : > { %5408 = vst [vmem:[#allocation2 + $0x88] sm:$0xff] %v5301_v23   ;;  %v1840_v27 = vadd.f32 %v6881_v45, %v1839_v33  ;;  %5763 = vmatmul.mubr.bf16.gmra.mxu0 %v6112_v57  ;;  %v1466_v32 = vmax.f32 %v1410_v5, 0.0  ;;  %v2033_v51 = vmul.f32 %v6888_v55, %v1907_v47  ;;  %v2578_v60 = vshll.u32 %v2478_v16, 16 }
 0x133   : > { %v5709_v36 = vpop.f32.mrf.mxu1  ;;  %5806 = vmatprep.mubr.bf16.mxu0 %v4883_v20  ;;  %v1414_v30 = vpop.f32.mrf.mxu0  ;;  %v2567_v42 = vsel %vm7104_vm4, %v2562_v63, %v2566_v40  ;;  %v2592_v55 = vshll.u32 %v2480_v28, 16  ;;  %v2575_v59 = vor.u32 %v2574_v8, %v2571_v38  ;;  %v4884_v0 = vcombine.low %v2525_v49, %v2539_v29  ;;  %v7637_v28 = vld [vmem:[#allocation6_spill] sm:$0xff] }
 0x134   : > { %v1908_v50 = vmax.f32 %v1840_v27, 0.0  ;;  %v1592_v31 = vmul.f32 %v6870_v41, %v1466_v32  ;;  %v1415_v26 = vadd.f32 %v6881_v45, %v1414_v30  ;;  %v6121_v41 = vld [vmem:[%s7616_s4 + $0x130] sm:$0xff]   ;;  %v2553_v57 = vsel %vm7104_vm4, %v2548_v54, %v2552_v37 }
 0x135   : > { %v1844_v24 = vpop.f32.mrf.mxu1  ;;  %v5682_v53 = vpop.f32.mrf.mxu0  ;;  %v4885_v5 = vcombine.low %v2553_v57, %v2567_v42  ;;  %v2594_v62 = vrot.slane %v2592_v55, 5  ;;  %v2576_v49 = vrot.slane %v2575_v59, 4 }
 0x136   : > { %v2034_v6 = vmul.f32 %v6886_v52, %v1908_v50  ;;  %v1845_v35 = vadd.f32 %v6881_v45, %v1844_v24  ;;  %v5316_v14 = vpack.c.bf16 %v1592_v31, %v1591_v13  ;;  %v2590_v52 = vrot.slane %v2589_v48, 4  ;;  %v6123_v50 = vld [vmem:[%s7616_s4 + $0x128] sm:$0xff]  }
 0x137   : > { %v5712_v12 = vpop.f32.mrf.mxu1  ;;  %v1467_v34 = vmax.f32 %v1415_v26, 0.0  ;;  %v1417_v47 = vpop.f32.mrf.mxu0  ;;  %v6118_v33 = vld [vmem:[#allocation2 + $0x90] ss:$8 sps:$4 sm:$0xff]  }
 0x138   : > { %v5351_v23 = vpack.c.bf16 %v2034_v6, %v2033_v51  ;;  %v1909_v25 = vmax.f32 %v1845_v35, 0.0  ;;  %5410 = vst [vmem:[#allocation2 + $0xa0] sm:$0xff] %v5316_v14   ;;  %v1418_v39 = vadd.f32 %v6881_v45, %v1417_v47  ;;  %5830 = vmatprep.mubr.bf16.mxu1 %v6118_v33  ;;  %v2595_v32 = vsel %vm7104_vm4, %v2590_v52, %v2594_v62  ;;  %v7639_v47 = vld [vmem:[#allocation7_spill] sm:$0xff] }
 0x139   : > { %v1847_v56 = vpop.f32.mrf.mxu1  ;;  %v5683_v27 = vpop.f32.mrf.mxu0  ;;  %v1593_v29 = vmul.f32 %v6876_v44, %v1467_v34  ;;  %v7173_v44 = vld [vmem:[%s7615_s3] ss:$0 sm:$0xff]  ;;  %v6127_v34 = vld [vmem:[%s7616_s4 + $0x118] sm:$0xff]  }
 0x13a   : > { %5352 = vst [vmem:[#allocation2 + $0xd8] sm:$0xff] %v5351_v23   ;;  %v1848_v7 = vadd.f32 %v6881_v45, %v1847_v56  ;;  %5807 = vmatmul.mubr.bf16.vlgmr.msra.gmra.mxu0 %v4884_v0  ;;  %v1468_v36 = vmax.f32 %v1418_v39, 0.0  ;;  %v2035_v63 = vmul.f32 %v6895_v4, %v1909_v25  ;;  %v2580_v45 = vrot.slane %v2578_v60, 5  ;;  %v7638_v23 = vld [vmem:[#allocation8_spill] sm:$0xff] }
 0x13b   : > { %v5713_v20 = vpop.f32.mrf.mxu1  ;;  %5810 = vmatprep.mubr.bf16.mxu0 %v4885_v5  ;;  %5839 = vmatpush3.bf16.msra.mxu0 %v7120_v15  ;;  %v1422_v16 = vpop.f32.mrf.mxu0 }
 0x13c   : > { %v1910_v9 = vmax.f32 %v1848_v7, 0.0  ;;  %5840 = vmatprep.subr.bf16.mxu0 %v6121_v41  ;;  %v1594_v8 = vmul.f32 %v7637_v28, %v1468_v36  ;;  %v1423_v4 = vadd.f32 %v7173_v44, %v1422_v16  ;;  %v2581_v54 = vsel %vm7104_vm4, %v2576_v49, %v2580_v45  ;;  %v6129_v20 = vld [vmem:[%s7616_s4 + $0x110] sm:$0xff]  }
 0x13d   : > { %v1852_v38 = vpop.f32.mrf.mxu1  ;;  %v5686_v13 = vpop.f32.mrf.mxu0  ;;  %v4886_v35 = vcombine.low %v2581_v54, %v2595_v32  ;;  %v7642_v54 = vld [vmem:[#allocation9_spill] sm:$0xff] }
 0x13e   : > { %v2036_v15 = vmul.f32 %v6893_v3, %v1910_v9  ;;  %v1853_v48 = vadd.f32 %v7173_v44, %v1852_v38  ;;  %v5321_v30 = vpack.c.bf16 %v1594_v8, %v1593_v29  ;;  %v6125_v3 = vld [vmem:[%s7616_s4 + $0x120] sm:$0xff]   ;;  %v1469_v40 = vmax.f32 %v1423_v4, 0.0  ;;  %v6131_v13 = vld [vmem:[%s7616_s4 + $0x108] sm:$0xff]  }
 0x13f   : > { %v5716_v51 = vpop.f32.mrf.mxu1  ;;  %5841 = vmatpush3.bf16.msra.mxu0 %v6121_v41  ;;  %v1425_v6 = vpop.f32.mrf.mxu0  ;;  %v7640_v8 = vld [vmem:[#allocation10_spill] sm:$0xff] }
 0x140   : > { %v5356_v24 = vpack.c.bf16 %v2036_v15, %v2035_v63  ;;  %v1911_v31 = vmax.f32 %v1853_v48, 0.0  ;;  %5842 = vmatprep.subr.bf16.mxu0 %v6123_v50  ;;  %5411 = vst [vmem:[#allocation2 + $0xa8] sm:$0xff] %v5321_v30   ;;  %v1426_v53 = vadd.f32 %v7173_v44, %v1425_v6  ;;  %v1595_v14 = vmul.f32 %v6917_v1, %v1469_v40  ;;  %v6132_v63 = vld [vmem:[%s7616_s4 + $0x170] sm:$0xff]   ;;  %v7641_v30 = vld [vmem:[#allocation11_spill] sm:$0xff] }
 0x141   : > { %v1855_v26 = vpop.f32.mrf.mxu1  ;;  %v5687_v37 = vpop.f32.mrf.mxu0  ;;  %v3090_v51 = vld [vmem:[#allocation2 + $0x90] sm:$0xf] }
 0x142   : > { %5417 = vst [vmem:[#allocation2 + $0xe0] sm:$0xff] %v5356_v24   ;;  %v1856_v12 = vadd.f32 %v7173_v44, %v1855_v26  ;;  %5811 = vmatmul.mubr.bf16.gmra.mxu0 %v4886_v35  ;;  %v1470_v60 = vmax.f32 %v1426_v53, 0.0  ;;  %v2037_v41 = vmul.f32 %v7638_v23, %v1911_v31  ;;  %v6134_v31 = vld [vmem:[%s7616_s4 + $0x168] sm:$0xff]   ;;  %v6133_v37 = vld [vmem:[%s7616_s4 + $0x100] sm:$0xff]  }
 0x143   : > { %v5717_v42 = vpop.f32.mrf.mxu1  ;;  %5843 = vmatpush3.bf16.msra.mxu0 %v6123_v50  ;;  %v1430_v59 = vpop.f32.mrf.mxu0  ;;  %v3092_v50 = vld [vmem:[#allocation2 + $0x98] sm:$0xf] }
 0x144   : > { %v1912_v55 = vmax.f32 %v1856_v12, 0.0  ;;  %5844 = vmatprep.subr.bf16.mxu0 %v6125_v3  ;;  %v1596_v25 = vmul.f32 %v6915_v11, %v1470_v60  ;;  %v1431_v0 = vadd.f32 %v7173_v44, %v1430_v59  ;;  %v3121_v35 = vshrl.u32 %v3092_v50, 16 }
 0x145   : > { %v1860_v52 = vpop.f32.mrf.mxu1  ;;  %v5690_v57 = vpop.f32.mrf.mxu0  ;;  %v3124_v53 = vshll.u32 %v3092_v50, 16  ;;  %v3107_v42 = vshrl.u32 %v3090_v51, 16 }
 0x146   : > { %v2038_v56 = vmul.f32 %v7639_v47, %v1912_v55  ;;  %v1861_v33 = vadd.f32 %v7173_v44, %v1860_v52  ;;  %v5326_v1 = vpack.c.bf16 %v1596_v25, %v1595_v14  ;;  %v1471_v5 = vmax.f32 %v1431_v0, 0.0  ;;  %v6137_v52 = vld [vmem:[%s7616_s4 + $0x160] sm:$0xff]  }
 0x147   : > { %v5720_v39 = vpop.f32.mrf.mxu1  ;;  %5845 = vmatpush3.bf16.msra.mxu0 %v6125_v3  ;;  %v1433_v62 = vpop.f32.mrf.mxu0  ;;  %v6126_v11 = vld [vmem:[#allocation2 + $0xa0] ss:$8 sps:$4 sm:$0xff]   ;;  %v3123_v0 = vrot.slane %v3121_v35, 4 }
 0x148   : > { %v5361_v7 = vpack.c.bf16 %v2038_v56, %v2037_v41  ;;  %v1913_v27 = vmax.f32 %v1861_v33, 0.0  ;;  %5846 = vmatprep.subr.bf16.mxu0 %v6127_v34  ;;  %5412 = vst [vmem:[#allocation2 + $0xb0] sm:$0xff] %v5326_v1   ;;  %v1434_v9 = vadd.f32 %v7173_v44, %v1433_v62  ;;  %5831 = vmatmul.mubr.bf16.vlgmr.msra.gmra.mxu1 %v6126_v11  ;;  %v3110_v56 = vshll.u32 %v3090_v51, 16  ;;  %v3094_v1 = vld [vmem:[#allocation2 + $0xa0] sm:$0xf]  ;;  %v6139_v62 = vld [vmem:[%s7616_s4 + $0x1b8] sm:$0xff]  }
 0x149   : > { %v1863_v36 = vpop.f32.mrf.mxu1  ;;  %v6128_v29 = vld [vmem:[#allocation2 + $0xd8] ss:$8 sps:$4 sm:$0xff]   ;;  %v5691_v16 = vpop.f32.mrf.mxu0  ;;  %v1597_v28 = vmul.f32 %v6923_v18, %v1471_v5  ;;  %5863 = vmatpush3.bf16.msra.mxu1 %v7084_v19  ;;  %v3126_v33 = vrot.slane %v3124_v53, 5  ;;  %v3138_v50 = vshll.u32 %v3094_v1, 16 }
 0x14a   : > { %5418 = vst [vmem:[#allocation2 + $0xe8] sm:$0xff] %v5361_v7   ;;  %v1864_v49 = vadd.f32 %v7173_v44, %v1863_v36  ;;  %v1472_v45 = vmax.f32 %v1434_v9, 0.0  ;;  %5854 = vmatprep.mubr.bf16.mxu0 %v6128_v29  ;;  %v2039_v15 = vmul.f32 %v7640_v8, %v1913_v27  ;;  %5864 = vmatprep.subr.bf16.mxu1 %v6132_v63  ;;  %v7227_v36 = vrot.slane %v3107_v42, 4 }
 0x14b   : > { %v5721_v38 = vpop.f32.mrf.mxu1  ;;  %5847 = vmatpush3.bf16.msra.mxu0 %v6127_v34  ;;  %v1438_v4 = vpop.f32.mrf.mxu0  ;;  %v3091_v34 = vld [vmem:[#allocation2 + $0x94] sm:$0x1] }
 0x14c   : > { %v1914_v32 = vmax.f32 %v1864_v49, 0.0  ;;  %5848 = vmatprep.subr.bf16.mxu0 %v6129_v20  ;;  %v1598_v24 = vmul.f32 %v7641_v30, %v1472_v45  ;;  %v1439_v40 = vadd.f32 %v7173_v44, %v1438_v4  ;;  %v3116_v11 = vshll.u32 %v3091_v34, 16  ;;  %v3096_v4 = vld [vmem:[#allocation2 + $0xa8] sm:$0xf] }
 0x14d   : > { %v1868_v48 = vpop.f32.mrf.mxu1  ;;  %v5694_v6 = vpop.f32.mrf.mxu0  ;;  %5865 = vmatpush3.bf16.msra.mxu1 %v6132_v63  ;;  %v7236_v38 = vrot.slane %v3110_v56, 5  ;;  %v3127_v45 = vor.u32 %v3126_v33, %v3123_v0  ;;  %v3149_v35 = vshrl.u32 %v3096_v4, 16  ;;  %v3152_v53 = vshll.u32 %v3096_v4, 16 }
 0x14e   : > { %v2040_v3 = vmul.f32 %v7642_v54, %v1914_v32  ;;  %v1869_v18 = vadd.f32 %v7173_v44, %v1868_v48  ;;  %v5331_v12 = vpack.c.bf16 %v1598_v24, %v1597_v28  ;;  %v1473_v60 = vmax.f32 %v1439_v40, 0.0  ;;  %5866 = vmatprep.subr.bf16.mxu1 %v6134_v31 }
 0x14f   : > { %v5724_v26 = vpop.f32.mrf.mxu1  ;;  %5849 = vmatpush3.bf16.msra.mxu0 %v6129_v20  ;;  %v1441_v14 = vpop.f32.mrf.mxu0  ;;  %v3135_v32 = vshrl.u32 %v3094_v1, 16  ;;  %v3113_v6 = vor.u32 %v7236_v38, %v7227_v36  ;;  %v3098_v34 = vld [vmem:[#allocation2 + $0xb0] sm:$0xf] }
 0x150   : > { %v5366_v19 = vpack.c.bf16 %v2040_v3, %v2039_v15  ;;  %v1915_v55 = vmax.f32 %v1869_v18, 0.0  ;;  %5850 = vmatprep.subr.bf16.mxu0 %v6131_v13  ;;  %5413 = vst [vmem:[#allocation2 + $0xb8] sm:$0xff] %v5331_v12   ;;  %v1442_v41 = vadd.f32 %v7173_v44, %v1441_v14  ;;  %v1599_v7 = vmul.f32 %v6933_v17, %v1473_v60  ;;  %v7238_v15 = vld [vmem:[#allocation2 + $0x9c] sm:$0x1]  ;;  %v6140_v3 = vld [vmem:[%s7616_s4 + $0x150] sm:$0xff]  }
 0x151   : > { %v1871_v23 = vpop.f32.mrf.mxu1  ;;  %v5695_v25 = vpop.f32.mrf.mxu0  ;;  %5867 = vmatpush3.bf16.msra.mxu1 %v6134_v31  ;;  %v6141_v31 = vld [vmem:[%s7616_s4 + $0x1b0] sm:$0xff]   ;;  %v7250_v26 = vrot.slane %v3116_v11, 5  ;;  %v3130_v42 = vshll.u32 %v7238_v15, 16 }
 0x152   : > { %5419 = vst [vmem:[#allocation2 + $0xf0] sm:$0xff] %v5366_v19   ;;  %v1872_v59 = vadd.f32 %v7173_v44, %v1871_v23  ;;  %v1474_v57 = vmax.f32 %v1442_v41, 0.0  ;;  %v2041_v5 = vmul.f32 %v6949_v21, %v1915_v55  ;;  %5868 = vmatprep.subr.bf16.mxu1 %v6137_v52  ;;  %v6138_v21 = vld [vmem:[%s7616_s4 + $0x158] sm:$0xff]  }
 0x153   : > { %v5725_v47 = vpop.f32.mrf.mxu1  ;;  %5851 = vmatpush3.bf16.msra.mxu0 %v6131_v13  ;;  %v1446_v27 = vpop.f32.mrf.mxu0 }
 0x154   : > { %v1916_v39 = vmax.f32 %v1872_v59, 0.0  ;;  %5852 = vmatprep.subr.bf16.mxu0 %v6133_v37  ;;  %v1600_v9 = vmul.f32 %v6931_v10, %v1474_v57  ;;  %v1447_v29 = vadd.f32 %v7173_v44, %v1446_v27  ;;  %v7257_v59 = vrot.slane %v3135_v32, 4  ;;  %v3095_v57 = vld [vmem:[#allocation2 + $0xa4] sm:$0x1] }
 0x155   : > { %v1876_v20 = vpop.f32.mrf.mxu1  ;;  %v5698_v63 = vpop.f32.mrf.mxu0  ;;  %5869 = vmatpush3.bf16.msra.mxu1 %v6137_v52  ;;  %v3140_v52 = vrot.slane %v3138_v50, 5  ;;  %v3163_v27 = vshrl.u32 %v3098_v34, 16 }
 0x156   : > { %v2042_v49 = vmul.f32 %v6947_v46, %v1916_v39  ;;  %v1877_v17 = vadd.f32 %v7173_v44, %v1876_v20  ;;  %v5336_v28 = vpack.c.bf16 %v1600_v9, %v1599_v7  ;;  %v1475_v8 = vmax.f32 %v1447_v29, 0.0  ;;  %5870 = vmatprep.subr.bf16.mxu1 %v6138_v21  ;;  %v6146_v29 = vld [vmem:[%s7616_s4 + $0x140] sm:$0xff]  }
 0x157   : > { %v5728_v16 = vpop.f32.mrf.mxu1  ;;  %5853 = vmatpush3.bf16.msra.mxu0 %v6133_v37  ;;  %v1449_v48 = vpop.f32.mrf.mxu0  ;;  %v6135_v51 = vld [vmem:[#allocation2 + $0xb0] ss:$8 sps:$4 sm:$0xff]   ;;  %v7252_v37 = vrot.slane %v3127_v45, 4  ;;  %v7268_v39 = vrot.slane %v3149_v35, 4  ;;  %v3166_v20 = vshll.u32 %v3098_v34, 16  ;;  %v3141_v38 = vor.u32 %v3140_v52, %v7257_v59 }
 0x158   : > { %v5371_v10 = vpack.c.bf16 %v2042_v49, %v2041_v5  ;;  %v1917_v46 = vmax.f32 %v1877_v17, 0.0  ;;  %5886 = vmatprep.subr.bf16.mxu0 %v6139_v62  ;;  %5414 = vst [vmem:[#allocation2 + $0xc0] sm:$0xff] %v5336_v28   ;;  %v1450_v30 = vadd.f32 %v7173_v44, %v1449_v48  ;;  %5834 = vmatprep.mubr.bf16.mxu1 %v6135_v51  ;;  %v3100_v60 = vld [vmem:[#allocation2 + $0xb8] sm:$0xf]  ;;  %v3132_v49 = vrot.slane %v3130_v42, 5  ;;  %v6147_v17 = vld [vmem:[%s7616_s4 + $0x1a0] sm:$0xff]   ;;  %v1580_v28 = vpop.permute.xlu0 %1579  ;;  %v1585_v48 = vpop.permute.xlu1 %1584 }
 0x159   : > { %v1879_v13 = vpop.f32.mrf.mxu1  ;;  %v6136_v54 = vld [vmem:[#allocation2 + $0xe8] ss:$8 sps:$4 sm:$0xff]   ;;  %v5699_v40 = vpop.f32.mrf.mxu0  ;;  %v1601_v55 = vmul.f32 %v6939_v2, %v1475_v8  ;;  %5871 = vmatpush3.bf16.msra.mxu1 %v6138_v21  ;;  %v3180_v1 = vshll.u32 %v3100_v60, 16  ;;  %v3144_v21 = vshll.u32 %v3095_v57, 16  ;;  %v3114_v16 = vrot.slane %v3113_v6, 4  ;;  %v6148_v6 = vld [vmem:[%s7616_s4 + $0x198] sm:$0xff]  }
 0x15a   : > { %5420 = vst [vmem:[#allocation2 + $0xf8] sm:$0xff] %v5371_v10   ;;  %v1880_v24 = vadd.f32 %v7173_v44, %v1879_v13  ;;  %v1476_v12 = vmax.f32 %v1450_v30, 0.0  ;;  %5855 = vmatmul.mubr.bf16.vlgmr.msra.gmra.mxu0 %v6136_v54  ;;  %v2043_v14 = vmul.f32 %v6955_v43, %v1917_v46  ;;  %5872 = vmatprep.subr.bf16.mxu1 %v6140_v3  ;;  %v6142_v2 = vld [vmem:[%s7616_s4 + $0x148] sm:$0xff]   ;;  %v3101_v4 = vld [vmem:[#allocation2 + $0xbc] sm:$0x1]  ;;  %v3168_v54 = vrot.slane %v3166_v20, 5 }
 0x15b   : > { %v5729_v18 = vpop.f32.mrf.mxu1  ;;  %v1454_v23 = vpop.f32.mrf.mxu0  ;;  %5887 = vmatpush3.bf16.msra.mxu0 %v6139_v62  ;;  %v6143_v43 = vld [vmem:[%s7616_s4 + $0x1a8] sm:$0xff]   ;;  %v3182_v32 = vrot.slane %v3180_v1, 5  ;;  %v3133_v8 = vsel %vm7104_vm4, %v7252_v37, %v3132_v49  ;;  %v7643_v13 = vld [vmem:[#allocation13_spill] sm:$0xff]  ;;  %v7644_v40 = vld [vmem:[#allocation12_spill] sm:$0xff] }
 0x15c   : > { %v1918_v19 = vmax.f32 %v1880_v24, 0.0  ;;  %v1602_v25 = vmul.f32 %v6937_v58, %v1476_v12  ;;  %5888 = vmatprep.subr.bf16.mxu0 %v6141_v31  ;;  %v7270_v58 = vrot.slane %v3152_v53, 5  ;;  %v3097_v46 = vld [vmem:[#allocation2 + $0xac] sm:$0x1]  ;;  %v3165_v24 = vrot.slane %v3163_v27, 4  ;;  %v7294_v35 = vld [vmem:[%s7616_s4 + $0x1f8] sm:$0xff]  }
 0x15d   : > { %v1884_v41 = vpop.f32.mrf.mxu1  ;;  %v5702_v0 = vpop.f32.mrf.mxu0  ;;  %5873 = vmatpush3.bf16.msra.mxu1 %v6140_v3  ;;  %v3146_v53 = vrot.slane %v3144_v21, 5  ;;  %v3158_v37 = vshll.u32 %v3097_v46, 16  ;;  %v6150_v23 = vld [vmem:[%s7616_s4 + $0x190] sm:$0xff]   ;;  %v7646_v21 = vld [vmem:[#allocation14_spill] sm:$0xff] }
 0x15e   : > { %v2044_v47 = vmul.f32 %v6953_v61, %v1918_v19  ;;  %v1885_v56 = vadd.f32 %v7173_v44, %v1884_v41  ;;  %v3177_v61 = vshrl.u32 %v3100_v60, 16  ;;  %v5341_v7 = vpack.c.bf16 %v1602_v25, %v1601_v55  ;;  %5874 = vmatprep.subr.bf16.mxu1 %v6142_v2 }
 0x15f   : > { %v5732_v33 = vpop.f32.mrf.mxu1  ;;  %v1457_v36 = vpop.f32.mrf.mxu0  ;;  %5889 = vmatpush3.bf16.msra.mxu0 %v6141_v31  ;;  %v3155_v15 = vor.u32 %v7270_v58, %v7268_v39  ;;  %v3102_v3 = vld [vmem:[#allocation2 + $0xc0] sm:$0xf]  ;;  %v3142_v19 = vrot.slane %v3141_v38, 4  ;;  %v3186_v60 = vshll.u32 %v3101_v4, 16  ;;  %v3119_v25 = vsel %vm7104_vm4, %v3114_v16, %v7250_v26  ;;  %v6152_v38 = vld [vmem:[%s7616_s4 + $0x188] sm:$0xff]  }
 0x160   : > { %v5376_v5 = vpack.c.bf16 %v2044_v47, %v2043_v14  ;;  %v1919_v62 = vmax.f32 %v1885_v56, 0.0  ;;  %5415 = vst [vmem:[#allocation2 + $0xc8] sm:$0xff] %v5341_v7   ;;  %5890 = vmatprep.subr.bf16.mxu0 %v6143_v43  ;;  %v3179_v45 = vrot.slane %v3177_v61, 4  ;;  %v3099_v14 = vld [vmem:[#allocation2 + $0xb4] sm:$0x1]  ;;  %v3191_v41 = vshrl.u32 %v3102_v3, 16 }
 0x161   : > { %v1887_v11 = vpop.f32.mrf.mxu1  ;;  %v5703_v50 = vpop.f32.mrf.mxu0  ;;  %5875 = vmatpush3.bf16.msra.mxu1 %v6142_v2  ;;  %v3194_v59 = vshll.u32 %v3102_v3, 16  ;;  %v3169_v47 = vor.u32 %v3168_v54, %v3165_v24  ;;  %v4967_v0 = vcombine.low %v3119_v25, %v3133_v8  ;;  %v3156_v33 = vrot.slane %v3155_v15, 4  ;;  %v6155_v25 = vld [vmem:[#allocation2 + $0x8] ss:$8 sps:$4 sm:$0xff]  }
 0x162   : > { %5421 = vst [vmem:[#allocation2 + $0x100] sm:$0xff] %v5376_v5   ;;  %v1888_v9 = vadd.f32 %v7173_v44, %v1887_v11  ;;  %v2045_v51 = vmul.f32 %v7643_v13, %v1919_v62  ;;  %5876 = vmatprep.subr.bf16.mxu1 %v6146_v29  ;;  %v3183_v42 = vor.u32 %v3182_v32, %v3179_v45  ;;  %v3172_v58 = vshll.u32 %v3099_v14, 16  ;;  %v3103_v45 = vld [vmem:[#allocation2 + $0xc4] sm:$0x1] }
 0x163   : > { %v5733_v63 = vpop.f32.mrf.mxu1  ;;  %5891 = vmatpush3.bf16.msra.mxu0 %v6143_v43  ;;  %v3160_v5 = vrot.slane %v3158_v37, 5  ;;  %v3193_v27 = vrot.slane %v3191_v41, 4  ;;  %v3196_v20 = vrot.slane %v3194_v59, 5  ;;  %v3170_v62 = vrot.slane %v3169_v47, 4  ;;  %v3716_v37 = vld [vmem:[#allocation2 + $0x10] sm:$0xf] }
 0x164   : > { %v1920_v10 = vmax.f32 %v1888_v9, 0.0  ;;  %5892 = vmatprep.subr.bf16.mxu0 %v6147_v17  ;;  %v3184_v61 = vrot.slane %v3183_v42, 4  ;;  %v3188_v36 = vrot.slane %v3186_v60, 5  ;;  %v3174_v50 = vrot.slane %v3172_v58, 5  ;;  %v3715_v58 = vld [vmem:[#allocation2 + $0xc] sm:$0x1] }
 0x165   : > { %v1892_v30 = vpop.f32.mrf.mxu1  ;;  %5877 = vmatpush3.bf16.msra.mxu1 %v6146_v29  ;;  %v7645_v29 = vld [vmem:[#allocation15_spill] sm:$0xff]  ;;  %v3161_v16 = vsel %vm7104_vm4, %v3156_v33, %v3160_v5  ;;  %v3147_v46 = vsel %vm7104_vm4, %v3142_v19, %v3146_v53  ;;  %v3197_v15 = vor.u32 %v3196_v20, %v3193_v27  ;;  %v3200_v24 = vshll.u32 %v3103_v45, 16  ;;  %v2031_v53 = vpop.permute.xlu1 %2030  ;;  %v6159_v33 = vld [vmem:[%s7616_s4 + $0x1d8] sm:$0xff]   ;;  %v6164_v5 = vld [vmem:[%s7616_s4 + $0x230] sm:$0xff]  }
 0x166   : > { %v2046_v18 = vmul.f32 %v7644_v40, %v1920_v10  ;;  %v1893_v31 = vadd.f32 %v7173_v44, %v1892_v30  ;;  %5910 = vmatprep.subr.bf16.mxu1 %v7294_v35  ;;  %v3189_v28 = vsel %vm7104_vm4, %v3184_v61, %v3188_v36  ;;  %v4968_v13 = vcombine.low %v3147_v46, %v3161_v16  ;;  %v6151_v30 = vld [vmem:[%s7616_s4 + $0x1f0] sm:$0xff]   ;;  %v6157_v40 = vld [vmem:[%s7616_s4 + $0x180] sm:$0xff]   ;;  %v6153_v19 = vld [vmem:[%s7616_s4 + $0x1e8] sm:$0xff]  }
 0x167   : > { %v5736_v12 = vpop.f32.mrf.mxu1  ;;  %v6144_v34 = vld [vmem:[#allocation2 + $0xc0] ss:$8 sps:$4 sm:$0xff]   ;;  %5893 = vmatpush3.bf16.msra.mxu0 %v6147_v17  ;;  %v3105_v11 = vld [vmem:[#allocation2 + $0xcc] sm:$0x1]  ;;  %v3202_v42 = vrot.slane %v3200_v24, 5  ;;  %v3748_v41 = vshll.u32 %v3716_v37, 16 }
 0x168   : > { %v5381_v55 = vpack.c.bf16 %v2046_v18, %v2045_v51  ;;  %v1921_v56 = vmax.f32 %v1893_v31, 0.0  ;;  %5894 = vmatprep.subr.bf16.mxu0 %v6148_v6  ;;  %v3104_v57 = vld [vmem:[#allocation2 + $0xc8] sm:$0xf]  ;;  %5835 = vmatmul.mubr.bf16.gmra.mxu1 %v6144_v34  ;;  %v3214_v4 = vshll.u32 %v3105_v11, 16  ;;  %v3175_v51 = vsel %vm7104_vm4, %v3170_v62, %v3174_v50  ;;  %v2026_v12 = vpop.permute.xlu0 %2025  ;;  %v6158_v34 = vld [vmem:[%s7616_s4 + $0x1e0] sm:$0xff]  }
 0x169   : > { %v1895_v52 = vpop.f32.mrf.mxu1  ;;  %v6145_v43 = vld [vmem:[#allocation2 + $0xf8] ss:$8 sps:$4 sm:$0xff]   ;;  %v3205_v1 = vshrl.u32 %v3104_v57, 16  ;;  %v3208_v26 = vshll.u32 %v3104_v57, 16  ;;  %5878 = vmatprep.mubr.bf16.mxu1 %v4967_v0  ;;  %v4969_v54 = vcombine.low %v3175_v51, %v3189_v28  ;;  %v3198_v31 = vrot.slane %v3197_v15, 4  ;;  %v6165_v11 = vld [vmem:[%s7616_s4 + $0x1c8] sm:$0xff]  }
 0x16a   : > { %5422 = vst [vmem:[#allocation2 + $0x108] sm:$0xff] %v5381_v55   ;;  %v1896_v2 = vadd.f32 %v7173_v44, %v1895_v52  ;;  %5858 = vmatprep.mubr.bf16.mxu0 %v6145_v43  ;;  %v2047_v17 = vmul.f32 %v7645_v29, %v1921_v56  ;;  %v3714_v55 = vld [vmem:[#allocation2 + $0x8] sm:$0xf]  ;;  %v3750_v0 = vrot.slane %v3748_v41, 5  ;;  %v3717_v61 = vld [vmem:[#allocation2 + $0x14] sm:$0x1] }
 0x16b   : > { %v5737_v39 = vpop.f32.mrf.mxu1  ;;  %5895 = vmatpush3.bf16.msra.mxu0 %v6148_v6  ;;  %v3207_v9 = vrot.slane %v3205_v1, 4  ;;  %v3210_v49 = vrot.slane %v3208_v26, 5  ;;  %v3216_v6 = vrot.slane %v3214_v4, 5  ;;  %v3203_v14 = vsel %vm7104_vm4, %v3198_v31, %v3202_v42  ;;  %v6161_v26 = vld [vmem:[#allocation2 + $0x18] ss:$8 sps:$4 sm:$0xff]  }
 0x16c   : > { %v1922_v7 = vmax.f32 %v1896_v2, 0.0  ;;  %5896 = vmatprep.subr.bf16.mxu0 %v6150_v23  ;;  %v3731_v47 = vshrl.u32 %v3714_v55, 16  ;;  %v3734_v56 = vshll.u32 %v3714_v55, 16  ;;  %v6156_v2 = vld [vmem:[#allocation2 + $0x50] ss:$8 sps:$4 sm:$0xff]   ;;  %v3740_v20 = vshll.u32 %v3715_v58, 16 }
 0x16d   : > { %v1900_v44 = vpop.f32.mrf.mxu1  ;;  %v3211_v10 = vor.u32 %v3210_v49, %v3207_v9  ;;  %v6162_v62 = vld [vmem:[#allocation2 + $0x28] ss:$8 sps:$4 sm:$0xff]   ;;  %v6168_v16 = vld [vmem:[%s7616_s4 + $0x1c0] sm:$0xff]  }
 0x16e   : > { %v2048_v63 = vmul.f32 %v7646_v21, %v1922_v7  ;;  %v3733_v57 = vrot.slane %v3731_v47, 4  ;;  %v3736_v39 = vrot.slane %v3734_v56, 5  ;;  %v6163_v7 = vld [vmem:[%s7616_s4 + $0x1d0] sm:$0xff]   ;;  %v3754_v44 = vshll.u32 %v3717_v61, 16  ;;  %v6166_v9 = vld [vmem:[%s7616_s4 + $0x228] sm:$0xff]   ;;  %v6169_v45 = vld [vmem:[%s7616_s4 + $0x220] sm:$0xff]  }
 0x16f   : > { %v5740_v32 = vpop.f32.mrf.mxu1  ;;  %5897 = vmatpush3.bf16.msra.mxu0 %v6150_v23  ;;  %v3212_v3 = vrot.slane %v3211_v10, 4  ;;  %v3745_v23 = vshrl.u32 %v3716_v37, 16  ;;  %v3742_v29 = vrot.slane %v3740_v20, 5  ;;  %v3720_v50 = vld [vmem:[#allocation2 + $0x20] sm:$0xf]  ;;  %v6171_v10 = vld [vmem:[%s7616_s4 + $0x218] sm:$0xff]  }
 0x170   : > { %v5386_v8 = vpack.c.bf16 %v2048_v63, %v2047_v17  ;;  %5898 = vmatprep.subr.bf16.mxu0 %v6152_v38  ;;  %5879 = vmatmul.mubr.bf16.vlgmr.msra.gmra.mxu1 %v4968_v13  ;;  %v3737_v27 = vor.u32 %v3736_v39, %v3733_v57  ;;  %v3756_v17 = vrot.slane %v3754_v44, 5  ;;  %v6167_v63 = vld [vmem:[#allocation2 + $0x38] ss:$8 sps:$4 sm:$0xff]   ;;  %v3724_v28 = vld [vmem:[#allocation2 + $0x30] sm:$0xf]  ;;  %v3773_v46 = vshrl.u32 %v3720_v50, 16 }
 0x171   : > { %v1903_v48 = vpop.f32.mrf.mxu1  ;;  %5911 = vmatpush3.bf16.msra.mxu1 %v7294_v35  ;;  %5882 = vmatprep.mubr.bf16.mxu1 %v4969_v54  ;;  %v3217_v60 = vsel %vm7104_vm4, %v3212_v3, %v3216_v6  ;;  %v6160_v35 = vld [vmem:[%s7616_s4 + $0x238] sm:$0xff]   ;;  %v3747_v43 = vrot.slane %v3745_v23, 4  ;;  %v3776_v15 = vshll.u32 %v3720_v50, 16  ;;  %v3722_v4 = vld [vmem:[#allocation2 + $0x28] sm:$0xf]  ;;  %v3804_v13 = vshll.u32 %v3724_v28, 16 }
 0x172   : > { %5423 = vst [vmem:[#allocation2 + $0x110] sm:$0xff] %v5386_v8   ;;  %5912 = vmatprep.subr.bf16.mxu1 %v6151_v30  ;;  %v4970_v52 = vcombine.low %v3203_v14, %v3217_v60  ;;  %v3738_v49 = vrot.slane %v3737_v27, 4  ;;  %v3718_v8 = vld [vmem:[#allocation2 + $0x18] sm:$0xf]  ;;  %v3801_v48 = vshrl.u32 %v3724_v28, 16  ;;  %v6173_v54 = vld [vmem:[%s7616_s4 + $0x210] sm:$0xff]  }
 0x173   : > { %v5741_v18 = vpop.f32.mrf.mxu1  ;;  %5899 = vmatpush3.bf16.msra.mxu0 %v6152_v38  ;;  %v3751_v1 = vor.u32 %v3750_v0, %v3747_v43  ;;  %v3759_v51 = vshrl.u32 %v3718_v8, 16  ;;  %v6170_v24 = vld [vmem:[#allocation2 + $0x60] ss:$8 sps:$4 sm:$0xff]   ;;  %v3787_v3 = vshrl.u32 %v3722_v4, 16  ;;  %v3775_v31 = vrot.slane %v3773_v46, 4 }
 0x174   : > { %5900 = vmatprep.subr.bf16.mxu0 %v6157_v40  ;;  %v3743_v38 = vsel %vm7104_vm4, %v3738_v49, %v3742_v29  ;;  %v6172_v18 = vld [vmem:[#allocation2 + $0x70] ss:$8 sps:$4 sm:$0xff]   ;;  %v3778_v6 = vrot.slane %v3776_v15, 5  ;;  %v3803_v53 = vrot.slane %v3801_v48, 4  ;;  %v3806_v12 = vrot.slane %v3804_v13, 5  ;;  %v6176_v39 = vld [vmem:[%s7616_s4 + $0x200] sm:$0xff]  }
 0x175   : > { %5913 = vmatpush3.bf16.msra.mxu1 %v6151_v30  ;;  %v3752_v36 = vrot.slane %v3751_v1, 4  ;;  %v3762_v30 = vshll.u32 %v3718_v8, 16  ;;  %v3721_v37 = vld [vmem:[#allocation2 + $0x24] sm:$0x1]  ;;  %v3761_v42 = vrot.slane %v3759_v51, 4  ;;  %v3789_v55 = vrot.slane %v3787_v3, 4 }
 0x176   : > { %5914 = vmatprep.subr.bf16.mxu1 %v6153_v19  ;;  %v3728_v23 = vld [vmem:[#allocation2 + $0x40] sm:$0xf]  ;;  %v3779_v41 = vor.u32 %v3778_v6, %v3775_v31  ;;  %v3807_v47 = vor.u32 %v3806_v12, %v3803_v53  ;;  %v3723_v43 = vld [vmem:[#allocation2 + $0x2c] sm:$0x1]  ;;  %v3727_v29 = vld [vmem:[#allocation2 + $0x3c] sm:$0x1] }
 0x177   : > { %5901 = vmatpush3.bf16.msra.mxu0 %v6157_v40  ;;  %v3757_v21 = vsel %vm7104_vm4, %v3752_v36, %v3756_v17  ;;  %v3790_v40 = vshll.u32 %v3722_v4, 16  ;;  %v3764_v60 = vrot.slane %v3762_v30, 5  ;;  %v3829_v0 = vshrl.u32 %v3728_v23, 16  ;;  %v6174_v57 = vld [vmem:[#allocation2 + $0x80] ss:$8 sps:$4 sm:$0xff]   ;;  %v6177_v3 = vld [vmem:[%s7618_s6 + $0x38] sm:$0xff]  }
 0x178   : > { %5934 = vmatprep.subr.bf16.mxu0 %v6160_v35  ;;  %5883 = vmatmul.mubr.bf16.gmra.mxu1 %v4970_v52  ;;  %v5051_v32 = vcombine.low %v3743_v38, %v3757_v21  ;;  %v3796_v27 = vshll.u32 %v3723_v43, 16  ;;  %v3808_v20 = vrot.slane %v3807_v47, 4  ;;  %v3824_v50 = vshll.u32 %v3727_v29, 16  ;;  %v6181_v31 = vld [vmem:[%s7620_s8] sm:$0xff]   ;;  %v6182_v6 = vld [vmem:[%s7618_s6 + $0x18] sm:$0xff]   ;;  %v6183_v53 = vld [vmem:[%s7618_s6 + $0x10] sm:$0xff]  }
 0x179   : > { %v6154_v59 = vld [vmem:[#allocation2 + $0x108] ss:$8 sps:$4 sm:$0xff]   ;;  %5915 = vmatpush3.bf16.msra.mxu1 %v6153_v19  ;;  %5926 = vmatprep.mubr.bf16.mxu1 %v6156_v2  ;;  %v3726_v19 = vld [vmem:[#allocation2 + $0x38] sm:$0xf]  ;;  %v3792_v14 = vrot.slane %v3790_v40, 5  ;;  %v3765_v56 = vor.u32 %v3764_v60, %v3761_v42  ;;  %v3782_v2 = vshll.u32 %v3721_v37, 16 }
 0x17a   : > { %5859 = vmatmul.mubr.bf16.gmra.mxu0 %v6154_v59  ;;  %5916 = vmatprep.subr.bf16.mxu1 %v6158_v34  ;;  %v3725_v59 = vld [vmem:[#allocation2 + $0x34] sm:$0x1]  ;;  %v3815_v52 = vshrl.u32 %v3726_v19, 16  ;;  %v3831_v36 = vrot.slane %v3829_v0, 4  ;;  %v3826_v48 = vrot.slane %v3824_v50, 5  ;;  %v6184_v12 = vld [vmem:[%s7618_s6 + $0x8] sm:$0xff]  }
 0x17b   : > { %5902 = vmatprep.mubr.bf16.mxu0 %v6155_v25  ;;  %v3719_v25 = vld [vmem:[#allocation2 + $0x1c] sm:$0x1]  ;;  %v3793_v58 = vor.u32 %v3792_v14, %v3789_v55  ;;  %v3810_v61 = vshll.u32 %v3725_v59, 16  ;;  %v3766_v44 = vrot.slane %v3765_v56, 4  ;;  %v6178_v40 = vld [vmem:[%s7618_s6 + $0x30] sm:$0xff]  }
 0x17c   : > { %v3768_v1 = vshll.u32 %v3719_v25, 16  ;;  %v5081_v37 = vld [vmem:[%s6391_s12 + $0x90] ss:$8 sps:$4 sm:$0xff]   ;;  %v5082_v60 = vld [vmem:[%s6391_s12 + $0x94] sm:$0x1] }
 0x17d   : > { %5917 = vmatpush3.bf16.msra.mxu1 %v6158_v34  ;;  %v3818_v34 = vshll.u32 %v3726_v19, 16  ;;  %v3812_v49 = vrot.slane %v3810_v61, 5  ;;  %v5073_v19 = vld [vmem:[%s6391_s12 + $0xd8] ss:$8 sps:$4 sm:$0xff]   ;;  %v4199_v55 = vunpack.c.l.bf16 %v5081_v37  ;;  %v4201_v14 = vunpack.c.h.bf16 %v5081_v37  ;;  %v5105_v25 = vld [vmem:[%s6391_s12 + $0x8] ss:$8 sps:$4 sm:$0xff]  }
 0x17e   : > { %5918 = vmatprep.subr.bf16.mxu1 %v6159_v33  ;;  %v3770_v17 = vrot.slane %v3768_v1, 5  ;;  %v4168_v59 = vunpack.c.h.bf16 %v5073_v19  ;;  %v5106_v47 = vld [vmem:[%s6391_s12 + $0xc] sm:$0x1]  ;;  %v5108_v56 = vld [vmem:[%s6391_s12 + $0x14] sm:$0x1]  ;;  %v4314_v0 = vunpack.c.l.bf16 %v5105_v25  ;;  %v4316_v61 = vunpack.c.h.bf16 %v5105_v25 }
 0x17f   : > { %v3813_v38 = vsel %vm7104_vm4, %v3808_v20, %v3812_v49  ;;  %v4235_v43 = vrot.slane %v4201_v14, 1  ;;  %v5075_v1 = vld [vmem:[%s6391_s12 + $0xe8] ss:$8 sps:$4 sm:$0xff]   ;;  %v6185_v49 = vld [vmem:[%s7618_s6] sm:$0xff]  }
 0x180   : > { %v5099_v50 = vld [vmem:[%s6391_s12 + $0x60] ss:$8 sps:$4 sm:$0xff]  }
 0x181   : > { %5919 = vmatpush3.bf16.msra.mxu1 %v6159_v33  ;;  %v3832_v33 = vshll.u32 %v3728_v23, 16  ;;  %v5097_v23 = vld [vmem:[%s6391_s12 + $0x50] ss:$8 sps:$4 sm:$0xff]  }
 0x182   : > { %5903 = vmatmul.mubr.bf16.vlgmr.msra.gmra.mxu0 %v6161_v26  ;;  %5920 = vmatprep.subr.bf16.mxu1 %v6163_v7  ;;  %v3780_v26 = vrot.slane %v3779_v41, 4  ;;  %v4167_v41 = vunpack.c.l.bf16 %v5073_v19 }
 0x183   : > { %5935 = vmatpush3.bf16.msra.mxu0 %v6160_v35  ;;  %5906 = vmatprep.mubr.bf16.mxu0 %v6162_v62  ;;  %v6175_v35 = vld [vmem:[%s7616_s4 + $0x208] sm:$0xff]   ;;  %v3784_v62 = vrot.slane %v3782_v2, 5  ;;  %v4232_v2 = vrot.slane %v4199_v55, 1 }
 0x184   : > { %5936 = vmatprep.subr.bf16.mxu0 %v6164_v5 }
 0x185   : > { %5921 = vmatpush3.bf16.msra.mxu1 %v6163_v7  ;;  %v3817_v7 = vrot.slane %v3815_v52, 4  ;;  %v3785_v21 = vsel %vm7104_vm4, %v3780_v26, %v3784_v62  ;;  %v4200_v52 = vunpack.c.l.bf16 %v5082_v60  ;;  %v5086_v62 = vld [vmem:[%s6391_s12 + $0xa4] sm:$0x1] }
 0x186   : > { %5922 = vmatprep.subr.bf16.mxu1 %v6165_v11 }
 0x187   : > { %5937 = vmatpush3.bf16.msra.mxu0 %v6164_v5  ;;  %v3820_v5 = vrot.slane %v3818_v34, 5 }
 0x188   : > { %5938 = vmatprep.subr.bf16.mxu0 %v6166_v9 }
 0x189   : > { %5923 = vmatpush3.bf16.msra.mxu1 %v6165_v11  ;;  %v3834_v11 = vrot.slane %v3832_v33, 5  ;;  %v4315_v33 = vunpack.c.l.bf16 %v5106_v47  ;;  %v5077_v47 = vld [vmem:[%s6391_s12 + $0xf8] ss:$8 sps:$4 sm:$0xff]  }
 0x18a   : > { %5907 = vmatmul.mubr.bf16.gmra.mxu0 %v6167_v63  ;;  %5924 = vmatprep.subr.bf16.mxu1 %v6168_v16  ;;  %v3821_v63 = vor.u32 %v3820_v5, %v3817_v7  ;;  %v4282_v7 = vunpack.c.h.bf16 %v5097_v23  ;;  %v4317_v5 = vunpack.c.l.bf16 %v5108_v56  ;;  %v5089_v56 = vld [vmem:[%s6391_s12 + $0xb0] ss:$8 sps:$4 sm:$0xff]  }
 0x18b   : > { %5939 = vmatpush3.bf16.msra.mxu0 %v6166_v9  ;;  %5950 = vmatprep.mubr.bf16.mxu0 %v5051_v32  ;;  %v3794_v9 = vrot.slane %v3793_v58, 4  ;;  %v3771_v32 = vsel %vm7104_vm4, %v3766_v44, %v3770_v17  ;;  %v3835_v28 = vor.u32 %v3834_v11, %v3831_v36  ;;  %v4281_v58 = vunpack.c.l.bf16 %v5097_v23  ;;  %v5085_v44 = vld [vmem:[%s6391_s12 + $0xa0] ss:$8 sps:$4 sm:$0xff]  }
 0x18c   : > { %5940 = vmatprep.subr.bf16.mxu0 %v6169_v45  ;;  %v3822_v15 = vrot.slane %v3821_v63, 4  ;;  %v4347_v20 = vrot.slane %v4315_v33, 1  ;;  %v5088_v63 = vld [vmem:[%s6391_s12 + $0xac] sm:$0x1] }
 0x18d   : > { %5925 = vmatpush3.bf16.msra.mxu1 %v6168_v16  ;;  %v3798_v16 = vrot.slane %v3796_v27, 5  ;;  %v3836_v13 = vrot.slane %v3835_v28, 4  ;;  %v4346_v27 = vrot.slane %v4314_v0, 1 }
 0x18e   : > { %v3827_v51 = vsel %vm7104_vm4, %v3822_v15, %v3826_v48  ;;  %5958 = vmatprep.subr.bf16.mxu1 %v6177_v3  ;;  %v4205_v15 = vunpack.c.h.bf16 %v5085_v44  ;;  %v4206_v48 = vunpack.c.l.bf16 %v5088_v63  ;;  %v5113_v63 = vld [vmem:[%s6391_s12 + $0x28] ss:$8 sps:$4 sm:$0xff]  }
 0x18f   : > { %5941 = vmatpush3.bf16.msra.mxu0 %v6169_v45  ;;  %v3729_v45 = vld [vmem:[#allocation2 + $0x44] sm:$0x1]  ;;  %v3799_v8 = vsel %vm7104_vm4, %v3794_v9, %v3798_v16  ;;  %v4349_v9 = vrot.slane %v4316_v61, 1  ;;  %v4348_v16 = vsel %vm4231_vm5, %v4346_v27, %v4347_v20  ;;  %v5101_v20 = vld [vmem:[%s6391_s12 + $0x70] ss:$8 sps:$4 sm:$0xff]  }
 0x190   : > { %5942 = vmatprep.subr.bf16.mxu0 %v6171_v10  ;;  %5927 = vmatmul.mubr.bf16.vlgmr.msra.gmra.mxu1 %v6170_v24  ;;  %v5053_v46 = vcombine.low %v3799_v8, %v3813_v38  ;;  %v3838_v4 = vshll.u32 %v3729_v45, 16  ;;  %v4169_v38 = vunpack.c.l.bf16 %v5075_v1  ;;  %v4203_v45 = vunpack.c.l.bf16 %v5085_v44 }
 0x191   : > { %5930 = vmatprep.mubr.bf16.mxu1 %v6172_v18  ;;  %5959 = vmatpush3.bf16.msra.mxu1 %v6177_v3  ;;  %v6180_v18 = vld [vmem:[%s7618_s6 + $0x20] sm:$0xff]   ;;  %v4241_v3 = vrot.slane %v4205_v15, 1  ;;  %v4286_v15 = vunpack.c.h.bf16 %v5101_v20 }
 0x192   : > { %v3840_v30 = vrot.slane %v3838_v4, 5  ;;  %5960 = vmatprep.subr.bf16.mxu1 %v6178_v40  ;;  %v4170_v4 = vunpack.c.h.bf16 %v5075_v1 }
 0x193   : > { %5943 = vmatpush3.bf16.msra.mxu0 %v6171_v10  ;;  %v5052_v10 = vcombine.low %v3771_v32, %v3785_v21  ;;  %v4350_v21 = vrot.slane %v4317_v5, 1  ;;  %v4204_v32 = vunpack.c.l.bf16 %v5086_v62  ;;  %v4207_v5 = vunpack.c.l.bf16 %v5089_v56 }
 0x194   : > { %5944 = vmatprep.subr.bf16.mxu0 %v6173_v54  ;;  %v3841_v24 = vsel %vm7104_vm4, %v3836_v13, %v3840_v30  ;;  %v4238_v13 = vrot.slane %v4203_v45, 1  ;;  %v5109_v30 = vld [vmem:[%s6391_s12 + $0x18] ss:$8 sps:$4 sm:$0xff]  }
 0x195   : > { %5961 = vmatpush3.bf16.msra.mxu1 %v6178_v40  ;;  %v4283_v40 = vunpack.c.l.bf16 %v5099_v50  ;;  %v4320_v23 = vunpack.c.h.bf16 %v5109_v30 }
 0x196   : > { %5962 = vmatprep.subr.bf16.mxu1 %v6179_v22 }
 0x197   : > { %5945 = vmatpush3.bf16.msra.mxu0 %v6173_v54  ;;  %v5054_v54 = vcombine.low %v3827_v51, %v3841_v24  ;;  %v4239_v51 = vrot.slane %v4204_v32, 1  ;;  %v4355_v33 = vrot.slane %v4320_v23, 1 }
 0x198   : > { %5946 = vmatprep.subr.bf16.mxu0 %v6175_v35  ;;  %5931 = vmatmul.mubr.bf16.gmra.mxu1 %v6174_v57  ;;  %v4233_v57 = vrot.slane %v4200_v52, 1 }
 0x199   : > { %5963 = vmatpush3.bf16.msra.mxu1 %v6179_v22  ;;  %v5110_v22 = vld [vmem:[%s6391_s12 + $0x1c] sm:$0x1] }
 0x19a   : > { %5964 = vmatprep.subr.bf16.mxu1 %v6180_v18  ;;  %v4234_v36 = vsel %vm4231_vm5, %v4232_v2, %v4233_v57  ;;  %v4319_v14 = vunpack.c.l.bf16 %v5110_v22  ;;  %v5090_v2 = vld [vmem:[%s6391_s12 + $0xb4] sm:$0x1]  ;;  %v5092_v57 = vld [vmem:[%s6391_s12 + $0xbc] sm:$0x1]  ;;  %v5093_v22 = vld [vmem:[%s6391_s12 + $0xc0] ss:$8 sps:$4 sm:$0xff]  }
 0x19b   : > { %5947 = vmatpush3.bf16.msra.mxu0 %v6175_v35  ;;  %v5084_v35 = vld [vmem:[%s6391_s12 + $0x9c] sm:$0x1]  ;;  %v4264_v29 = vadd.f32 %v4234_v36, %v4167_v41  ;;  %v4208_v27 = vunpack.c.l.bf16 %v5090_v2  ;;  %v5103_v2 = vld [vmem:[%s6391_s12 + $0x80] ss:$8 sps:$4 sm:$0xff]  }
 0x19c   : > { %5948 = vmatprep.subr.bf16.mxu0 %v6176_v39  ;;  %v4202_v34 = vunpack.c.l.bf16 %v5084_v35  ;;  %v4318_v35 = vunpack.c.l.bf16 %v5109_v30  ;;  %v4353_v0 = vrot.slane %v4319_v14, 1  ;;  %v4322_v30 = vunpack.c.l.bf16 %v5113_v63  ;;  %v5096_v14 = vld [vmem:[%s6391_s12 + $0xcc] sm:$0x1] }
 0x19d   : > { %5965 = vmatpush3.bf16.msra.mxu1 %v6180_v18  ;;  %v4240_v18 = vsel %vm4231_vm5, %v4238_v13, %v4239_v51 }
 0x19e   : > { %5966 = vmatprep.subr.bf16.mxu1 %v6182_v6  ;;  %v4266_v60 = vadd.f32 %v4240_v18, %v4169_v38 }
 0x19f   : > { %5949 = vmatpush3.bf16.msra.mxu0 %v6176_v39  ;;  %v4236_v39 = vrot.slane %v4202_v34, 1 }
 0x1a0   : > { %5982 = vmatprep.subr.bf16.mxu0 %v6181_v31  ;;  %v4291_v34 = vadd.f32 %v4283_v40, %v4266_v60  ;;  %v4324_v40 = vunpack.c.h.bf16 %v5113_v63 }
 0x1a1   : > { %5967 = vmatpush3.bf16.msra.mxu1 %v6182_v6  ;;  %v4237_v11 = vsel %vm4231_vm5, %v4235_v43, %v4236_v39  ;;  %v4284_v6 = vunpack.c.h.bf16 %v5099_v50  ;;  %v4352_v43 = vrot.slane %v4318_v35, 1 }
 0x1a2   : > { %5951 = vmatmul.mubr.bf16.vlgmr.msra.gmra.mxu0 %v5052_v10  ;;  %5968 = vmatprep.subr.bf16.mxu1 %v6183_v53  ;;  %v4265_v17 = vadd.f32 %v4237_v11, %v4168_v59  ;;  %v4289_v10 = vadd.f32 %v4281_v58, %v4264_v29  ;;  %v4209_v11 = vunpack.c.h.bf16 %v5089_v56  ;;  %v4172_v29 = vunpack.c.h.bf16 %v5077_v47 }
 0x1a3   : > { %5954 = vmatprep.mubr.bf16.mxu0 %v5053_v46  ;;  %5983 = vmatpush3.bf16.msra.mxu0 %v6181_v31  ;;  %v4351_v46 = vsel %vm4231_vm5, %v4349_v9, %v4350_v21  ;;  %v4242_v31 = vrot.slane %v4206_v48, 1  ;;  %v4354_v1 = vsel %vm4231_vm5, %v4352_v43, %v4353_v0  ;;  %v4210_v9 = vunpack.c.l.bf16 %v5092_v57  ;;  %v5117_v43 = vld [vmem:[%s6391_s12 + $0x38] ss:$8 sps:$4 sm:$0xff]  }
 0x1a4   : > { %v4290_v8 = vadd.f32 %v4282_v7, %v4265_v17  ;;  %v4378_v24 = vadd.f32 %v4348_v16, %v4289_v10  ;;  %v4171_v7 = vunpack.c.l.bf16 %v5077_v47  ;;  %v4380_v36 = vadd.f32 %v4354_v1, %v4291_v34  ;;  %v5114_v16 = vld [vmem:[%s6391_s12 + $0x2c] sm:$0x1]  ;;  %v5118_v1 = vld [vmem:[%s6391_s12 + $0x3c] sm:$0x1] }
 0x1a5   : > { %5969 = vmatpush3.bf16.msra.mxu1 %v6183_v53  ;;  %v5112_v53 = vld [vmem:[%s6391_s12 + $0x24] sm:$0x1]  ;;  %v4243_v55 = vsel %vm4231_vm5, %v4241_v3, %v4242_v31  ;;  %v4244_v17 = vrot.slane %v4207_v5, 1  ;;  %v4245_v21 = vrot.slane %v4208_v27, 1  ;;  %v4247_v32 = vrot.slane %v4209_v11, 1 }
 0x1a6   : > { %5970 = vmatprep.subr.bf16.mxu1 %v6184_v12  ;;  %v4386_v19 = vmul.f32 0.25, %v4378_v24  ;;  %v4267_v52 = vadd.f32 %v4243_v55, %v4170_v4  ;;  %v4321_v25 = vunpack.c.l.bf16 %v5112_v53  ;;  %v4388_v45 = vmul.f32 0.25, %v4380_v36  ;;  %v5116_v4 = vld [vmem:[%s6391_s12 + $0x34] sm:$0x1]  ;;  %v5079_v55 = vld [vmem:[%s6391_s12 + $0x108] ss:$8 sps:$4 sm:$0xff]  }
 0x1a7   : > { %v4248_v50 = vrot.slane %v4210_v9, 1  ;;  %v4285_v10 = vunpack.c.l.bf16 %v5101_v20  ;;  %v4323_v24 = vunpack.c.l.bf16 %v5114_v16  ;;  %v4358_v53 = vrot.slane %v4322_v30, 1 }
 0x1a8   : > { %v4292_v58 = vadd.f32 %v4284_v6, %v4267_v52  ;;  %v4356_v61 = vrot.slane %v4321_v25, 1  ;;  %v4325_v6 = vunpack.c.l.bf16 %v5116_v4  ;;  %v4361_v35 = vrot.slane %v4324_v40, 1 }
 0x1a9   : > { %5971 = vmatpush3.bf16.msra.mxu1 %v6184_v12  ;;  %v4249_v13 = vsel %vm4231_vm5, %v4247_v32, %v4248_v50  ;;  %v4211_v34 = vunpack.c.l.bf16 %v5093_v22  ;;  %v4213_v56 = vunpack.c.h.bf16 %v5093_v22  ;;  %v4173_v57 = vunpack.c.l.bf16 %v5079_v55 }
 0x1aa   : > { %5955 = vmatmul.mubr.bf16.gmra.mxu0 %v5054_v54  ;;  %5972 = vmatprep.subr.bf16.mxu1 %v6185_v49  ;;  %v4379_v54 = vadd.f32 %v4351_v46, %v4290_v8  ;;  %v4357_v62 = vsel %vm4231_vm5, %v4355_v33, %v4356_v61  ;;  %v4246_v46 = vsel %vm4231_vm5, %v4244_v17, %v4245_v21  ;;  %v4362_v52 = vrot.slane %v4325_v6, 1 }
 0x1ab   : > { %v4268_v51 = vadd.f32 %v4246_v46, %v4171_v7  ;;  %v4269_v3 = vadd.f32 %v4249_v13, %v4172_v29  ;;  %v4250_v61 = vrot.slane %v4211_v34, 1  ;;  %v4174_v27 = vunpack.c.h.bf16 %v5079_v55 }
 0x1ac   : > { %v4387_v37 = vmul.f32 0.25, %v4379_v54  ;;  %v4363_v33 = vsel %vm4231_vm5, %v4361_v35, %v4362_v52  ;;  %v4253_v9 = vrot.slane %v4213_v56, 1  ;;  %v4287_v29 = vunpack.c.l.bf16 %v5103_v2 }
 0x1ad   : > { %5973 = vmatpush3.bf16.msra.mxu1 %v6185_v49  ;;  %v4381_v49 = vadd.f32 %v4357_v62, %v4292_v58  ;;  %v4293_v31 = vadd.f32 %v4285_v10, %v4268_v51  ;;  %v4294_v60 = vadd.f32 %v4286_v15, %v4269_v3  ;;  %v4214_v58 = vunpack.c.l.bf16 %v5096_v14  ;;  %v5120_v62 = vld [vmem:[%s6391_s12 + $0x44] sm:$0x1] }
 0x1ae   : > { %v5208_v59 = vpack.c.bf16 %v4387_v37, %v4386_v19  ;;  %v4359_v19 = vrot.slane %v4323_v24, 1  ;;  %v5094_v37 = vld [vmem:[%s6391_s12 + $0xc4] sm:$0x1]  ;;  %v4326_v17 = vunpack.c.l.bf16 %v5117_v43  ;;  %v4288_v16 = vunpack.c.h.bf16 %v5103_v2 }
 0x1af   : > { %v4389_v8 = vmul.f32 0.25, %v4381_v49  ;;  %v4212_v47 = vunpack.c.l.bf16 %v5094_v37  ;;  %v4383_v7 = vadd.f32 %v4363_v33, %v4294_v60  ;;  %v4254_v49 = vrot.slane %v4214_v58, 1 }
 0x1b0   : > { %5984 = vmatprep.mubr.msk.bf16.mxu0 %vm437_vm1, %v5208_v59  ;;  %v4360_v59 = vsel %vm4231_vm5, %v4358_v53, %v4359_v19  ;;  %v4328_v10 = vunpack.c.h.bf16 %v5117_v43  ;;  %v4364_v4 = vrot.slane %v4326_v17, 1 }
 0x1b1   : > { %v5209_v54 = vpack.c.bf16 %v4389_v8, %v4388_v45  ;;  %v4382_v25 = vadd.f32 %v4360_v59, %v4293_v31  ;;  %v4251_v20 = vrot.slane %v4212_v47, 1  ;;  %v4391_v21 = vmul.f32 0.25, %v4383_v7 }
 0x1b2   : > { %v4327_v45 = vunpack.c.l.bf16 %v5118_v1  ;;  %v4255_v32 = vsel %vm4231_vm5, %v4253_v9, %v4254_v49  ;;  %v4329_v8 = vunpack.c.l.bf16 %v5120_v62 }
 0x1b3   : > { %5985 = vmatmul.mubr.msk.bf16.vlgmr.msra.gmra.mxu0 %vm437_vm1, %v5209_v54  ;;  %v4390_v5 = vmul.f32 0.25, %v4382_v25  ;;  %v4252_v63 = vsel %vm4231_vm5, %v4250_v61, %v4251_v20  ;;  %v4271_v15 = vadd.f32 %v4255_v32, %v4174_v27  ;;  %v4367_v54 = vrot.slane %v4328_v10, 1 }
 0x1b4   : > { %v4270_v50 = vadd.f32 %v4252_v63, %v4173_v57  ;;  %v4365_v24 = vrot.slane %v4327_v45, 1  ;;  %v4368_v3 = vrot.slane %v4329_v8, 1 }
 0x1b5   : > { %v5210_v46 = vpack.c.bf16 %v4391_v21, %v4390_v5  ;;  %v4296_v40 = vadd.f32 %v4288_v16, %v4271_v15 }
 0x1b6   : > { %v4295_v30 = vadd.f32 %v4287_v29, %v4270_v50  ;;  %v4366_v22 = vsel %vm4231_vm5, %v4364_v4, %v4365_v24  ;;  %v4369_v31 = vsel %vm4231_vm5, %v4367_v54, %v4368_v3 }
 0x1b7   : > { %5988 = vmatprep.mubr.msk.bf16.mxu0 %vm437_vm1, %v5210_v46  ;;  %v4385_v53 = vadd.f32 %v4369_v31, %v4296_v40 }
 0x1b8   : > { %v4384_v6 = vadd.f32 %v4366_v22, %v4295_v30 }
 0x1b9   : > { %v4393_v35 = vmul.f32 0.25, %v4385_v53 }
 0x1ba   : > { %v4392_v60 = vmul.f32 0.25, %v4384_v6 }
 0x1bc   : > { %v5211_v55 = vpack.c.bf16 %v4393_v35, %v4392_v60 }
 0x1be   : > { %5989 = vmatmul.mubr.msk.bf16.gmra.mxu0 %vm437_vm1, %v5211_v55 }
 0x1c8   : > { %v7449_v39 = vpop.f32.mrf.mxu1 }
 0x1ca   : > { %v7459_v38 = vpop.f32.mrf.mxu1 }
 0x1cc   : > { %v7467_v18 = vpop.f32.mrf.mxu1 }
 0x1ce   : > { %v7478_v0 = vpop.f32.mrf.mxu1 }
 0x1d2   : > { %v7412_v42 = vpop.f32.mrf.mxu0 }
 0x1d3   : > { %v2443_v40 = vadd.f32 %v7449_v39, %v7412_v42 }
 0x1d4   : > { %v7421_v26 = vpop.f32.mrf.mxu0 }
 0x1d5   : > { %v2435_v3 = vadd.f32 %v7459_v38, %v7421_v26 }
 0x1d6   : > { %v7433_v28 = vpop.f32.mrf.mxu0 }
 0x1d7   : > { %v2446_v6 = vadd.f32 %v7467_v18, %v7433_v28 }
 0x1d8   : > { %v7440_v12 = vpop.f32.mrf.mxu0 }
 0x1d9   : > { %v2438_v35 = vadd.f32 %v7478_v0, %v7440_v12 }
 0x1e8   : > { %v7483_v36 = vpop.f32.mrf.mxu1 }
 0x1ea   : > { %v7489_v13 = vpop.f32.mrf.mxu1 }
 0x1ec   : > { %v5789_v19 = vpop.f32.mrf.mxu1 }
 0x1ee   : > { %v2453_v14 = vpop.f32.mrf.mxu1 }
 0x1f2   : > { %v7443_v41 = vpop.f32.mrf.mxu0 }
 0x1f3   : > { %v2459_v28 = vadd.f32 %v7483_v36, %v7443_v41 }
 0x1f4   : > { %v7454_v44 = vpop.f32.mrf.mxu0 }
 0x1f5   : > { %v2451_v26 = vadd.f32 %v7489_v13, %v7454_v44 }
 0x1f6   : > { %v7463_v48 = vpop.f32.mrf.mxu0 }
 0x1f7   : > { %v2462_v18 = vadd.f32 %v5789_v19, %v7463_v48 }
 0x1f8   : > { %v7473_v23 = vpop.f32.mrf.mxu0 }
 0x1fa   : > { %v7485_v11 = vpop.f32.mrf.mxu0 }
 0x1fb   : > { %v2744_v60 = vadd.f32 %v7485_v11, %v2443_v40 }
 0x1fc   : > { %v2711_v51 = vpop.f32.mrf.mxu0 }
 0x1fd   : > { %v2742_v53 = vadd.f32 %v2711_v51, %v2435_v3 }
 0x1fe   : > { %v5809_v37 = vpop.f32.mrf.mxu0 }
 0x1ff   : > { %v2745_v55 = vadd.f32 %v5809_v37, %v2446_v6  ;;  %v2454_v37 = vadd.f32 %v2453_v14, %v7473_v23 }
 0x200   : > { %v2714_v59 = vpop.f32.mrf.mxu0 }
 0x201   : > { %v2743_v42 = vadd.f32 %v2714_v59, %v2438_v35 }
 0x202   : > { %v5812_v34 = vpop.f32.mrf.mxu0 }
 0x204   : > { %v2727_v47 = vpop.f32.mrf.mxu0 }
 0x205   : > { %v2746_v51 = vadd.f32 %v2727_v47, %v2451_v26 }
 0x206   : > { %v5813_v2 = vpop.f32.mrf.mxu0 }
 0x208   : > { %v5832_v52 = vpop.f32.mrf.mxu1  ;;  %v2730_v33 = vpop.f32.mrf.mxu0 }
 0x20a   : > { %v2881_v25 = vpop.f32.mrf.mxu1 }
 0x20c   : > { %v5833_v56 = vpop.f32.mrf.mxu1 }
 0x20d   : > { %v2915_v39 = vadd.f32 %v5833_v56, %v2745_v55 }
 0x20e   : > { %v2884_v43 = vpop.f32.mrf.mxu1 }
 0x20f   : > { %v2913_v3 = vadd.f32 %v2884_v43, %v2743_v42 }
 0x21a   : > { %v5856_v58 = vpop.f32.mrf.mxu0 }
 0x21c   : > { %v3051_v7 = vpop.f32.mrf.mxu0 }
 0x21e   : > { %v5857_v27 = vpop.f32.mrf.mxu0 }
 0x21f   : > { %v3085_v12 = vadd.f32 %v5857_v27, %v2915_v39 }
 0x220   : > { %v3054_v62 = vpop.f32.mrf.mxu0 }
 0x221   : > { %v3083_v13 = vadd.f32 %v3054_v62, %v2913_v3 }
 0x228   : > { %v5836_v57 = vpop.f32.mrf.mxu1 }
 0x22a   : > { %v2897_v61 = vpop.f32.mrf.mxu1 }
 0x22b   : > { %v2916_v59 = vadd.f32 %v2897_v61, %v2746_v51 }
 0x22c   : > { %v5837_v1 = vpop.f32.mrf.mxu1 }
 0x22e   : > { %v7495_v5 = vpop.f32.mrf.mxu1 }
 0x230   : > { %v5880_v20 = vpop.f32.mrf.mxu1 }
 0x232   : > { %v3333_v9 = vpop.f32.mrf.mxu1 }
 0x234   : > { %v5881_v29 = vpop.f32.mrf.mxu1 }
 0x235   : > { %v3367_v56 = vadd.f32 %v5881_v29, %v3085_v12 }
 0x236   : > { %v3336_v63 = vpop.f32.mrf.mxu1 }
 0x237   : > { %v3365_v47 = vadd.f32 %v3336_v63, %v3083_v13 }
 0x238   : > { %v7499_v45 = vpop.f32.mrf.mxu1 }
 0x239   : > { %7647 = vst [vmem:[#allocation6_spill] sm:$0xff] %v7499_v45 }
 0x23a   : > { %v5860_v49 = vpop.f32.mrf.mxu0  ;;  %v7501_v50 = vpop.f32.mrf.mxu1 }
 0x23c   : > { %v3067_v17 = vpop.f32.mrf.mxu0  ;;  %v7503_v8 = vpop.f32.mrf.mxu1 }
 0x23d   : > { %7648 = vst [vmem:[#allocation8_spill] sm:$0xff] %v7503_v8  ;;  %v3086_v43 = vadd.f32 %v3067_v17, %v2916_v59  ;;  %v5063_v17 = vld [vmem:[%s7617_s5] ss:$0 sm:$0xff] }
 0x23e   : > { %v5861_v21 = vpop.f32.mrf.mxu0  ;;  %v7505_v15 = vpop.f32.mrf.mxu1 }
 0x23f   : > { %7649 = vst [vmem:[#allocation7_spill] sm:$0xff] %v7505_v15  ;;  %v2914_v15 = vadd.f32 %v5832_v52, %v2744_v60  ;;  %v2748_v52 = vadd.f32 %v5812_v34, %v2459_v28 }
 0x240   : > { %v7497_v16 = vpop.f32.mrf.mxu0 }
 0x241   : > { %v3084_v11 = vadd.f32 %v5856_v58, %v2914_v15  ;;  %v2918_v41 = vadd.f32 %v5836_v57, %v2748_v52 }
 0x242   : > { %v5904_v32 = vpop.f32.mrf.mxu0 }
 0x243   : > { %v3366_v40 = vadd.f32 %v5880_v20, %v3084_v11  ;;  %v3088_v14 = vadd.f32 %v5860_v49, %v2918_v41  ;;  %v7651_v49 = vld [vmem:[#allocation6_spill] sm:$0xff] }
 0x244   : > { %v3504_v10 = vpop.f32.mrf.mxu0 }
 0x245   : > { %v3537_v48 = vadd.f32 %v5904_v32, %v3366_v40  ;;  %v3368_v32 = vadd.f32 %v7501_v50, %v3086_v43 }
 0x246   : > { %v5905_v46 = vpop.f32.mrf.mxu0 }
 0x247   : > { %v3538_v58 = vadd.f32 %v5905_v46, %v3367_v56 }
 0x248   : > { %v3507_v4 = vpop.f32.mrf.mxu0 }
 0x249   : > { %v3536_v62 = vadd.f32 %v3507_v4, %v3365_v47 }
 0x24a   : > { %v7507_v24 = vpop.f32.mrf.mxu0 }
 0x24b   : > { %7650 = vst [vmem:[#allocation10_spill] sm:$0xff] %v7507_v24  ;;  %v2912_v24 = vadd.f32 %v2881_v25, %v2742_v53  ;;  %v2749_v25 = vadd.f32 %v5813_v2, %v2462_v18  ;;  %v7653_v53 = vld [vmem:[#allocation7_spill] sm:$0xff] }
 0x24c   : > { %v3520_v22 = vpop.f32.mrf.mxu0 }
 0x24d   : > { %v3082_v38 = vadd.f32 %v3051_v7, %v2912_v24  ;;  %v2747_v24 = vadd.f32 %v2730_v33, %v2454_v37  ;;  %v2919_v36 = vadd.f32 %v5837_v1, %v2749_v25 }
 0x24e   : > { %v5909_v8 = vpop.f32.mrf.mxu0 }
 0x24f   : > { %v3364_v0 = vadd.f32 %v3333_v9, %v3082_v38  ;;  %v2917_v23 = vadd.f32 %v7495_v5, %v2747_v24  ;;  %v3089_v34 = vadd.f32 %v5861_v21, %v2919_v36  ;;  %v3370_v21 = vadd.f32 %v7651_v49, %v3088_v14 }
 0x250   : > { %v5928_v30 = vpop.f32.mrf.mxu1  ;;  %v3523_v6 = vpop.f32.mrf.mxu0 }
 0x251   : > { %v3535_v7 = vadd.f32 %v3504_v10, %v3364_v0  ;;  %v3708_v2 = vadd.f32 %v5928_v30, %v3537_v48  ;;  %v3087_v33 = vadd.f32 %v7497_v16, %v2917_v23  ;;  %v7652_v10 = vld [vmem:[#allocation8_spill] sm:$0xff]  ;;  %v3539_v30 = vadd.f32 %v3520_v22, %v3368_v32 }
 0x252   : > { %v3675_v54 = vpop.f32.mrf.mxu1  ;;  %v3371_v46 = vadd.f32 %v7652_v10, %v3089_v34  ;;  %v7654_v35 = vld [vmem:[#allocation10_spill] sm:$0xff] }
 0x253   : > { %v3706_v27 = vadd.f32 %v3675_v54, %v3535_v7  ;;  %v3369_v60 = vadd.f32 %v7653_v53, %v3087_v33  ;;  %v3541_v50 = vadd.f32 %v7654_v35, %v3370_v21  ;;  %v5121_v34 = vld [vmem:[%s7621_s9] ss:$0 sm:$0xff] }
 0x254   : > { %v5929_v31 = vpop.f32.mrf.mxu1  ;;  %v3542_v26 = vadd.f32 %v5909_v8, %v3371_v46 }
 0x255   : > { %v3709_v61 = vadd.f32 %v5929_v31, %v3538_v58  ;;  %v3540_v38 = vadd.f32 %v3523_v6, %v3369_v60 }
 0x256   : > { %v3678_v45 = vpop.f32.mrf.mxu1 }
 0x257   : > { %v3707_v63 = vadd.f32 %v3678_v45, %v3536_v62 }
 0x258   : > { %v5932_v44 = vpop.f32.mrf.mxu1 }
 0x259   : > { %v3712_v28 = vadd.f32 %v5932_v44, %v3541_v50 }
 0x25a   : > { %v3691_v20 = vpop.f32.mrf.mxu1 }
 0x25b   : > { %v3710_v42 = vadd.f32 %v3691_v20, %v3539_v30  ;;  %v5064_v20 = vld [vmem:[%s7619_s7] ss:$0 sm:$0xff] }
 0x25c   : > { %v5933_v15 = vpop.f32.mrf.mxu1 }
 0x25d   : > { %v3713_v3 = vadd.f32 %v5933_v15, %v3542_v26 }
 0x25e   : > { %v3694_v18 = vpop.f32.mrf.mxu1 }
 0x25f   : > { %v3711_v40 = vadd.f32 %v3694_v18, %v3540_v38 }
 0x262   : > { %v5952_v19 = vpop.f32.mrf.mxu0 }
 0x263   : > { %v3990_v57 = vadd.f32 %v5952_v19, %v3708_v2 }
 0x264   : > { %v3957_v9 = vpop.f32.mrf.mxu0 }
 0x265   : > { %v3988_v29 = vadd.f32 %v3957_v9, %v3706_v27  ;;  %v4005_v45 = vadd.f32 %v5063_v17, %v3990_v57 }
 0x266   : > { %v5953_v1 = vpop.f32.mrf.mxu0 }
 0x267   : > { %v3991_v5 = vadd.f32 %v5953_v1, %v3709_v61  ;;  %v4003_v54 = vadd.f32 %v5063_v17, %v3988_v29  ;;  %v4013_v37 = vmax.f32 %v4005_v45, 0.0 }
 0x268   : > { %v3960_v4 = vpop.f32.mrf.mxu0 }
 0x269   : > { %v4006_v31 = vadd.f32 %v5063_v17, %v3991_v5  ;;  %v3989_v16 = vadd.f32 %v3960_v4, %v3707_v63  ;;  %v4011_v12 = vmax.f32 %v4003_v54, 0.0 }
 0x26a   : > { %v5956_v55 = vpop.f32.mrf.mxu0 }
 0x26b   : > { %v4004_v39 = vadd.f32 %v5063_v17, %v3989_v16  ;;  %v4014_v11 = vmax.f32 %v4006_v31, 0.0  ;;  %v3994_v52 = vadd.f32 %v5956_v55, %v3712_v28 }
 0x26c   : > { %v3973_v51 = vpop.f32.mrf.mxu0 }
 0x26d   : > { %v4012_v22 = vmax.f32 %v4004_v39, 0.0  ;;  %v3992_v0 = vadd.f32 %v3973_v51, %v3710_v42  ;;  %v4020_v56 = vpack.c.bf16 %v4014_v11, %v4013_v37  ;;  %v4009_v6 = vadd.f32 %v5063_v17, %v3994_v52 }
 0x26e   : > { %v5957_v25 = vpop.f32.mrf.mxu0 }
 0x26f   : > { %v3995_v13 = vadd.f32 %v5957_v25, %v3713_v3  ;;  %v4019_v59 = vpack.c.bf16 %v4012_v22, %v4011_v12  ;;  %v4007_v8 = vadd.f32 %v5063_v17, %v3992_v0  ;;  %v4017_v47 = vmax.f32 %v4009_v6, 0.0 }
 0x270   : > { %v3976_v7 = vpop.f32.mrf.mxu0 }
 0x271   : > { %v4010_v24 = vadd.f32 %v5063_v17, %v3995_v13  ;;  %v3993_v41 = vadd.f32 %v3976_v7, %v3711_v40  ;;  %5974 = vmatprep.mubr.bf16.mxu1 %v4019_v59  ;;  %v4015_v48 = vmax.f32 %v4007_v8, 0.0 }
 0x272   : > { %5975 = vmatmul.mubr.bf16.vlgmr.msra.gmra.mxu1 %v4020_v56 }
 0x273   : > { %v4008_v44 = vadd.f32 %v5063_v17, %v3993_v41  ;;  %v4018_v36 = vmax.f32 %v4010_v24, 0.0  ;;  %v5986_v27 = vpop.f32.mrf.mxu0 }
 0x274   : > { %v4492_v9 = vadd.f32 %v5986_v27, %v5121_v34 }
 0x275   : > { %v4016_v19 = vmax.f32 %v4008_v44, 0.0  ;;  %v4022_v58 = vpack.c.bf16 %v4018_v36, %v4017_v47  ;;  %v4483_v23 = vpop.f32.mrf.mxu0 }
 0x276   : > { %v4484_v57 = vadd.f32 %v5121_v34, %v4483_v23 }
 0x277   : > { %v4021_v43 = vpack.c.bf16 %v4016_v19, %v4015_v48  ;;  %v5987_v14 = vpop.f32.mrf.mxu0 }
 0x278   : > { %v4495_v5 = vadd.f32 %v5987_v14, %v5121_v34 }
 0x279   : > { %5978 = vmatprep.mubr.bf16.mxu1 %v4021_v43  ;;  %v4486_v2 = vpop.f32.mrf.mxu0 }
 0x27a   : > { %5979 = vmatmul.mubr.bf16.gmra.mxu1 %v4022_v58  ;;  %v4487_v46 = vadd.f32 %v5121_v34, %v4486_v2 }
 0x27e   : > { %v5990_v61 = vpop.f32.mrf.mxu0 }
 0x27f   : > { %v4508_v30 = vadd.f32 %v5990_v61, %v5121_v34 }
 0x280   : > { %v4499_v17 = vpop.f32.mrf.mxu0 }
 0x281   : > { %v4500_v55 = vadd.f32 %v5121_v34, %v4499_v17 }
 0x282   : > { %v5991_v16 = vpop.f32.mrf.mxu0 }
 0x283   : > { %v4511_v18 = vadd.f32 %v5991_v16, %v5121_v34 }
 0x284   : > { %v4502_v38 = vpop.f32.mrf.mxu0 }
 0x285   : > { %v4503_v22 = vadd.f32 %v5121_v34, %v4502_v38 }
 0x332   : > { %v5976_v62 = vpop.f32.mrf.mxu1 }
 0x333   : > { %v4137_v29 = vadd.f32 %v5976_v62, %v5064_v20 }
 0x334   : > { %v4128_v33 = vpop.f32.mrf.mxu1 }
 0x335   : > { %v4516_v1 = vadd.f32 %v4492_v9, %v4137_v29  ;;  %v4129_v32 = vadd.f32 %v5064_v20, %v4128_v33 }
 0x336   : > { %v5977_v63 = vpop.f32.mrf.mxu1 }
 0x337   : > { %v4524_v49 = vmax.f32 %v4516_v1, 0.0  ;;  %v4514_v21 = vadd.f32 %v4484_v57, %v4129_v32  ;;  %v4140_v10 = vadd.f32 %v5977_v63, %v5064_v20 }
 0x338   : > { %v4131_v15 = vpop.f32.mrf.mxu1 }
 0x339   : > { %4533 = vst.msk [vmem:[%s7543_s20 + $0x10] sm:$0xff] %vm4530_vm6, %v4524_v49  ;;  %v4522_v4 = vmax.f32 %v4514_v21, 0.0  ;;  %v4517_v54 = vadd.f32 %v4495_v5, %v4140_v10  ;;  %v4132_v31 = vadd.f32 %v5064_v20, %v4131_v15 }
 0x33a   : > { %v5980_v53 = vpop.f32.mrf.mxu1 }
 0x33b   : > { %4531 = vst.msk [vmem:[%s7543_s20] sm:$0xff] %vm4530_vm6, %v4522_v4  ;;  %v4525_v60 = vmax.f32 %v4517_v54, 0.0  ;;  %v4515_v35 = vadd.f32 %v4487_v46, %v4132_v31  ;;  %v4153_v50 = vadd.f32 %v5980_v53, %v5064_v20 }
 0x33c   : > { %v4144_v45 = vpop.f32.mrf.mxu1 }
 0x33d   : > { %4534 = vst.msk [vmem:[%s7543_s20 + $0x18] sm:$0xff] %vm4530_vm6, %v4525_v60  ;;  %v4523_v26 = vmax.f32 %v4515_v35, 0.0  ;;  %v4520_v42 = vadd.f32 %v4508_v30, %v4153_v50  ;;  %v4145_v39 = vadd.f32 %v5064_v20, %v4144_v45 }
 0x33e   : > { %v5981_v28 = vpop.f32.mrf.mxu1 }
 0x33f   : > { %4532 = vst.msk [vmem:[%s7543_s20 + $0x8] sm:$0xff] %vm4530_vm6, %v4523_v26  ;;  %v4528_v11 = vmax.f32 %v4520_v42, 0.0  ;;  %v4518_v51 = vadd.f32 %v4500_v55, %v4145_v39  ;;  %v4156_v3 = vadd.f32 %v5981_v28, %v5064_v20 }
 0x340   : > { %v4147_v12 = vpop.f32.mrf.mxu1 }
 0x341   : > { %4537 = vst.msk [vmem:[%s7543_s20 + $0x30] sm:$0xff] %vm4530_vm6, %v4528_v11  ;;  %v4526_v0 = vmax.f32 %v4518_v51, 0.0  ;;  %v4521_v37 = vadd.f32 %v4511_v18, %v4156_v3  ;;  %v4148_v52 = vadd.f32 %v5064_v20, %v4147_v12 }
 0x343   : > { %4535 = vst.msk [vmem:[%s7543_s20 + $0x20] sm:$0xff] %vm4530_vm6, %v4526_v0  ;;  %v4529_v25 = vmax.f32 %v4521_v37, 0.0  ;;  %v4519_v40 = vadd.f32 %v4503_v22, %v4148_v52 }
 0x345   : > { %4538 = vst.msk [vmem:[%s7543_s20 + $0x38] sm:$0xff] %vm4530_vm6, %v4529_v25  ;;  %v4527_v13 = vmax.f32 %v4519_v40, 0.0 }
 0x347   : > { %4536 = vst.msk [vmem:[%s7543_s20 + $0x28] sm:$0xff] %vm4530_vm6, %v4527_v13 }
 0x348   : > { %6200 = shalt.err (!%p6197_p3)
}
 0x349   : > { %s6201_s29 = scalar_lea.hbm %s7562_s27, 1024  ;;  %s6205_s12 = scalar_lea.hbm %s7622_s10, 2048 }
 0x34a   : > { %p6202_p4 = scmp.ne.s32.totalorder %s7562_s27, %s6201_s29  ;;  %p6206_p9 = scmp.lt.s32.totalorder %s7562_s27, %s7622_s10 }
 0x34b   : > { %p6207_p10 = scmp.lt.s32.totalorder %s6205_s12, %s6201_s29 }
 0x34c   : > { %p6203_p7 = pnand %p6202_p4, %p6348_p5 }
 0x34d   : > { %p6208_p11 = por %p6207_p10, %p6206_p9 }
 0x34e   : > { %p6204_p8 = pneg %p6203_p7 }
 0x350   : > { %p6209_p12 = pnand %p6208_p11, %p6204_p8 }
 0x352   : > { %6212 = shalt.err (!%p6209_p12)
}
 0x353   : > { %s6253_s28 = smov 128   ;;  %s6254_s11 = smov 8  }
 0x354   : > { %5995 = dma.vmem_to_hbm [thread:$0]  (%p6348_p5), %s7564_s26, 1024, %s7562_s27, %s7572_s17, %s6253_s28, %s6253_s28, %s6254_s11  }
 0x355 PF: > { %p6001_p13 = scmp.ge.s32.totalorder %s6247_s16, 2  ;;  %s4568_s18 = sand.u32 1, %s6235_s13  }
 0x356   : > { %s4569_s29 = scalar_lea.sflag [#allocation4], %s4568_s18 }
 0x357   : > { %p5998_p0 = pnand %p6001_p13, %p6352_p6 }
 0x359   : > { %p5999_p1 = pneg %p5998_p0 }
 0x35b   : > { %6230 = dma.done.wait (%p5999_p1), %s4569_s29, 1024  }
 0x35c   : > { %6232 = vsyncadd (%p5999_p1), %s4569_s29, 4294966272  ;;  %p20_p2 = scmp.ge.s32.totalorder %s6335_s19, 4   ;;  %s7655_s13 = smov %s6239_s14 }
 0x35d   : > { %s7656_s14 = smov %s6243_s15  ;;  %s7657_s15 = smov %s6346_s22 }
 0x35e   : > { %s7658_s16 = smov %s6335_s19  ;;  %22 = sbr.rel (!%p20_p2) target bundleno = 3 (0x3), region = 113 }
 0x363   :  { %4574 = vsyncpa [#allocation4], 1 }
 0x364   :  { %4576 = vsyncpa [#allocation4 + $0x1], 1 }

</bundles_post_ra>
